<compile_context>
chip_gen: v7x
topology: tpu7x:2x2x1
jax: 0.10.0
libtpu: 0.0.40
codegen_flags: <defaults>
</compile_context>

<pallas_src>
import jax
import jax.numpy as jnp
from jax.experimental import pallas as pl
from jax.experimental.pallas import tpu as pltpu


def _make_lateral_kernel(H, W, c_in, c_out, has_proj, lane_dense_out, compute_dtype):
    """Fused LateralBlock kernel for one batch element.

    Ref order: x, w1, b1, a1, w2, b2, a2, [wr, br], out, xpad_scratch, ypad_scratch
      x:            (1, H, W, c_in)
      w1, wr:       (9*c_in,  c_out)   flattened HWIO
      w2:           (9*c_out, c_out)
      b*, a*:       (1, c_out)
      out:          (1, H, W*c_out)    (lane-dense) or (1, H*W, c_out) (fallback)
      xpad/ypad:    VMEM scratch (H+2, W+2, c_in/c_out), zero halo.
    """

    def kernel(*refs):
        if has_proj:
            (x_ref, w1_ref, b1_ref, a1_ref, w2_ref, b2_ref, a2_ref,
             wr_ref, br_ref, o_ref, xpad_ref, ypad_ref) = refs
        else:
            (x_ref, w1_ref, b1_ref, a1_ref, w2_ref, b2_ref, a2_ref,
             o_ref, xpad_ref, ypad_ref) = refs
            wr_ref = br_ref = None

        # ---- stage zero-padded input in VMEM (no HBM pad materialization) ----
        xpad_ref[...] = jnp.zeros_like(xpad_ref)
        xpad_ref[1:H + 1, 1:W + 1, :] = x_ref[0]

        def im2col(pad_ref, c):
            # (H*W, 9*c) im2col matrix; column order (ky, kx, ci) matches the
            # wrapper's weight reshape (3, 3, c, c_out) -> (9*c, c_out).
            taps = []
            for ky in range(3):
                for kx in range(3):
                    taps.append(pad_ref[ky:ky + H, kx:kx + W, :].reshape(H * W, c))
            return jnp.concatenate(taps, axis=-1).astype(compute_dtype)

        lhs_x = im2col(xpad_ref, c_in)                              # (H*W, 9*c_in)

        # ---- conv1 + bias + PReLU (single MXU matmul, f32 accumulate) ----
        y1 = jnp.dot(lhs_x, w1_ref[...], preferred_element_type=jnp.float32)
        y1 = y1 + b1_ref[...]
        y1 = jnp.where(y1 > 0, y1, y1 * a1_ref[...])

        # ---- residual path (reuses the same im2col LHS for the projection conv) ----
        if has_proj:
            res = jnp.dot(lhs_x, wr_ref[...], preferred_element_type=jnp.float32)
            res = res + br_ref[...]
        else:
            res = x_ref[0].reshape(H * W, c_out).astype(jnp.float32)

        # ---- conv2 + bias + PReLU; y1 never leaves VMEM ----
        ypad_ref[...] = jnp.zeros_like(ypad_ref)
        ypad_ref[1:H + 1, 1:W + 1, :] = y1.reshape(H, W, c_out).astype(ypad_ref.dtype)
        lhs_y = im2col(ypad_ref, c_out)                             # (H*W, 9*c_out)
        y2 = jnp.dot(lhs_y, w2_ref[...], preferred_element_type=jnp.float32)
        y2 = y2 + b2_ref[...]
        y2 = jnp.where(y2 > 0, y2, y2 * a2_ref[...])

        out = y2 + res                                              # (H*W, c_out) f32
        if lane_dense_out:
            # lane-dense store: last output dim is W*c_out (=128 in the test case)
            o_ref[...] = out.reshape(1, H, W * c_out).astype(o_ref.dtype)
        else:
            o_ref[...] = out.reshape(1, H * W, c_out).astype(o_ref.dtype)

    return kernel


def _lateral_block_pallas(x, params, ch_in, ch_out, *, compute_dtype, lane_dense_out):
    N, H, W, cin = x.shape
    assert cin == ch_in
    has_proj = ch_in != ch_out

    # Pre-flatten weights / broadcast-shape bias & alpha in the wrapper (free, done once).
    w1 = params["w1"].reshape(9 * ch_in, ch_out).astype(compute_dtype)
    w2 = params["w2"].reshape(9 * ch_out, ch_out).astype(compute_dtype)
    b1 = params["b1"].reshape(1, ch_out).astype(jnp.float32)
    a1 = params["a1"].reshape(1, ch_out).astype(jnp.float32)
    b2 = params["b2"].reshape(1, ch_out).astype(jnp.float32)
    a2 = params["a2"].reshape(1, ch_out).astype(jnp.float32)

    def const_spec(shape):
        return pl.BlockSpec(shape, lambda n: (0,) * len(shape))

    inputs = [x.astype(jnp.float32), w1, b1, a1, w2, b2, a2]
    in_specs = [
        pl.BlockSpec((1, H, W, ch_in), lambda n: (n, 0, 0, 0)),
        const_spec((9 * ch_in, ch_out)),
        const_spec((1, ch_out)),
        const_spec((1, ch_out)),
        const_spec((9 * ch_out, ch_out)),
        const_spec((1, ch_out)),
        const_spec((1, ch_out)),
    ]
    if has_proj:
        wr = params["wr"].reshape(9 * ch_in, ch_out).astype(compute_dtype)
        br = params["br"].reshape(1, ch_out).astype(jnp.float32)
        inputs += [wr, br]
        in_specs += [const_spec((9 * ch_in, ch_out)), const_spec((1, ch_out))]

    if lane_dense_out:
        out_shape = jax.ShapeDtypeStruct((N, H, W * ch_out), jnp.float32)
        out_spec = pl.BlockSpec((1, H, W * ch_out), lambda n: (n, 0, 0))
    else:
        out_shape = jax.ShapeDtypeStruct((N, H * W, ch_out), jnp.float32)
        out_spec = pl.BlockSpec((1, H * W, ch_out), lambda n: (n, 0, 0))

    kernel = _make_lateral_kernel(H, W, ch_in, ch_out, has_proj,
                                  lane_dense_out, compute_dtype)

    out = pl.pallas_call(
        kernel,
        out_shape=out_shape,
        grid=(N,),
        in_specs=in_specs,
        out_specs=out_spec,
        scratch_shapes=[
            pltpu.VMEM((H + 2, W + 2, ch_in), jnp.float32),   # padded x
            pltpu.VMEM((H + 2, W + 2, ch_out), jnp.float32),  # padded y1
        ],
        compiler_params=pltpu.CompilerParams(
            dimension_semantics=("parallel",),
            vmem_limit_bytes=32 * 1024 * 1024,
        ),
    )(*inputs)

    # Both output layouts share the NHWC memory order -> metadata-only reshape.
    return out.reshape(N, H, W, ch_out)


def lateral_block_forward(x, params, ch_in, ch_out, compute_dtype=jnp.float32):
    """x: (N, H, W, ch_in) NHWC.  Returns (N, H, W, ch_out)."""
    try:
        return _lateral_block_pallas(x, params, ch_in, ch_out,
                                     compute_dtype=compute_dtype, lane_dense_out=True)
    except Exception:
        # Some Mosaic versions cannot lower the (H*W, C) -> (H, W*C) lane-merge relayout
        # needed for the lane-dense store; keep the proven channel-minor output layout.
        return _lateral_block_pallas(x, params, ch_in, ch_out,
                                     compute_dtype=compute_dtype, lane_dense_out=False)


def init_lateral_block_params(key, ch_in, ch_out):
    """Deterministic synthetic params matching LateralBlock(ch_in, ch_out)."""
    ks = jax.random.split(key, 6)
    p = {
        "w1": jax.random.normal(ks[0], (3, 3, ch_in, ch_out), jnp.float32) * 0.1,
        "b1": jax.random.normal(ks[1], (ch_out,), jnp.float32) * 0.1,
        "a1": jnp.full((ch_out,), 0.25, jnp.float32),   # PReLU default init
        "w2": jax.random.normal(ks[2], (3, 3, ch_out, ch_out), jnp.float32) * 0.1,
        "b2": jax.random.normal(ks[3], (ch_out,), jnp.float32) * 0.1,
        "a2": jnp.full((ch_out,), 0.25, jnp.float32),
    }
    if ch_in != ch_out:
        p["wr"] = jax.random.normal(ks[4], (3, 3, ch_in, ch_out), jnp.float32) * 0.1
        p["br"] = jax.random.normal(ks[5], (ch_out,), jnp.float32) * 0.1
    return p


# ---------------------- pure-JAX reference for verification -------------------
def _conv_ref(x, w, b):
    y = jax.lax.conv_general_dilated(
        x, w, window_strides=(1, 1), padding="SAME",
        dimension_numbers=("NHWC", "HWIO", "NHWC"))
    return y + b.reshape(1, 1, 1, -1)


def _prelu_ref(x, a):
    return jnp.where(x > 0, x, x * a.reshape(1, 1, 1, -1))


def _lateral_block_ref(x, p, ch_in, ch_out):
    fx = _prelu_ref(_conv_ref(x, p["w1"], p["b1"]), p["a1"])
    fx = _prelu_ref(_conv_ref(fx, p["w2"], p["b2"]), p["a2"])
    res = _conv_ref(x, p["wr"], p["br"]) if ch_in != ch_out else x
    return fx + res


if __name__ == "__main__":
    key = jax.random.PRNGKey(0)
    kx_, kp1, kp2 = jax.random.split(key, 3)

    # Case 1: ch_in != ch_out (projection conv on the skip path), f32 compute.
    N, H, W, ch_in, ch_out = 2, 16, 16, 4, 8
    x = jax.random.normal(kx_, (N, H, W, ch_in), jnp.float32)      # NHWC
    params = init_lateral_block_params(kp1, ch_in, ch_out)
    out = jax.block_until_ready(lateral_block_forward(x, params, ch_in, ch_out))
    ref = _lateral_block_ref(x, params, ch_in, ch_out)
    assert out.shape == (N, H, W, ch_out)
    assert float(jnp.max(jnp.abs(out - ref))) < 1e-4

    # Case 2: ch_in == ch_out (identity residual stays resident in VMEM).
    params2 = init_lateral_block_params(kp2, ch_out, ch_out)
    x2 = jax.random.normal(kx_, (N, H, W, ch_out), jnp.float32)
    out2 = jax.block_until_ready(lateral_block_forward(x2, params2, ch_out, ch_out))
    ref2 = _lateral_block_ref(x2, params2, ch_out, ch_out)
    assert float(jnp.max(jnp.abs(out2 - ref2))) < 1e-4

    # Case 3: bf16 matmul inputs (f32 accumulate / bias / PReLU / residual).
    out3 = jax.block_until_ready(
        lateral_block_forward(x, params, ch_in, ch_out, compute_dtype=jnp.bfloat16))
    assert float(jnp.max(jnp.abs(out3 - ref))) < 1e-1

    print("KERNEL_OK")
</pallas_src>

<mosaic_0001>
module attributes {stable_mosaic.version = 11 : i64} {
  func.func @kernel(%arg0: i32, %arg1: memref<1x16x16x4xf32, #tpu.memory_space<vmem>>, %arg2: memref<36x8xf32, #tpu.memory_space<vmem>>, %arg3: memref<1x8xf32, #tpu.memory_space<vmem>>, %arg4: memref<1x8xf32, #tpu.memory_space<vmem>>, %arg5: memref<72x8xf32, #tpu.memory_space<vmem>>, %arg6: memref<1x8xf32, #tpu.memory_space<vmem>>, %arg7: memref<1x8xf32, #tpu.memory_space<vmem>>, %arg8: memref<36x8xf32, #tpu.memory_space<vmem>>, %arg9: memref<1x8xf32, #tpu.memory_space<vmem>>, %arg10: memref<1x16x128xf32, #tpu.memory_space<vmem>>, %arg11: memref<18x18x4xf32, #tpu.memory_space<vmem>>, %arg12: memref<18x18x8xf32, #tpu.memory_space<vmem>>) attributes {dimension_semantics = [#tpu.dimension_semantics<parallel>], iteration_bounds = array<i64: 2>, scalar_prefetch = 0 : i64, scratch_operands = 2 : i64, tpu.core_type = #tpu.core_type<tc>, window_params = [{transform_indices = @transform_0, window_bounds = array<i64: 1, 16, 16, 4>}, {pipeline_mode = #tpu.pipeline_mode<synchronous>, transform_indices = @transform_1, window_bounds = array<i64: 36, 8>}, {pipeline_mode = #tpu.pipeline_mode<synchronous>, transform_indices = @transform_2, window_bounds = array<i64: 1, 8>}, {pipeline_mode = #tpu.pipeline_mode<synchronous>, transform_indices = @transform_3, window_bounds = array<i64: 1, 8>}, {pipeline_mode = #tpu.pipeline_mode<synchronous>, transform_indices = @transform_4, window_bounds = array<i64: 72, 8>}, {pipeline_mode = #tpu.pipeline_mode<synchronous>, transform_indices = @transform_5, window_bounds = array<i64: 1, 8>}, {pipeline_mode = #tpu.pipeline_mode<synchronous>, transform_indices = @transform_6, window_bounds = array<i64: 1, 8>}, {pipeline_mode = #tpu.pipeline_mode<synchronous>, transform_indices = @transform_7, window_bounds = array<i64: 36, 8>}, {pipeline_mode = #tpu.pipeline_mode<synchronous>, transform_indices = @transform_8, window_bounds = array<i64: 1, 8>}, {transform_indices = @transform_9, window_bounds = array<i64: 1, 16, 128>}]} {
    %cst = arith.constant 0.000000e+00 : f32
    %0 = vector.broadcast %cst : f32 to vector<18x18x4xf32>
    %c0 = arith.constant 0 : index
    %c0_0 = arith.constant 0 : index
    %c0_1 = arith.constant 0 : index
    %1 = vector.load %arg11[%c0, %c0_0, %c0_1] : memref<18x18x4xf32, #tpu.memory_space<vmem>>, vector<18x18x4xf32>
    tpu.vector_store %arg11[%c0, %c0_0, %c0_1], %0 {strides = array<i32>} : memref<18x18x4xf32, #tpu.memory_space<vmem>>, vector<18x18x4xf32>,
    %c0_2 = arith.constant 0 : index
    %c0_3 = arith.constant 0 : index
    %c0_4 = arith.constant 0 : index
    %c0_5 = arith.constant 0 : index
    %2 = vector.load %arg1[%c0_2, %c0_3, %c0_4, %c0_5] : memref<1x16x16x4xf32, #tpu.memory_space<vmem>>, vector<1x16x16x4xf32>
    %3 = vector.shape_cast %2 : vector<1x16x16x4xf32> to vector<16x16x4xf32>
    %c1 = arith.constant 1 : index
    %c1_6 = arith.constant 1 : index
    %c0_7 = arith.constant 0 : index
    %4 = vector.load %arg11[%c1, %c1_6, %c0_7] : memref<18x18x4xf32, #tpu.memory_space<vmem>>, vector<16x16x4xf32>
    tpu.vector_store %arg11[%c1, %c1_6, %c0_7], %3 {strides = array<i32>} : memref<18x18x4xf32, #tpu.memory_space<vmem>>, vector<16x16x4xf32>,
    %c0_8 = arith.constant 0 : index
    %c0_9 = arith.constant 0 : index
    %c0_10 = arith.constant 0 : index
    %5 = vector.load %arg11[%c0_8, %c0_9, %c0_10] : memref<18x18x4xf32, #tpu.memory_space<vmem>>, vector<16x16x4xf32>
    %6 = vector.shape_cast %5 : vector<16x16x4xf32> to vector<256x4xf32>
    %c0_11 = arith.constant 0 : index
    %c1_12 = arith.constant 1 : index
    %c0_13 = arith.constant 0 : index
    %7 = vector.load %arg11[%c0_11, %c1_12, %c0_13] : memref<18x18x4xf32, #tpu.memory_space<vmem>>, vector<16x16x4xf32>
    %8 = vector.shape_cast %7 : vector<16x16x4xf32> to vector<256x4xf32>
    %c0_14 = arith.constant 0 : index
    %c2 = arith.constant 2 : index
    %c0_15 = arith.constant 0 : index
    %9 = vector.load %arg11[%c0_14, %c2, %c0_15] : memref<18x18x4xf32, #tpu.memory_space<vmem>>, vector<16x16x4xf32>
    %10 = vector.shape_cast %9 : vector<16x16x4xf32> to vector<256x4xf32>
    %c1_16 = arith.constant 1 : index
    %c0_17 = arith.constant 0 : index
    %c0_18 = arith.constant 0 : index
    %11 = vector.load %arg11[%c1_16, %c0_17, %c0_18] : memref<18x18x4xf32, #tpu.memory_space<vmem>>, vector<16x16x4xf32>
    %12 = vector.shape_cast %11 : vector<16x16x4xf32> to vector<256x4xf32>
    %c1_19 = arith.constant 1 : index
    %c1_20 = arith.constant 1 : index
    %c0_21 = arith.constant 0 : index
    %13 = vector.load %arg11[%c1_19, %c1_20, %c0_21] : memref<18x18x4xf32, #tpu.memory_space<vmem>>, vector<16x16x4xf32>
    %14 = vector.shape_cast %13 : vector<16x16x4xf32> to vector<256x4xf32>
    %c1_22 = arith.constant 1 : index
    %c2_23 = arith.constant 2 : index
    %c0_24 = arith.constant 0 : index
    %15 = vector.load %arg11[%c1_22, %c2_23, %c0_24] : memref<18x18x4xf32, #tpu.memory_space<vmem>>, vector<16x16x4xf32>
    %16 = vector.shape_cast %15 : vector<16x16x4xf32> to vector<256x4xf32>
    %c2_25 = arith.constant 2 : index
    %c0_26 = arith.constant 0 : index
    %c0_27 = arith.constant 0 : index
    %17 = vector.load %arg11[%c2_25, %c0_26, %c0_27] : memref<18x18x4xf32, #tpu.memory_space<vmem>>, vector<16x16x4xf32>
    %18 = vector.shape_cast %17 : vector<16x16x4xf32> to vector<256x4xf32>
    %c2_28 = arith.constant 2 : index
    %c1_29 = arith.constant 1 : index
    %c0_30 = arith.constant 0 : index
    %19 = vector.load %arg11[%c2_28, %c1_29, %c0_30] : memref<18x18x4xf32, #tpu.memory_space<vmem>>, vector<16x16x4xf32>
    %20 = vector.shape_cast %19 : vector<16x16x4xf32> to vector<256x4xf32>
    %c2_31 = arith.constant 2 : index
    %c2_32 = arith.constant 2 : index
    %c0_33 = arith.constant 0 : index
    %21 = vector.load %arg11[%c2_31, %c2_32, %c0_33] : memref<18x18x4xf32, #tpu.memory_space<vmem>>, vector<16x16x4xf32>
    %22 = vector.shape_cast %21 : vector<16x16x4xf32> to vector<256x4xf32>
    %23 = tpu.concatenate %6, %8, %10, %12, %14, %16, %18, %20, %22 in 1 : vector<256x4xf32>, vector<256x4xf32>, vector<256x4xf32>, vector<256x4xf32>, vector<256x4xf32>, vector<256x4xf32>, vector<256x4xf32>, vector<256x4xf32>, vector<256x4xf32> -> vector<256x36xf32>
    %c0_34 = arith.constant 0 : index
    %c0_35 = arith.constant 0 : index
    %24 = vector.load %arg2[%c0_34, %c0_35] : memref<36x8xf32, #tpu.memory_space<vmem>>, vector<36x8xf32>
    %cst_36 = arith.constant dense<0.000000e+00> : vector<256x8xf32>
    %25 = tpu.matmul %23, %24, %cst_36 {dimension_numbers = #tpu.dot_dimension_numbers<[1], [0], [0], [1], [0, 0, 1, 1], [], []>} : vector<256x36xf32>, vector<36x8xf32>, vector<256x8xf32> -> vector<256x8xf32>
    %c0_37 = arith.constant 0 : index
    %c0_38 = arith.constant 0 : index
    %26 = vector.load %arg3[%c0_37, %c0_38] : memref<1x8xf32, #tpu.memory_space<vmem>>, vector<1x8xf32>
    %27 = vector.broadcast %26 : vector<1x8xf32> to vector<256x8xf32>
    %28 = arith.addf %25, %27 : vector<256x8xf32>
    %cst_39 = arith.constant 0.000000e+00 : f32
    %29 = vector.broadcast %cst_39 : f32 to vector<256x8xf32>
    %30 = arith.cmpf ogt, %28, %29 : vector<256x8xf32>
    %c0_40 = arith.constant 0 : index
    %c0_41 = arith.constant 0 : index
    %31 = vector.load %arg4[%c0_40, %c0_41] : memref<1x8xf32, #tpu.memory_space<vmem>>, vector<1x8xf32>
    %32 = vector.broadcast %31 : vector<1x8xf32> to vector<256x8xf32>
    %33 = arith.mulf %28, %32 : vector<256x8xf32>
    %34 = arith.select %30, %28, %33 : vector<256x8xi1>, vector<256x8xf32>
    %c0_42 = arith.constant 0 : index
    %c0_43 = arith.constant 0 : index
    %35 = vector.load %arg8[%c0_42, %c0_43] : memref<36x8xf32, #tpu.memory_space<vmem>>, vector<36x8xf32>
    %cst_44 = arith.constant dense<0.000000e+00> : vector<256x8xf32>
    %36 = tpu.matmul %23, %35, %cst_44 {dimension_numbers = #tpu.dot_dimension_numbers<[1], [0], [0], [1], [0, 0, 1, 1], [], []>} : vector<256x36xf32>, vector<36x8xf32>, vector<256x8xf32> -> vector<256x8xf32>
    %c0_45 = arith.constant 0 : index
    %c0_46 = arith.constant 0 : index
    %37 = vector.load %arg9[%c0_45, %c0_46] : memref<1x8xf32, #tpu.memory_space<vmem>>, vector<1x8xf32>
    %38 = vector.broadcast %37 : vector<1x8xf32> to vector<256x8xf32>
    %39 = arith.addf %36, %38 : vector<256x8xf32>
    %cst_47 = arith.constant 0.000000e+00 : f32
    %40 = vector.broadcast %cst_47 : f32 to vector<18x18x8xf32>
    %c0_48 = arith.constant 0 : index
    %c0_49 = arith.constant 0 : index
    %c0_50 = arith.constant 0 : index
    %41 = vector.load %arg12[%c0_48, %c0_49, %c0_50] : memref<18x18x8xf32, #tpu.memory_space<vmem>>, vector<18x18x8xf32>
    tpu.vector_store %arg12[%c0_48, %c0_49, %c0_50], %40 {strides = array<i32>} : memref<18x18x8xf32, #tpu.memory_space<vmem>>, vector<18x18x8xf32>,
    %42 = vector.shape_cast %34 : vector<256x8xf32> to vector<16x16x8xf32>
    %c1_51 = arith.constant 1 : index
    %c1_52 = arith.constant 1 : index
    %c0_53 = arith.constant 0 : index
    %43 = vector.load %arg12[%c1_51, %c1_52, %c0_53] : memref<18x18x8xf32, #tpu.memory_space<vmem>>, vector<16x16x8xf32>
    tpu.vector_store %arg12[%c1_51, %c1_52, %c0_53], %42 {strides = array<i32>} : memref<18x18x8xf32, #tpu.memory_space<vmem>>, vector<16x16x8xf32>,
    %c0_54 = arith.constant 0 : index
    %c0_55 = arith.constant 0 : index
    %c0_56 = arith.constant 0 : index
    %44 = vector.load %arg12[%c0_54, %c0_55, %c0_56] : memref<18x18x8xf32, #tpu.memory_space<vmem>>, vector<16x16x8xf32>
    %45 = vector.shape_cast %44 : vector<16x16x8xf32> to vector<256x8xf32>
    %c0_57 = arith.constant 0 : index
    %c1_58 = arith.constant 1 : index
    %c0_59 = arith.constant 0 : index
    %46 = vector.load %arg12[%c0_57, %c1_58, %c0_59] : memref<18x18x8xf32, #tpu.memory_space<vmem>>, vector<16x16x8xf32>
    %47 = vector.shape_cast %46 : vector<16x16x8xf32> to vector<256x8xf32>
    %c0_60 = arith.constant 0 : index
    %c2_61 = arith.constant 2 : index
    %c0_62 = arith.constant 0 : index
    %48 = vector.load %arg12[%c0_60, %c2_61, %c0_62] : memref<18x18x8xf32, #tpu.memory_space<vmem>>, vector<16x16x8xf32>
    %49 = vector.shape_cast %48 : vector<16x16x8xf32> to vector<256x8xf32>
    %c1_63 = arith.constant 1 : index
    %c0_64 = arith.constant 0 : index
    %c0_65 = arith.constant 0 : index
    %50 = vector.load %arg12[%c1_63, %c0_64, %c0_65] : memref<18x18x8xf32, #tpu.memory_space<vmem>>, vector<16x16x8xf32>
    %51 = vector.shape_cast %50 : vector<16x16x8xf32> to vector<256x8xf32>
    %c1_66 = arith.constant 1 : index
    %c1_67 = arith.constant 1 : index
    %c0_68 = arith.constant 0 : index
    %52 = vector.load %arg12[%c1_66, %c1_67, %c0_68] : memref<18x18x8xf32, #tpu.memory_space<vmem>>, vector<16x16x8xf32>
    %53 = vector.shape_cast %52 : vector<16x16x8xf32> to vector<256x8xf32>
    %c1_69 = arith.constant 1 : index
    %c2_70 = arith.constant 2 : index
    %c0_71 = arith.constant 0 : index
    %54 = vector.load %arg12[%c1_69, %c2_70, %c0_71] : memref<18x18x8xf32, #tpu.memory_space<vmem>>, vector<16x16x8xf32>
    %55 = vector.shape_cast %54 : vector<16x16x8xf32> to vector<256x8xf32>
    %c2_72 = arith.constant 2 : index
    %c0_73 = arith.constant 0 : index
    %c0_74 = arith.constant 0 : index
    %56 = vector.load %arg12[%c2_72, %c0_73, %c0_74] : memref<18x18x8xf32, #tpu.memory_space<vmem>>, vector<16x16x8xf32>
    %57 = vector.shape_cast %56 : vector<16x16x8xf32> to vector<256x8xf32>
    %c2_75 = arith.constant 2 : index
    %c1_76 = arith.constant 1 : index
    %c0_77 = arith.constant 0 : index
    %58 = vector.load %arg12[%c2_75, %c1_76, %c0_77] : memref<18x18x8xf32, #tpu.memory_space<vmem>>, vector<16x16x8xf32>
    %59 = vector.shape_cast %58 : vector<16x16x8xf32> to vector<256x8xf32>
    %c2_78 = arith.constant 2 : index
    %c2_79 = arith.constant 2 : index
    %c0_80 = arith.constant 0 : index
    %60 = vector.load %arg12[%c2_78, %c2_79, %c0_80] : memref<18x18x8xf32, #tpu.memory_space<vmem>>, vector<16x16x8xf32>
    %61 = vector.shape_cast %60 : vector<16x16x8xf32> to vector<256x8xf32>
    %62 = tpu.concatenate %45, %47, %49, %51, %53, %55, %57, %59, %61 in 1 : vector<256x8xf32>, vector<256x8xf32>, vector<256x8xf32>, vector<256x8xf32>, vector<256x8xf32>, vector<256x8xf32>, vector<256x8xf32>, vector<256x8xf32>, vector<256x8xf32> -> vector<256x72xf32>
    %c0_81 = arith.constant 0 : index
    %c0_82 = arith.constant 0 : index
    %63 = vector.load %arg5[%c0_81, %c0_82] : memref<72x8xf32, #tpu.memory_space<vmem>>, vector<72x8xf32>
    %cst_83 = arith.constant dense<0.000000e+00> : vector<256x8xf32>
    %64 = tpu.matmul %62, %63, %cst_83 {dimension_numbers = #tpu.dot_dimension_numbers<[1], [0], [0], [1], [0, 0, 1, 1], [], []>} : vector<256x72xf32>, vector<72x8xf32>, vector<256x8xf32> -> vector<256x8xf32>
    %c0_84 = arith.constant 0 : index
    %c0_85 = arith.constant 0 : index
    %65 = vector.load %arg6[%c0_84, %c0_85] : memref<1x8xf32, #tpu.memory_space<vmem>>, vector<1x8xf32>
    %66 = vector.broadcast %65 : vector<1x8xf32> to vector<256x8xf32>
    %67 = arith.addf %64, %66 : vector<256x8xf32>
    %cst_86 = arith.constant 0.000000e+00 : f32
    %68 = vector.broadcast %cst_86 : f32 to vector<256x8xf32>
    %69 = arith.cmpf ogt, %67, %68 : vector<256x8xf32>
    %c0_87 = arith.constant 0 : index
    %c0_88 = arith.constant 0 : index
    %70 = vector.load %arg7[%c0_87, %c0_88] : memref<1x8xf32, #tpu.memory_space<vmem>>, vector<1x8xf32>
    %71 = vector.broadcast %70 : vector<1x8xf32> to vector<256x8xf32>
    %72 = arith.mulf %67, %71 : vector<256x8xf32>
    %73 = arith.select %69, %67, %72 : vector<256x8xi1>, vector<256x8xf32>
    %74 = arith.addf %73, %39 : vector<256x8xf32>
    %75 = vector.shape_cast %74 : vector<256x8xf32> to vector<1x16x128xf32>
    %c0_89 = arith.constant 0 : index
    %c0_90 = arith.constant 0 : index
    %c0_91 = arith.constant 0 : index
    %76 = vector.load %arg10[%c0_89, %c0_90, %c0_91] : memref<1x16x128xf32, #tpu.memory_space<vmem>>, vector<1x16x128xf32>
    tpu.vector_store %arg10[%c0_89, %c0_90, %c0_91], %75 {strides = array<i32>} : memref<1x16x128xf32, #tpu.memory_space<vmem>>, vector<1x16x128xf32>,
    return
  }
  func.func @transform_0(%arg0: i32) -> (i32, i32, i32, i32) {
    %c0_i32 = arith.constant 0 : i32
    %c0_i32_0 = arith.constant 0 : i32
    %c0_i32_1 = arith.constant 0 : i32
    %c0_i32_2 = arith.constant 0 : i32
    return %arg0, %c0_i32, %c0_i32_0, %c0_i32_1 : i32, i32, i32, i32
  }
  func.func @transform_1(%arg0: i32) -> (i32, i32) {
    %c0_i32 = arith.constant 0 : i32
    %c0_i32_0 = arith.constant 0 : i32
    %c0_i32_1 = arith.constant 0 : i32
    return %c0_i32, %c0_i32_0 : i32, i32
  }
  func.func @transform_2(%arg0: i32) -> (i32, i32) {
    %c0_i32 = arith.constant 0 : i32
    %c0_i32_0 = arith.constant 0 : i32
    %c0_i32_1 = arith.constant 0 : i32
    return %c0_i32, %c0_i32_0 : i32, i32
  }
  func.func @transform_3(%arg0: i32) -> (i32, i32) {
    %c0_i32 = arith.constant 0 : i32
    %c0_i32_0 = arith.constant 0 : i32
    %c0_i32_1 = arith.constant 0 : i32
    return %c0_i32, %c0_i32_0 : i32, i32
  }
  func.func @transform_4(%arg0: i32) -> (i32, i32) {
    %c0_i32 = arith.constant 0 : i32
    %c0_i32_0 = arith.constant 0 : i32
    %c0_i32_1 = arith.constant 0 : i32
    return %c0_i32, %c0_i32_0 : i32, i32
  }
  func.func @transform_5(%arg0: i32) -> (i32, i32) {
    %c0_i32 = arith.constant 0 : i32
    %c0_i32_0 = arith.constant 0 : i32
    %c0_i32_1 = arith.constant 0 : i32
    return %c0_i32, %c0_i32_0 : i32, i32
  }
  func.func @transform_6(%arg0: i32) -> (i32, i32) {
    %c0_i32 = arith.constant 0 : i32
    %c0_i32_0 = arith.constant 0 : i32
    %c0_i32_1 = arith.constant 0 : i32
    return %c0_i32, %c0_i32_0 : i32, i32
  }
  func.func @transform_7(%arg0: i32) -> (i32, i32) {
    %c0_i32 = arith.constant 0 : i32
    %c0_i32_0 = arith.constant 0 : i32
    %c0_i32_1 = arith.constant 0 : i32
    return %c0_i32, %c0_i32_0 : i32, i32
  }
  func.func @transform_8(%arg0: i32) -> (i32, i32) {
    %c0_i32 = arith.constant 0 : i32
    %c0_i32_0 = arith.constant 0 : i32
    %c0_i32_1 = arith.constant 0 : i32
    return %c0_i32, %c0_i32_0 : i32, i32
  }
  func.func @transform_9(%arg0: i32) -> (i32, i32, i32) {
    %c0_i32 = arith.constant 0 : i32
    %c0_i32_0 = arith.constant 0 : i32
    %c0_i32_1 = arith.constant 0 : i32
    return %arg0, %c0_i32, %c0_i32_0 : i32, i32, i32
  }
}

module attributes {stable_mosaic.version = 11 : i64} {
  func.func @kernel(%arg0: i32, %arg1: memref<1x16x16x4xf32, #tpu.memory_space<vmem>>, %arg2: memref<36x8xf32, #tpu.memory_space<vmem>>, %arg3: memref<1x8xf32, #tpu.memory_space<vmem>>, %arg4: memref<1x8xf32, #tpu.memory_space<vmem>>, %arg5: memref<72x8xf32, #tpu.memory_space<vmem>>, %arg6: memref<1x8xf32, #tpu.memory_space<vmem>>, %arg7: memref<1x8xf32, #tpu.memory_space<vmem>>, %arg8: memref<36x8xf32, #tpu.memory_space<vmem>>, %arg9: memref<1x8xf32, #tpu.memory_space<vmem>>, %arg10: memref<1x256x8xf32, #tpu.memory_space<vmem>>, %arg11: memref<18x18x4xf32, #tpu.memory_space<vmem>>, %arg12: memref<18x18x8xf32, #tpu.memory_space<vmem>>) attributes {dimension_semantics = [#tpu.dimension_semantics<parallel>], iteration_bounds = array<i64: 2>, scalar_prefetch = 0 : i64, scratch_operands = 2 : i64, tpu.core_type = #tpu.core_type<tc>, window_params = [{transform_indices = @transform_0, window_bounds = array<i64: 1, 16, 16, 4>}, {pipeline_mode = #tpu.pipeline_mode<synchronous>, transform_indices = @transform_1, window_bounds = array<i64: 36, 8>}, {pipeline_mode = #tpu.pipeline_mode<synchronous>, transform_indices = @transform_2, window_bounds = array<i64: 1, 8>}, {pipeline_mode = #tpu.pipeline_mode<synchronous>, transform_indices = @transform_3, window_bounds = array<i64: 1, 8>}, {pipeline_mode = #tpu.pipeline_mode<synchronous>, transform_indices = @transform_4, window_bounds = array<i64: 72, 8>}, {pipeline_mode = #tpu.pipeline_mode<synchronous>, transform_indices = @transform_5, window_bounds = array<i64: 1, 8>}, {pipeline_mode = #tpu.pipeline_mode<synchronous>, transform_indices = @transform_6, window_bounds = array<i64: 1, 8>}, {pipeline_mode = #tpu.pipeline_mode<synchronous>, transform_indices = @transform_7, window_bounds = array<i64: 36, 8>}, {pipeline_mode = #tpu.pipeline_mode<synchronous>, transform_indices = @transform_8, window_bounds = array<i64: 1, 8>}, {transform_indices = @transform_9, window_bounds = array<i64: 1, 256, 8>}]} {
    %cst = arith.constant 0.000000e+00 : f32
    %0 = vector.broadcast %cst : f32 to vector<18x18x4xf32>
    %c0 = arith.constant 0 : index
    %c0_0 = arith.constant 0 : index
    %c0_1 = arith.constant 0 : index
    %1 = vector.load %arg11[%c0, %c0_0, %c0_1] : memref<18x18x4xf32, #tpu.memory_space<vmem>>, vector<18x18x4xf32>
    tpu.vector_store %arg11[%c0, %c0_0, %c0_1], %0 {strides = array<i32>} : memref<18x18x4xf32, #tpu.memory_space<vmem>>, vector<18x18x4xf32>,
    %c0_2 = arith.constant 0 : index
    %c0_3 = arith.constant 0 : index
    %c0_4 = arith.constant 0 : index
    %c0_5 = arith.constant 0 : index
    %2 = vector.load %arg1[%c0_2, %c0_3, %c0_4, %c0_5] : memref<1x16x16x4xf32, #tpu.memory_space<vmem>>, vector<1x16x16x4xf32>
    %3 = vector.shape_cast %2 : vector<1x16x16x4xf32> to vector<16x16x4xf32>
    %c1 = arith.constant 1 : index
    %c1_6 = arith.constant 1 : index
    %c0_7 = arith.constant 0 : index
    %4 = vector.load %arg11[%c1, %c1_6, %c0_7] : memref<18x18x4xf32, #tpu.memory_space<vmem>>, vector<16x16x4xf32>
    tpu.vector_store %arg11[%c1, %c1_6, %c0_7], %3 {strides = array<i32>} : memref<18x18x4xf32, #tpu.memory_space<vmem>>, vector<16x16x4xf32>,
    %c0_8 = arith.constant 0 : index
    %c0_9 = arith.constant 0 : index
    %c0_10 = arith.constant 0 : index
    %5 = vector.load %arg11[%c0_8, %c0_9, %c0_10] : memref<18x18x4xf32, #tpu.memory_space<vmem>>, vector<16x16x4xf32>
    %6 = vector.shape_cast %5 : vector<16x16x4xf32> to vector<256x4xf32>
    %c0_11 = arith.constant 0 : index
    %c1_12 = arith.constant 1 : index
    %c0_13 = arith.constant 0 : index
    %7 = vector.load %arg11[%c0_11, %c1_12, %c0_13] : memref<18x18x4xf32, #tpu.memory_space<vmem>>, vector<16x16x4xf32>
    %8 = vector.shape_cast %7 : vector<16x16x4xf32> to vector<256x4xf32>
    %c0_14 = arith.constant 0 : index
    %c2 = arith.constant 2 : index
    %c0_15 = arith.constant 0 : index
    %9 = vector.load %arg11[%c0_14, %c2, %c0_15] : memref<18x18x4xf32, #tpu.memory_space<vmem>>, vector<16x16x4xf32>
    %10 = vector.shape_cast %9 : vector<16x16x4xf32> to vector<256x4xf32>
    %c1_16 = arith.constant 1 : index
    %c0_17 = arith.constant 0 : index
    %c0_18 = arith.constant 0 : index
    %11 = vector.load %arg11[%c1_16, %c0_17, %c0_18] : memref<18x18x4xf32, #tpu.memory_space<vmem>>, vector<16x16x4xf32>
    %12 = vector.shape_cast %11 : vector<16x16x4xf32> to vector<256x4xf32>
    %c1_19 = arith.constant 1 : index
    %c1_20 = arith.constant 1 : index
    %c0_21 = arith.constant 0 : index
    %13 = vector.load %arg11[%c1_19, %c1_20, %c0_21] : memref<18x18x4xf32, #tpu.memory_space<vmem>>, vector<16x16x4xf32>
    %14 = vector.shape_cast %13 : vector<16x16x4xf32> to vector<256x4xf32>
    %c1_22 = arith.constant 1 : index
    %c2_23 = arith.constant 2 : index
    %c0_24 = arith.constant 0 : index
    %15 = vector.load %arg11[%c1_22, %c2_23, %c0_24] : memref<18x18x4xf32, #tpu.memory_space<vmem>>, vector<16x16x4xf32>
    %16 = vector.shape_cast %15 : vector<16x16x4xf32> to vector<256x4xf32>
    %c2_25 = arith.constant 2 : index
    %c0_26 = arith.constant 0 : index
    %c0_27 = arith.constant 0 : index
    %17 = vector.load %arg11[%c2_25, %c0_26, %c0_27] : memref<18x18x4xf32, #tpu.memory_space<vmem>>, vector<16x16x4xf32>
    %18 = vector.shape_cast %17 : vector<16x16x4xf32> to vector<256x4xf32>
    %c2_28 = arith.constant 2 : index
    %c1_29 = arith.constant 1 : index
    %c0_30 = arith.constant 0 : index
    %19 = vector.load %arg11[%c2_28, %c1_29, %c0_30] : memref<18x18x4xf32, #tpu.memory_space<vmem>>, vector<16x16x4xf32>
    %20 = vector.shape_cast %19 : vector<16x16x4xf32> to vector<256x4xf32>
    %c2_31 = arith.constant 2 : index
    %c2_32 = arith.constant 2 : index
    %c0_33 = arith.constant 0 : index
    %21 = vector.load %arg11[%c2_31, %c2_32, %c0_33] : memref<18x18x4xf32, #tpu.memory_space<vmem>>, vector<16x16x4xf32>
    %22 = vector.shape_cast %21 : vector<16x16x4xf32> to vector<256x4xf32>
    %23 = tpu.concatenate %6, %8, %10, %12, %14, %16, %18, %20, %22 in 1 : vector<256x4xf32>, vector<256x4xf32>, vector<256x4xf32>, vector<256x4xf32>, vector<256x4xf32>, vector<256x4xf32>, vector<256x4xf32>, vector<256x4xf32>, vector<256x4xf32> -> vector<256x36xf32>
    %c0_34 = arith.constant 0 : index
    %c0_35 = arith.constant 0 : index
    %24 = vector.load %arg2[%c0_34, %c0_35] : memref<36x8xf32, #tpu.memory_space<vmem>>, vector<36x8xf32>
    %cst_36 = arith.constant dense<0.000000e+00> : vector<256x8xf32>
    %25 = tpu.matmul %23, %24, %cst_36 {dimension_numbers = #tpu.dot_dimension_numbers<[1], [0], [0], [1], [0, 0, 1, 1], [], []>} : vector<256x36xf32>, vector<36x8xf32>, vector<256x8xf32> -> vector<256x8xf32>
    %c0_37 = arith.constant 0 : index
    %c0_38 = arith.constant 0 : index
    %26 = vector.load %arg3[%c0_37, %c0_38] : memref<1x8xf32, #tpu.memory_space<vmem>>, vector<1x8xf32>
    %27 = vector.broadcast %26 : vector<1x8xf32> to vector<256x8xf32>
    %28 = arith.addf %25, %27 : vector<256x8xf32>
    %cst_39 = arith.constant 0.000000e+00 : f32
    %29 = vector.broadcast %cst_39 : f32 to vector<256x8xf32>
    %30 = arith.cmpf ogt, %28, %29 : vector<256x8xf32>
    %c0_40 = arith.constant 0 : index
    %c0_41 = arith.constant 0 : index
    %31 = vector.load %arg4[%c0_40, %c0_41] : memref<1x8xf32, #tpu.memory_space<vmem>>, vector<1x8xf32>
    %32 = vector.broadcast %31 : vector<1x8xf32> to vector<256x8xf32>
    %33 = arith.mulf %28, %32 : vector<256x8xf32>
    %34 = arith.select %30, %28, %33 : vector<256x8xi1>, vector<256x8xf32>
    %c0_42 = arith.constant 0 : index
    %c0_43 = arith.constant 0 : index
    %35 = vector.load %arg8[%c0_42, %c0_43] : memref<36x8xf32, #tpu.memory_space<vmem>>, vector<36x8xf32>
    %cst_44 = arith.constant dense<0.000000e+00> : vector<256x8xf32>
    %36 = tpu.matmul %23, %35, %cst_44 {dimension_numbers = #tpu.dot_dimension_numbers<[1], [0], [0], [1], [0, 0, 1, 1], [], []>} : vector<256x36xf32>, vector<36x8xf32>, vector<256x8xf32> -> vector<256x8xf32>
    %c0_45 = arith.constant 0 : index
    %c0_46 = arith.constant 0 : index
    %37 = vector.load %arg9[%c0_45, %c0_46] : memref<1x8xf32, #tpu.memory_space<vmem>>, vector<1x8xf32>
    %38 = vector.broadcast %37 : vector<1x8xf32> to vector<256x8xf32>
    %39 = arith.addf %36, %38 : vector<256x8xf32>
    %cst_47 = arith.constant 0.000000e+00 : f32
    %40 = vector.broadcast %cst_47 : f32 to vector<18x18x8xf32>
    %c0_48 = arith.constant 0 : index
    %c0_49 = arith.constant 0 : index
    %c0_50 = arith.constant 0 : index
    %41 = vector.load %arg12[%c0_48, %c0_49, %c0_50] : memref<18x18x8xf32, #tpu.memory_space<vmem>>, vector<18x18x8xf32>
    tpu.vector_store %arg12[%c0_48, %c0_49, %c0_50], %40 {strides = array<i32>} : memref<18x18x8xf32, #tpu.memory_space<vmem>>, vector<18x18x8xf32>,
    %42 = vector.shape_cast %34 : vector<256x8xf32> to vector<16x16x8xf32>
    %c1_51 = arith.constant 1 : index
    %c1_52 = arith.constant 1 : index
    %c0_53 = arith.constant 0 : index
    %43 = vector.load %arg12[%c1_51, %c1_52, %c0_53] : memref<18x18x8xf32, #tpu.memory_space<vmem>>, vector<16x16x8xf32>
    tpu.vector_store %arg12[%c1_51, %c1_52, %c0_53], %42 {strides = array<i32>} : memref<18x18x8xf32, #tpu.memory_space<vmem>>, vector<16x16x8xf32>,
    %c0_54 = arith.constant 0 : index
    %c0_55 = arith.constant 0 : index
    %c0_56 = arith.constant 0 : index
    %44 = vector.load %arg12[%c0_54, %c0_55, %c0_56] : memref<18x18x8xf32, #tpu.memory_space<vmem>>, vector<16x16x8xf32>
    %45 = vector.shape_cast %44 : vector<16x16x8xf32> to vector<256x8xf32>
    %c0_57 = arith.constant 0 : index
    %c1_58 = arith.constant 1 : index
    %c0_59 = arith.constant 0 : index
    %46 = vector.load %arg12[%c0_57, %c1_58, %c0_59] : memref<18x18x8xf32, #tpu.memory_space<vmem>>, vector<16x16x8xf32>
    %47 = vector.shape_cast %46 : vector<16x16x8xf32> to vector<256x8xf32>
    %c0_60 = arith.constant 0 : index
    %c2_61 = arith.constant 2 : index
    %c0_62 = arith.constant 0 : index
    %48 = vector.load %arg12[%c0_60, %c2_61, %c0_62] : memref<18x18x8xf32, #tpu.memory_space<vmem>>, vector<16x16x8xf32>
    %49 = vector.shape_cast %48 : vector<16x16x8xf32> to vector<256x8xf32>
    %c1_63 = arith.constant 1 : index
    %c0_64 = arith.constant 0 : index
    %c0_65 = arith.constant 0 : index
    %50 = vector.load %arg12[%c1_63, %c0_64, %c0_65] : memref<18x18x8xf32, #tpu.memory_space<vmem>>, vector<16x16x8xf32>
    %51 = vector.shape_cast %50 : vector<16x16x8xf32> to vector<256x8xf32>
    %c1_66 = arith.constant 1 : index
    %c1_67 = arith.constant 1 : index
    %c0_68 = arith.constant 0 : index
    %52 = vector.load %arg12[%c1_66, %c1_67, %c0_68] : memref<18x18x8xf32, #tpu.memory_space<vmem>>, vector<16x16x8xf32>
    %53 = vector.shape_cast %52 : vector<16x16x8xf32> to vector<256x8xf32>
    %c1_69 = arith.constant 1 : index
    %c2_70 = arith.constant 2 : index
    %c0_71 = arith.constant 0 : index
    %54 = vector.load %arg12[%c1_69, %c2_70, %c0_71] : memref<18x18x8xf32, #tpu.memory_space<vmem>>, vector<16x16x8xf32>
    %55 = vector.shape_cast %54 : vector<16x16x8xf32> to vector<256x8xf32>
    %c2_72 = arith.constant 2 : index
    %c0_73 = arith.constant 0 : index
    %c0_74 = arith.constant 0 : index
    %56 = vector.load %arg12[%c2_72, %c0_73, %c0_74] : memref<18x18x8xf32, #tpu.memory_space<vmem>>, vector<16x16x8xf32>
    %57 = vector.shape_cast %56 : vector<16x16x8xf32> to vector<256x8xf32>
    %c2_75 = arith.constant 2 : index
    %c1_76 = arith.constant 1 : index
    %c0_77 = arith.constant 0 : index
    %58 = vector.load %arg12[%c2_75, %c1_76, %c0_77] : memref<18x18x8xf32, #tpu.memory_space<vmem>>, vector<16x16x8xf32>
    %59 = vector.shape_cast %58 : vector<16x16x8xf32> to vector<256x8xf32>
    %c2_78 = arith.constant 2 : index
    %c2_79 = arith.constant 2 : index
    %c0_80 = arith.constant 0 : index
    %60 = vector.load %arg12[%c2_78, %c2_79, %c0_80] : memref<18x18x8xf32, #tpu.memory_space<vmem>>, vector<16x16x8xf32>
    %61 = vector.shape_cast %60 : vector<16x16x8xf32> to vector<256x8xf32>
    %62 = tpu.concatenate %45, %47, %49, %51, %53, %55, %57, %59, %61 in 1 : vector<256x8xf32>, vector<256x8xf32>, vector<256x8xf32>, vector<256x8xf32>, vector<256x8xf32>, vector<256x8xf32>, vector<256x8xf32>, vector<256x8xf32>, vector<256x8xf32> -> vector<256x72xf32>
    %c0_81 = arith.constant 0 : index
    %c0_82 = arith.constant 0 : index
    %63 = vector.load %arg5[%c0_81, %c0_82] : memref<72x8xf32, #tpu.memory_space<vmem>>, vector<72x8xf32>
    %cst_83 = arith.constant dense<0.000000e+00> : vector<256x8xf32>
    %64 = tpu.matmul %62, %63, %cst_83 {dimension_numbers = #tpu.dot_dimension_numbers<[1], [0], [0], [1], [0, 0, 1, 1], [], []>} : vector<256x72xf32>, vector<72x8xf32>, vector<256x8xf32> -> vector<256x8xf32>
    %c0_84 = arith.constant 0 : index
    %c0_85 = arith.constant 0 : index
    %65 = vector.load %arg6[%c0_84, %c0_85] : memref<1x8xf32, #tpu.memory_space<vmem>>, vector<1x8xf32>
    %66 = vector.broadcast %65 : vector<1x8xf32> to vector<256x8xf32>
    %67 = arith.addf %64, %66 : vector<256x8xf32>
    %cst_86 = arith.constant 0.000000e+00 : f32
    %68 = vector.broadcast %cst_86 : f32 to vector<256x8xf32>
    %69 = arith.cmpf ogt, %67, %68 : vector<256x8xf32>
    %c0_87 = arith.constant 0 : index
    %c0_88 = arith.constant 0 : index
    %70 = vector.load %arg7[%c0_87, %c0_88] : memref<1x8xf32, #tpu.memory_space<vmem>>, vector<1x8xf32>
    %71 = vector.broadcast %70 : vector<1x8xf32> to vector<256x8xf32>
    %72 = arith.mulf %67, %71 : vector<256x8xf32>
    %73 = arith.select %69, %67, %72 : vector<256x8xi1>, vector<256x8xf32>
    %74 = arith.addf %73, %39 : vector<256x8xf32>
    %75 = vector.shape_cast %74 : vector<256x8xf32> to vector<1x256x8xf32>
    %c0_89 = arith.constant 0 : index
    %c0_90 = arith.constant 0 : index
    %c0_91 = arith.constant 0 : index
    %76 = vector.load %arg10[%c0_89, %c0_90, %c0_91] : memref<1x256x8xf32, #tpu.memory_space<vmem>>, vector<1x256x8xf32>
    tpu.vector_store %arg10[%c0_89, %c0_90, %c0_91], %75 {strides = array<i32>} : memref<1x256x8xf32, #tpu.memory_space<vmem>>, vector<1x256x8xf32>,
    return
  }
  func.func @transform_0(%arg0: i32) -> (i32, i32, i32, i32) {
    %c0_i32 = arith.constant 0 : i32
    %c0_i32_0 = arith.constant 0 : i32
    %c0_i32_1 = arith.constant 0 : i32
    %c0_i32_2 = arith.constant 0 : i32
    return %arg0, %c0_i32, %c0_i32_0, %c0_i32_1 : i32, i32, i32, i32
  }
  func.func @transform_1(%arg0: i32) -> (i32, i32) {
    %c0_i32 = arith.constant 0 : i32
    %c0_i32_0 = arith.constant 0 : i32
    %c0_i32_1 = arith.constant 0 : i32
    return %c0_i32, %c0_i32_0 : i32, i32
  }
  func.func @transform_2(%arg0: i32) -> (i32, i32) {
    %c0_i32 = arith.constant 0 : i32
    %c0_i32_0 = arith.constant 0 : i32
    %c0_i32_1 = arith.constant 0 : i32
    return %c0_i32, %c0_i32_0 : i32, i32
  }
  func.func @transform_3(%arg0: i32) -> (i32, i32) {
    %c0_i32 = arith.constant 0 : i32
    %c0_i32_0 = arith.constant 0 : i32
    %c0_i32_1 = arith.constant 0 : i32
    return %c0_i32, %c0_i32_0 : i32, i32
  }
  func.func @transform_4(%arg0: i32) -> (i32, i32) {
    %c0_i32 = arith.constant 0 : i32
    %c0_i32_0 = arith.constant 0 : i32
    %c0_i32_1 = arith.constant 0 : i32
    return %c0_i32, %c0_i32_0 : i32, i32
  }
  func.func @transform_5(%arg0: i32) -> (i32, i32) {
    %c0_i32 = arith.constant 0 : i32
    %c0_i32_0 = arith.constant 0 : i32
    %c0_i32_1 = arith.constant 0 : i32
    return %c0_i32, %c0_i32_0 : i32, i32
  }
  func.func @transform_6(%arg0: i32) -> (i32, i32) {
    %c0_i32 = arith.constant 0 : i32
    %c0_i32_0 = arith.constant 0 : i32
    %c0_i32_1 = arith.constant 0 : i32
    return %c0_i32, %c0_i32_0 : i32, i32
  }
  func.func @transform_7(%arg0: i32) -> (i32, i32) {
    %c0_i32 = arith.constant 0 : i32
    %c0_i32_0 = arith.constant 0 : i32
    %c0_i32_1 = arith.constant 0 : i32
    return %c0_i32, %c0_i32_0 : i32, i32
  }
  func.func @transform_8(%arg0: i32) -> (i32, i32) {
    %c0_i32 = arith.constant 0 : i32
    %c0_i32_0 = arith.constant 0 : i32
    %c0_i32_1 = arith.constant 0 : i32
    return %c0_i32, %c0_i32_0 : i32, i32
  }
  func.func @transform_9(%arg0: i32) -> (i32, i32, i32) {
    %c0_i32 = arith.constant 0 : i32
    %c0_i32_0 = arith.constant 0 : i32
    %c0_i32_1 = arith.constant 0 : i32
    return %arg0, %c0_i32, %c0_i32_0 : i32, i32, i32
  }
}

</mosaic_0001>

<bundles_post_ra>
// kernel: tpu_custom_call.1
= control target key start
LH: loop header
LB: loop body
LE: loop exit
PB: predicated region body
PF: predicated region fallthrough
CT: control target
= control target key end

     0   :  { %s5512_s30 = smov 0   ;;  %s8956_s0 = inlined_call_operand.vmem [shape: f32[2,16,16,4], index: 0, kind: input, shape index: {}]   ;;  %s8957_s1 = inlined_call_operand.vmem [shape: f32[36,8], index: 1, kind: input, shape index: {}]   ;;  %s8958_s2 = inlined_call_operand.vmem [shape: f32[1,8], index: 2, kind: input, shape index: {}]   ;;  %s8959_s3 = inlined_call_operand.vmem [shape: f32[1,8], index: 3, kind: input, shape index: {}]   ;;  %s8960_s4 = inlined_call_operand.vmem [shape: f32[72,8], index: 4, kind: input, shape index: {}]   ;;  %s8961_s5 = inlined_call_operand.vmem [shape: f32[1,8], index: 5, kind: input, shape index: {}]   ;;  %s8962_s6 = inlined_call_operand.vmem [shape: f32[1,8], index: 6, kind: input, shape index: {}]   ;;  %s8963_s7 = inlined_call_operand.vmem [shape: f32[36,8], index: 7, kind: input, shape index: {}]   ;;  %s8964_s8 = inlined_call_operand.vmem [shape: f32[1,8], index: 8, kind: input, shape index: {}]   ;;  %s8965_s9 = inlined_call_operand.vmem [shape: f32[2,256,8], index: 9, kind: output, shape index: {}]  }
   0x1 LB: > { %s4932_s10 = sadd.s32 4294967295, %s5447_s30   ;;  %p4936_p0 = scmp.ge.s32.totalorder %s5447_s30, 1  ;;  %s5447_s30 = sphi %s5512_s30, %s19_s30  }
   0x2   : > { %p287_p1 = scmp.lt.s32.totalorder %s5447_s30, 3 }
   0x4   : > { %p288_p2 = pnand %p4936_p0, %p287_p1 }
   0x6   : > { %291 = sbr.rel (%p288_p2) target bundleno = 1677 (0x68d), region = 56 }
   0xd   : > { %vm333_vm0 = vcmask 31744   ;;  %vm336_vm1 = vcmask 25600   ;;  %p5522_p3 = scmp.lt.s32.totalorder %s4932_s10, 1  ;;  %v8966_v0 = vmov 0.0   ;;  %s5450_s16 = smov 4   ;;  %vm1799_vm2 = vcmask 64512  }
   0xe   : > { %334 = vst.msk [vmem:[#allocation2] sm:$0xff] %vm333_vm0, %v8966_v0  ;;  %335 = vst.msk [vmem:[#allocation2 + $0x8] sm:$0xff] %vm333_vm0, %v8966_v0  ;;  %s5451_s17 = smov 8   ;;  %s5452_s18 = smov 12   ;;  %vm2139_vm3 = vcmask 1043456   ;;  %vm1832_vm4 = vcmask 97280  }
   0xf   : > { %338 = vst.msk [vmem:[#allocation2 + $0x18] sm:$0xff] %vm333_vm0, %v8966_v0  ;;  %339 = vst.msk [vmem:[#allocation2 + $0x20] sm:$0xff] %vm333_vm0, %v8966_v0  ;;  %s9535_s10 = smov (!%p5522_p3, %s4932_s10), 1  ;;  %s5453_s19 = smov 16   ;;  %vm1865_vm5 = vcmask 130048   ;;  %vm1898_vm6 = vcmask 162816  }
  0x10   : > { %341 = vst.msk [vmem:[#allocation2 + $0x30] sm:$0xff] %vm333_vm0, %v8966_v0  ;;  %342 = vst.msk [vmem:[#allocation2 + $0x38] sm:$0xff] %vm333_vm0, %v8966_v0  ;;  %s5046_s12 = sshll.u32 %s9535_s10, 8  ;;  %s5454_s20 = smov 20   ;;  %vm1931_vm7 = vcmask 195584   ;;  %vm1964_vm8 = vcmask 228352  }
  0x11   : > { %344 = vst.msk [vmem:[#allocation2 + $0x48] sm:$0xff] %vm333_vm0, %v8966_v0  ;;  %345 = vst.msk [vmem:[#allocation2 + $0x50] sm:$0xff] %vm333_vm0, %v8966_v0  ;;  %s5646_s15 = scalar_lea.vmem %s8956_s0, %s5046_s12  ;;  %s5455_s21 = smov 24   ;;  %vm1997_vm9 = vcmask 261120   ;;  %vm2042_vm10 = vcmask 293888   ;;  %vm2713_vm11 = vcmask 58368  }
  0x12   : > { %347 = vst.msk [vmem:[#allocation2 + $0x60] sm:$0xff] %vm333_vm0, %v8966_v0  ;;  %348 = vst.msk [vmem:[#allocation2 + $0x68] sm:$0xff] %vm333_vm0, %v8966_v0  ;;  %v389_v1 = vld [vmem:[%s5646_s15] sm:$0xff]  ;;  %v391_v2 = vld [vmem:[%s5646_s15 + $0x10] sm:$0xff]  ;;  %s5456_s14 = smov 28   ;;  %s5458_s13 = smov 40  }
  0x13   : > { %350 = vst.msk [vmem:[#allocation2 + $0x78] sm:$0xff] %vm333_vm0, %v8966_v0  ;;  %351 = vst.msk [vmem:[#allocation2 + $0x80] sm:$0xff] %vm333_vm0, %v8966_v0  ;;  %v390_v3 = vld [vmem:[%s5646_s15 + $0x8] sm:$0xff]  ;;  %v393_v4 = vld [vmem:[%s5646_s15 + $0x20] sm:$0xff]  ;;  %s5460_s23 = smov 56   ;;  %s5461_s24 = smov 64  }
  0x14   : > { %353 = vst.msk [vmem:[#allocation2 + $0x90] sm:$0xff] %vm333_vm0, %v8966_v0  ;;  %354 = vst.msk [vmem:[#allocation2 + $0x98] sm:$0xff] %vm333_vm0, %v8966_v0  ;;  %v392_v5 = vld [vmem:[%s5646_s15 + $0x18] sm:$0xff]  ;;  %v395_v6 = vld [vmem:[%s5646_s15 + $0x30] sm:$0xff] }
  0x15   : > { %356 = vst.msk [vmem:[#allocation2 + $0xa8] sm:$0xff] %vm333_vm0, %v8966_v0  ;;  %357 = vst.msk [vmem:[#allocation2 + $0xb0] sm:$0xff] %vm333_vm0, %v8966_v0  ;;  %v486_v7 = vld [vmem:[#allocation2 + $0x1] sm:$0xff]  ;;  %v396_v11 = vld [vmem:[%s5646_s15 + $0x38] sm:$0xff] }
  0x16   : > { %359 = vst.msk [vmem:[#allocation2 + $0xc0] sm:$0xff] %vm333_vm0, %v8966_v0  ;;  %360 = vst.msk [vmem:[#allocation2 + $0xc8] sm:$0xff] %vm333_vm0, %v8966_v0  ;;  %v394_v9 = vld [vmem:[%s5646_s15 + $0x28] sm:$0xff]  ;;  %775 = vrot.lane.b32.xlu0 %v486_v7, %s5450_s16  ;;  %v397_v10 = vld [vmem:[%s5646_s15 + $0x40] sm:$0xff] }
  0x17   : > { %362 = vst.msk [vmem:[#allocation2 + $0xd8] sm:$0xff] %vm333_vm0, %v8966_v0  ;;  %363 = vst.msk [vmem:[#allocation2 + $0xe0] sm:$0xff] %vm333_vm0, %v8966_v0  ;;  %v399_v12 = vld [vmem:[%s5646_s15 + $0x50] sm:$0xff]  ;;  %v398_v13 = vld [vmem:[%s5646_s15 + $0x48] sm:$0xff] }
  0x18   : > { %365 = vst.msk [vmem:[#allocation2 + $0xf0] sm:$0xff] %vm333_vm0, %v8966_v0  ;;  %366 = vst.msk [vmem:[#allocation2 + $0xf8] sm:$0xff] %vm333_vm0, %v8966_v0  ;;  %v401_v14 = vld [vmem:[%s5646_s15 + $0x60] sm:$0xff]  ;;  %v400_v15 = vld [vmem:[%s5646_s15 + $0x58] sm:$0xff] }
  0x19   : > { %368 = vst.msk [vmem:[#allocation2 + $0x108] sm:$0xff] %vm333_vm0, %v8966_v0  ;;  %369 = vst.msk [vmem:[#allocation2 + $0x110] sm:$0xff] %vm333_vm0, %v8966_v0  ;;  %v403_v16 = vld [vmem:[%s5646_s15 + $0x70] sm:$0xff]  ;;  %v402_v17 = vld [vmem:[%s5646_s15 + $0x68] sm:$0xff] }
  0x1a   : > { %371 = vst.msk [vmem:[#allocation2 + $0x120] sm:$0xff] %vm333_vm0, %v8966_v0  ;;  %372 = vst.msk [vmem:[#allocation2 + $0x128] sm:$0xff] %vm333_vm0, %v8966_v0  ;;  %v405_v18 = vld [vmem:[%s5646_s15 + $0x80] sm:$0xff]  ;;  %v404_v19 = vld [vmem:[%s5646_s15 + $0x78] sm:$0xff] }
  0x1b   : > { %374 = vst.msk [vmem:[#allocation2 + $0x138] sm:$0xff] %vm333_vm0, %v8966_v0  ;;  %375 = vst.msk [vmem:[#allocation2 + $0x140] sm:$0xff] %vm333_vm0, %v8966_v0  ;;  %v407_v20 = vld [vmem:[%s5646_s15 + $0x90] sm:$0xff]  ;;  %v406_v21 = vld [vmem:[%s5646_s15 + $0x88] sm:$0xff] }
  0x1c   : > { %377 = vst.msk [vmem:[#allocation2 + $0x150] sm:$0xff] %vm333_vm0, %v8966_v0  ;;  %378 = vst.msk [vmem:[#allocation2 + $0x158] sm:$0xff] %vm333_vm0, %v8966_v0  ;;  %v409_v22 = vld [vmem:[%s5646_s15 + $0xa0] sm:$0xff]  ;;  %v408_v23 = vld [vmem:[%s5646_s15 + $0x98] sm:$0xff] }
  0x1d   : > { %380 = vst.msk [vmem:[#allocation2 + $0x168] sm:$0xff] %vm333_vm0, %v8966_v0  ;;  %381 = vst.msk [vmem:[#allocation2 + $0x170] sm:$0xff] %vm333_vm0, %v8966_v0  ;;  %v411_v24 = vld [vmem:[%s5646_s15 + $0xb0] sm:$0xff]  ;;  %v410_v28 = vld [vmem:[%s5646_s15 + $0xa8] sm:$0xff] }
  0x1e   : > { %383 = vst.msk [vmem:[#allocation2 + $0x180] sm:$0xff] %vm333_vm0, %v8966_v0  ;;  %384 = vst.msk [vmem:[#allocation2 + $0x188] sm:$0xff] %vm333_vm0, %v8966_v0  ;;  %v413_v29 = vld [vmem:[%s5646_s15 + $0xc0] sm:$0xff]  ;;  %v412_v33 = vld [vmem:[%s5646_s15 + $0xb8] sm:$0xff] }
  0x1f   : > { %386 = vst.msk [vmem:[#allocation2 + $0x198] sm:$0xff] %vm333_vm0, %v8966_v0  ;;  %387 = vst.msk [vmem:[#allocation2 + $0x1a0] sm:$0xff] %vm333_vm0, %v8966_v0  ;;  %v415_v34 = vld [vmem:[%s5646_s15 + $0xd0] sm:$0xff]  ;;  %v414_v35 = vld [vmem:[%s5646_s15 + $0xc8] sm:$0xff] }
  0x20   : > { %337 = vst.msk [vmem:[#allocation2 + $0x10] sm:$0x3] %vm336_vm1, %v8966_v0  ;;  %340 = vst.msk [vmem:[#allocation2 + $0x28] sm:$0x3] %vm336_vm1, %v8966_v0  ;;  %v417_v36 = vld [vmem:[%s5646_s15 + $0xe0] sm:$0xff]  ;;  %v416_v37 = vld [vmem:[%s5646_s15 + $0xd8] sm:$0xff] }
  0x21   : > { %343 = vst.msk [vmem:[#allocation2 + $0x40] sm:$0x3] %vm336_vm1, %v8966_v0  ;;  %346 = vst.msk [vmem:[#allocation2 + $0x58] sm:$0x3] %vm336_vm1, %v8966_v0  ;;  %v418_v39 = vld [vmem:[%s5646_s15 + $0xe8] sm:$0xff]  ;;  %v419_v58 = vld [vmem:[%s5646_s15 + $0xf0] sm:$0xff] }
  0x22   : > { %349 = vst.msk [vmem:[#allocation2 + $0x70] sm:$0x3] %vm336_vm1, %v8966_v0  ;;  %352 = vst.msk [vmem:[#allocation2 + $0x88] sm:$0x3] %vm336_vm1, %v8966_v0  ;;  %v420_v62 = vld [vmem:[%s5646_s15 + $0xf8] sm:$0xff]  ;;  %s5457_s15 = smov 32  }
  0x23   : > { %355 = vst.msk [vmem:[#allocation2 + $0xa0] sm:$0x3] %vm336_vm1, %v8966_v0  ;;  %358 = vst.msk [vmem:[#allocation2 + $0xb8] sm:$0x3] %vm336_vm1, %v8966_v0 }
  0x24   : > { %361 = vst.msk [vmem:[#allocation2 + $0xd0] sm:$0x3] %vm336_vm1, %v8966_v0  ;;  %364 = vst.msk [vmem:[#allocation2 + $0xe8] sm:$0x3] %vm336_vm1, %v8966_v0 }
  0x25   : > { %367 = vst.msk [vmem:[#allocation2 + $0x100] sm:$0x3] %vm336_vm1, %v8966_v0  ;;  %370 = vst.msk [vmem:[#allocation2 + $0x118] sm:$0x3] %vm336_vm1, %v8966_v0 }
  0x26   : > { %373 = vst.msk [vmem:[#allocation2 + $0x130] sm:$0x3] %vm336_vm1, %v8966_v0  ;;  %376 = vst.msk [vmem:[#allocation2 + $0x148] sm:$0x3] %vm336_vm1, %v8966_v0 }
  0x27   : > { %379 = vst.msk [vmem:[#allocation2 + $0x160] sm:$0x3] %vm336_vm1, %v8966_v0  ;;  %382 = vst.msk [vmem:[#allocation2 + $0x178] sm:$0x3] %vm336_vm1, %v8966_v0  ;;  %v487_v8 = vld [vmem:[#allocation2 + $0x9] sm:$0xff] }
  0x28   : > { %385 = vst.msk [vmem:[#allocation2 + $0x190] sm:$0x3] %vm336_vm1, %v8966_v0  ;;  %388 = vst.msk [vmem:[#allocation2 + $0x1a8] sm:$0x3] %vm336_vm1, %v8966_v0  ;;  %777 = vrot.lane.b32.xlu0 %v487_v8, %s5450_s16 }
  0x29   : > { %422 = vst.msk [vmem:[#allocation2 + $0x19] sm:$0xff] %vm333_vm0, %v389_v1  ;;  %424 = vst.msk [vmem:[#allocation2 + $0x31] sm:$0xff] %vm333_vm0, %v391_v2  ;;  %v518_v1 = vld [vmem:[#allocation2 + $0x2] sm:$0xff] }
  0x2a   : > { %423 = vst.msk [vmem:[#allocation2 + $0x21] sm:$0xff] %vm333_vm0, %v390_v3  ;;  %426 = vst.msk [vmem:[#allocation2 + $0x49] sm:$0xff] %vm333_vm0, %v393_v4  ;;  %v519_v4 = vld [vmem:[#allocation2 + $0xa] sm:$0xff] }
  0x2b   : > { %425 = vst.msk [vmem:[#allocation2 + $0x39] sm:$0xff] %vm333_vm0, %v392_v5  ;;  %428 = vst.msk [vmem:[#allocation2 + $0x61] sm:$0xff] %vm333_vm0, %v395_v6 }
  0x2c   : > { %427 = vst.msk [vmem:[#allocation2 + $0x51] sm:$0xff] %vm333_vm0, %v394_v9  ;;  %430 = vst.msk [vmem:[#allocation2 + $0x79] sm:$0xff] %vm333_vm0, %v397_v10 }
  0x2d   : > { %429 = vst.msk [vmem:[#allocation2 + $0x69] sm:$0xff] %vm333_vm0, %v396_v11  ;;  %432 = vst.msk [vmem:[#allocation2 + $0x91] sm:$0xff] %vm333_vm0, %v399_v12 }
  0x2e   : > { %431 = vst.msk [vmem:[#allocation2 + $0x81] sm:$0xff] %vm333_vm0, %v398_v13  ;;  %434 = vst.msk [vmem:[#allocation2 + $0xa9] sm:$0xff] %vm333_vm0, %v401_v14 }
  0x2f   : > { %433 = vst.msk [vmem:[#allocation2 + $0x99] sm:$0xff] %vm333_vm0, %v400_v15  ;;  %436 = vst.msk [vmem:[#allocation2 + $0xc1] sm:$0xff] %vm333_vm0, %v403_v16 }
  0x30   : > { %435 = vst.msk [vmem:[#allocation2 + $0xb1] sm:$0xff] %vm333_vm0, %v402_v17  ;;  %438 = vst.msk [vmem:[#allocation2 + $0xd9] sm:$0xff] %vm333_vm0, %v405_v18  ;;  %v5691_v25 = vld [vmem:[#allocation2 + $0x19] sm:$0xff]  ;;  %v5693_v26 = vld [vmem:[#allocation2 + $0x31] sm:$0xff] }
  0x31   : > { %437 = vst.msk [vmem:[#allocation2 + $0xc9] sm:$0xff] %vm333_vm0, %v404_v19  ;;  %440 = vst.msk [vmem:[#allocation2 + $0xf1] sm:$0xff] %vm333_vm0, %v407_v20  ;;  %779 = vrot.lane.b32.xlu1 %v5691_v25, %s5450_s16  ;;  %v5700_v27 = vld [vmem:[#allocation2 + $0x21] sm:$0xff]  ;;  %783 = vrot.lane.b32.xlu0 %v5693_v26, %s5450_s16  ;;  %v5708_v30 = vld [vmem:[#allocation2 + $0x49] sm:$0xff] }
  0x32   : > { %439 = vst.msk [vmem:[#allocation2 + $0xe1] sm:$0xff] %vm333_vm0, %v406_v21  ;;  %442 = vst.msk [vmem:[#allocation2 + $0x109] sm:$0xff] %vm333_vm0, %v409_v22  ;;  %v5712_v31 = vld [vmem:[#allocation2 + $0x39] sm:$0xff]  ;;  %v5716_v32 = vld [vmem:[#allocation2 + $0x61] sm:$0xff] }
  0x33   : > { %441 = vst.msk [vmem:[#allocation2 + $0xf9] sm:$0xff] %vm333_vm0, %v408_v23  ;;  %444 = vst.msk [vmem:[#allocation2 + $0x121] sm:$0xff] %vm333_vm0, %v411_v24  ;;  %v5728_v38 = vld [vmem:[#allocation2 + $0x51] sm:$0xff]  ;;  %v5736_v40 = vld [vmem:[#allocation2 + $0x79] sm:$0xff] }
  0x34   : > { %443 = vst.msk [vmem:[#allocation2 + $0x111] sm:$0xff] %vm333_vm0, %v410_v28  ;;  %446 = vst.msk [vmem:[#allocation2 + $0x139] sm:$0xff] %vm333_vm0, %v413_v29  ;;  %v5740_v41 = vld [vmem:[#allocation2 + $0x69] sm:$0xff]  ;;  %v5744_v42 = vld [vmem:[#allocation2 + $0x91] sm:$0xff] }
  0x35   : > { %781 = vrot.lane.b32.xlu1 %v5700_v27, %s5450_s16  ;;  %787 = vrot.lane.b32.xlu0 %v5708_v30, %s5450_s16  ;;  %445 = vst.msk [vmem:[#allocation2 + $0x129] sm:$0xff] %vm333_vm0, %v412_v33  ;;  %448 = vst.msk [vmem:[#allocation2 + $0x151] sm:$0xff] %vm333_vm0, %v415_v34  ;;  %v5748_v43 = vld [vmem:[#allocation2 + $0x81] sm:$0xff]  ;;  %v5752_v44 = vld [vmem:[#allocation2 + $0xa9] sm:$0xff] }
  0x36   : > { %447 = vst.msk [vmem:[#allocation2 + $0x141] sm:$0xff] %vm333_vm0, %v414_v35  ;;  %450 = vst.msk [vmem:[#allocation2 + $0x169] sm:$0xff] %vm333_vm0, %v417_v36  ;;  %v5756_v45 = vld [vmem:[#allocation2 + $0x99] sm:$0xff]  ;;  %v5760_v46 = vld [vmem:[#allocation2 + $0xc1] sm:$0xff] }
  0x37   : > { %449 = vst.msk [vmem:[#allocation2 + $0x159] sm:$0xff] %vm333_vm0, %v416_v37  ;;  %451 = vst.msk [vmem:[#allocation2 + $0x171] sm:$0xff] %vm333_vm0, %v418_v39  ;;  %v5764_v47 = vld [vmem:[#allocation2 + $0xb1] sm:$0xff]  ;;  %v5768_v48 = vld [vmem:[#allocation2 + $0xd9] sm:$0xff] }
  0x38   : > { %v5772_v49 = vld [vmem:[#allocation2 + $0xc9] sm:$0xff]  ;;  %v5776_v50 = vld [vmem:[#allocation2 + $0xf1] sm:$0xff]  ;;  %2711 = vst.msk [vmem:[#allocation3] sm:$0xff] %vm1799_vm2, %v8966_v0  ;;  %2712 = vst.msk [vmem:[#allocation3 + $0x8] sm:$0xff] %vm1799_vm2, %v8966_v0 }
  0x39   : > { %785 = vrot.lane.b32.xlu1 %v5712_v31, %s5450_s16  ;;  %791 = vrot.lane.b32.xlu0 %v5716_v32, %s5450_s16  ;;  %v5780_v51 = vld [vmem:[#allocation2 + $0xe1] sm:$0xff]  ;;  %v5784_v52 = vld [vmem:[#allocation2 + $0x109] sm:$0xff]  ;;  %2715 = vst.msk [vmem:[#allocation3 + $0x18] sm:$0xff] %vm1799_vm2, %v8966_v0  ;;  %2716 = vst.msk [vmem:[#allocation3 + $0x20] sm:$0xff] %vm1799_vm2, %v8966_v0 }
  0x3a   : > { %v5788_v53 = vld [vmem:[#allocation2 + $0xf9] sm:$0xff]  ;;  %v5792_v54 = vld [vmem:[#allocation2 + $0x121] sm:$0xff]  ;;  %2718 = vst.msk [vmem:[#allocation3 + $0x30] sm:$0xff] %vm1799_vm2, %v8966_v0  ;;  %2719 = vst.msk [vmem:[#allocation3 + $0x38] sm:$0xff] %vm1799_vm2, %v8966_v0 }
  0x3b   : > { %v5796_v55 = vld [vmem:[#allocation2 + $0x111] sm:$0xff]  ;;  %v5800_v56 = vld [vmem:[#allocation2 + $0x139] sm:$0xff]  ;;  %2721 = vst.msk [vmem:[#allocation3 + $0x48] sm:$0xff] %vm1799_vm2, %v8966_v0  ;;  %2722 = vst.msk [vmem:[#allocation3 + $0x50] sm:$0xff] %vm1799_vm2, %v8966_v0 }
  0x3c   : > { %2724 = vst.msk [vmem:[#allocation3 + $0x60] sm:$0xff] %vm1799_vm2, %v8966_v0  ;;  %2725 = vst.msk [vmem:[#allocation3 + $0x68] sm:$0xff] %vm1799_vm2, %v8966_v0  ;;  %v5876_v57 = vld [vmem:[#allocation2 + $0x129] sm:$0xff]  ;;  %v5882_v59 = vld [vmem:[#allocation2 + $0x151] sm:$0xff] }
  0x3d   : > { %789 = vrot.lane.b32.xlu1 %v5728_v38, %s5450_s16  ;;  %795 = vrot.lane.b32.xlu0 %v5736_v40, %s5450_s16  ;;  %2727 = vst.msk [vmem:[#allocation3 + $0x78] sm:$0xff] %vm1799_vm2, %v8966_v0  ;;  %2728 = vst.msk [vmem:[#allocation3 + $0x80] sm:$0xff] %vm1799_vm2, %v8966_v0  ;;  %v5886_v60 = vld [vmem:[#allocation2 + $0x141] sm:$0xff]  ;;  %v5890_v61 = vld [vmem:[#allocation2 + $0x169] sm:$0xff] }
  0x3e   : > { %2730 = vst.msk [vmem:[#allocation3 + $0x90] sm:$0xff] %vm1799_vm2, %v8966_v0  ;;  %2731 = vst.msk [vmem:[#allocation3 + $0x98] sm:$0xff] %vm1799_vm2, %v8966_v0  ;;  %v5896_v63 = vld [vmem:[#allocation2 + $0x159] sm:$0xff]  ;;  %v5902_v2 = vld [vmem:[#allocation2 + $0x171] sm:$0xff] }
  0x3f   : > { %2733 = vst.msk [vmem:[#allocation3 + $0xa8] sm:$0xff] %vm1799_vm2, %v8966_v0  ;;  %2734 = vst.msk [vmem:[#allocation3 + $0xb0] sm:$0xff] %vm1799_vm2, %v8966_v0  ;;  %v5905_v3 = vld [vmem:[#allocation2 + $0x1a] sm:$0xff]  ;;  %v5911_v5 = vld [vmem:[#allocation2 + $0x32] sm:$0xff] }
  0x40   : > { %2736 = vst.msk [vmem:[#allocation3 + $0xc0] sm:$0xff] %vm1799_vm2, %v8966_v0  ;;  %2737 = vst.msk [vmem:[#allocation3 + $0xc8] sm:$0xff] %vm1799_vm2, %v8966_v0  ;;  %v5914_v6 = vld [vmem:[#allocation2 + $0x22] sm:$0xff]  ;;  %v5918_v7 = vld [vmem:[#allocation2 + $0x4a] sm:$0xff] }
  0x41   : > { %793 = vrot.lane.b32.xlu1 %v5740_v41, %s5450_s16  ;;  %799 = vrot.lane.b32.xlu0 %v5744_v42, %s5450_s16  ;;  %2739 = vst.msk [vmem:[#allocation3 + $0xd8] sm:$0xff] %vm1799_vm2, %v8966_v0  ;;  %2740 = vst.msk [vmem:[#allocation3 + $0xe0] sm:$0xff] %vm1799_vm2, %v8966_v0  ;;  %v5922_v8 = vld [vmem:[#allocation2 + $0x3a] sm:$0xff]  ;;  %v5926_v9 = vld [vmem:[#allocation2 + $0x62] sm:$0xff] }
  0x42   : > { %2742 = vst.msk [vmem:[#allocation3 + $0xf0] sm:$0xff] %vm1799_vm2, %v8966_v0  ;;  %2743 = vst.msk [vmem:[#allocation3 + $0xf8] sm:$0xff] %vm1799_vm2, %v8966_v0  ;;  %v5930_v10 = vld [vmem:[#allocation2 + $0x52] sm:$0xff]  ;;  %v5934_v11 = vld [vmem:[#allocation2 + $0x7a] sm:$0xff] }
  0x43   : > { %2745 = vst.msk [vmem:[#allocation3 + $0x108] sm:$0xff] %vm1799_vm2, %v8966_v0  ;;  %2746 = vst.msk [vmem:[#allocation3 + $0x110] sm:$0xff] %vm1799_vm2, %v8966_v0  ;;  %v5938_v12 = vld [vmem:[#allocation2 + $0x6a] sm:$0xff]  ;;  %v5942_v13 = vld [vmem:[#allocation2 + $0x92] sm:$0xff] }
  0x44   : > { %2748 = vst.msk [vmem:[#allocation3 + $0x120] sm:$0xff] %vm1799_vm2, %v8966_v0  ;;  %2749 = vst.msk [vmem:[#allocation3 + $0x128] sm:$0xff] %vm1799_vm2, %v8966_v0  ;;  %v5946_v14 = vld [vmem:[#allocation2 + $0x82] sm:$0xff]  ;;  %v5950_v15 = vld [vmem:[#allocation2 + $0xaa] sm:$0xff] }
  0x45   : > { %797 = vrot.lane.b32.xlu1 %v5748_v43, %s5450_s16  ;;  %803 = vrot.lane.b32.xlu0 %v5752_v44, %s5450_s16  ;;  %2751 = vst.msk [vmem:[#allocation3 + $0x138] sm:$0xff] %vm1799_vm2, %v8966_v0  ;;  %2752 = vst.msk [vmem:[#allocation3 + $0x140] sm:$0xff] %vm1799_vm2, %v8966_v0  ;;  %v5954_v16 = vld [vmem:[#allocation2 + $0x9a] sm:$0xff]  ;;  %v5958_v17 = vld [vmem:[#allocation2 + $0xc2] sm:$0xff] }
  0x46   : > { %2754 = vst.msk [vmem:[#allocation3 + $0x150] sm:$0xff] %vm1799_vm2, %v8966_v0  ;;  %2755 = vst.msk [vmem:[#allocation3 + $0x158] sm:$0xff] %vm1799_vm2, %v8966_v0  ;;  %v5962_v18 = vld [vmem:[#allocation2 + $0xb2] sm:$0xff]  ;;  %v5966_v19 = vld [vmem:[#allocation2 + $0xda] sm:$0xff] }
  0x47   : > { %2757 = vst.msk [vmem:[#allocation3 + $0x168] sm:$0xff] %vm1799_vm2, %v8966_v0  ;;  %2758 = vst.msk [vmem:[#allocation3 + $0x170] sm:$0xff] %vm1799_vm2, %v8966_v0  ;;  %v5970_v20 = vld [vmem:[#allocation2 + $0xca] sm:$0xff]  ;;  %v5974_v21 = vld [vmem:[#allocation2 + $0xf2] sm:$0xff] }
  0x48   : > { %2760 = vst.msk [vmem:[#allocation3 + $0x180] sm:$0xff] %vm1799_vm2, %v8966_v0  ;;  %2761 = vst.msk [vmem:[#allocation3 + $0x188] sm:$0xff] %vm1799_vm2, %v8966_v0  ;;  %v5978_v22 = vld [vmem:[#allocation2 + $0xe2] sm:$0xff]  ;;  %v5982_v23 = vld [vmem:[#allocation2 + $0x10a] sm:$0xff] }
  0x49   : > { %801 = vrot.lane.b32.xlu1 %v5756_v45, %s5450_s16  ;;  %807 = vrot.lane.b32.xlu0 %v5760_v46, %s5450_s16  ;;  %2763 = vst.msk [vmem:[#allocation3 + $0x198] sm:$0xff] %vm1799_vm2, %v8966_v0  ;;  %2764 = vst.msk [vmem:[#allocation3 + $0x1a0] sm:$0xff] %vm1799_vm2, %v8966_v0  ;;  %v5986_v24 = vld [vmem:[#allocation2 + $0xfa] sm:$0xff]  ;;  %v5990_v28 = vld [vmem:[#allocation2 + $0x122] sm:$0xff] }
  0x4a   : > { %452 = vst.msk [vmem:[#allocation2 + $0x181] sm:$0xff] %vm333_vm0, %v419_v58  ;;  %453 = vst.msk [vmem:[#allocation2 + $0x189] sm:$0xff] %vm333_vm0, %v420_v62  ;;  %v5994_v29 = vld [vmem:[#allocation2 + $0x112] sm:$0xff]  ;;  %v5998_v33 = vld [vmem:[#allocation2 + $0x13a] sm:$0xff] }
  0x4b   : > { %v6004_v35 = vld [vmem:[#allocation2 + $0x12a] sm:$0xff]  ;;  %v6008_v36 = vld [vmem:[#allocation2 + $0x152] sm:$0xff]  ;;  %v6014_v39 = vld [vmem:[#allocation2 + $0x142] sm:$0xff] }
  0x4c   : > { %9007 = vst [vmem:[#allocation6_spill] sm:$0xff] %v6014_v39  ;;  %v6020_v62 = vld [vmem:[#allocation2 + $0x16a] sm:$0xff] }
  0x4d   : > { %805 = vrot.lane.b32.xlu1 %v5764_v47, %s5450_s16  ;;  %811 = vrot.lane.b32.xlu0 %v5768_v48, %s5450_s16  ;;  %9009 = vst [vmem:[#allocation8_spill] sm:$0xff] %v6020_v62 }
  0x51   : > { %809 = vrot.lane.b32.xlu1 %v5772_v49, %s5450_s16  ;;  %815 = vrot.lane.b32.xlu0 %v5776_v50, %s5450_s16 }
  0x55   : > { %813 = vrot.lane.b32.xlu1 %v5780_v51, %s5450_s16  ;;  %819 = vrot.lane.b32.xlu0 %v5784_v52, %s5450_s16 }
  0x59   : > { %817 = vrot.lane.b32.xlu1 %v5788_v53, %s5450_s16  ;;  %823 = vrot.lane.b32.xlu0 %v5792_v54, %s5450_s16 }
  0x5d   : > { %821 = vrot.lane.b32.xlu1 %v5796_v55, %s5450_s16  ;;  %827 = vrot.lane.b32.xlu0 %v5800_v56, %s5450_s16 }
  0x61   : > { %825 = vrot.lane.b32.xlu1 %v5876_v57, %s5450_s16  ;;  %831 = vrot.lane.b32.xlu0 %v5882_v59, %s5450_s16 }
  0x65   : > { %829 = vrot.lane.b32.xlu1 %v5886_v60, %s5450_s16  ;;  %835 = vrot.lane.b32.xlu0 %v5890_v61, %s5450_s16 }
  0x69   : > { %833 = vrot.lane.b32.xlu1 %v5896_v63, %s5450_s16  ;;  %903 = vrot.lane.b32.xlu0 %v518_v1, %s5451_s17 }
  0x6d   : > { %837 = vrot.lane.b32.xlu1 %v5902_v2, %s5450_s16  ;;  %907 = vrot.lane.b32.xlu0 %v5905_v3, %s5451_s17 }
  0x71   : > { %905 = vrot.lane.b32.xlu1 %v519_v4, %s5451_s17  ;;  %911 = vrot.lane.b32.xlu0 %v5911_v5, %s5451_s17  ;;  %v6026_v4 = vld [vmem:[#allocation2 + $0x15a] sm:$0xff] }
  0x72   : > { %9011 = vst [vmem:[#allocation10_spill] sm:$0xff] %v6026_v4 }
  0x75   : > { %909 = vrot.lane.b32.xlu1 %v5914_v6, %s5451_s17  ;;  %915 = vrot.lane.b32.xlu0 %v5918_v7, %s5451_s17 }
  0x79   : > { %913 = vrot.lane.b32.xlu1 %v5922_v8, %s5451_s17  ;;  %919 = vrot.lane.b32.xlu0 %v5926_v9, %s5451_s17 }
  0x7d   : > { %917 = vrot.lane.b32.xlu1 %v5930_v10, %s5451_s17  ;;  %923 = vrot.lane.b32.xlu0 %v5934_v11, %s5451_s17 }
  0x81   : > { %921 = vrot.lane.b32.xlu1 %v5938_v12, %s5451_s17  ;;  %927 = vrot.lane.b32.xlu0 %v5942_v13, %s5451_s17 }
  0x85   : > { %925 = vrot.lane.b32.xlu1 %v5946_v14, %s5451_s17  ;;  %931 = vrot.lane.b32.xlu0 %v5950_v15, %s5451_s17 }
  0x88   : > { %v6000_v34 = vpop.permute.xlu0 %775 }
  0x89   : > { %929 = vrot.lane.b32.xlu1 %v5954_v16, %s5451_s17  ;;  %935 = vrot.lane.b32.xlu0 %v5958_v17, %s5451_s17  ;;  %9005 = vst [vmem:[#allocation4_spill] sm:$0xff] %v6000_v34  ;;  %v6036_v34 = vld [vmem:[#allocation2 + $0x172] sm:$0xff] }
  0x8a   : > { %9014 = vst [vmem:[#allocation13_spill] sm:$0xff] %v6036_v34 }
  0x8d   : > { %933 = vrot.lane.b32.xlu1 %v5962_v18, %s5451_s17  ;;  %939 = vrot.lane.b32.xlu0 %v5966_v19, %s5451_s17 }
  0x91   : > { %937 = vrot.lane.b32.xlu1 %v5970_v20, %s5451_s17  ;;  %943 = vrot.lane.b32.xlu0 %v5974_v21, %s5451_s17 }
  0x95   : > { %941 = vrot.lane.b32.xlu1 %v5978_v22, %s5451_s17  ;;  %947 = vrot.lane.b32.xlu0 %v5982_v23, %s5451_s17 }
  0x99   : > { %945 = vrot.lane.b32.xlu1 %v5986_v24, %s5451_s17  ;;  %951 = vrot.lane.b32.xlu0 %v5990_v28, %s5451_s17 }
  0x9a   : > { %v6010_v37 = vpop.permute.xlu0 %777 }
  0x9b   : > { %9006 = vst [vmem:[#allocation5_spill] sm:$0xff] %v6010_v37 }
  0x9d   : > { %949 = vrot.lane.b32.xlu1 %v5994_v29, %s5451_s17  ;;  %955 = vrot.lane.b32.xlu0 %v5998_v33, %s5451_s17 }
  0xa1   : > { %953 = vrot.lane.b32.xlu1 %v6004_v35, %s5451_s17  ;;  %959 = vrot.lane.b32.xlu0 %v6008_v36, %s5451_s17 }
  0xa3   : > { %v6018_v58 = vpop.permute.xlu1 %779  ;;  %v6022_v1 = vpop.permute.xlu0 %783 }
  0xa4   : > { %9008 = vst [vmem:[#allocation7_spill] sm:$0xff] %v6018_v58  ;;  %9010 = vst [vmem:[#allocation9_spill] sm:$0xff] %v6022_v1  ;;  %v456_v58 = vld [vmem:[#allocation2 + $0x18] sm:$0xff] }
  0xa5   : > { %957 = vrot.lane.b32.xlu1 %v6014_v39, %s5451_s17  ;;  %963 = vrot.lane.b32.xlu0 %v6020_v62, %s5451_s17  ;;  %v6045_v62 = vld [vmem:[#allocation2 + $0x30] sm:$0xff] }
  0xa6   : > { %9017 = vst [vmem:[#allocation16_spill] sm:$0xff] %v6045_v62 }
  0xa7   : > { %v6030_v0 = vpop.permute.xlu1 %781  ;;  %v6032_v37 = vpop.permute.xlu0 %787 }
  0xa8   : > { %9012 = vst [vmem:[#allocation11_spill] sm:$0xff] %v6030_v0  ;;  %9013 = vst [vmem:[#allocation12_spill] sm:$0xff] %v6032_v37  ;;  %v457_v0 = vld [vmem:[#allocation2 + $0x20] sm:$0xff] }
  0xa9   : > { %961 = vrot.lane.b32.xlu1 %v6026_v4, %s5451_s17  ;;  %1031 = vrot.lane.b32.xlu0 %v456_v58, %s5452_s18  ;;  %v6054_v58 = vld [vmem:[#allocation2 + $0x48] sm:$0xff] }
  0xaa   : > { %9020 = vst [vmem:[#allocation19_spill] sm:$0xff] %v6054_v58 }
  0xab   : > { %v6039_v1 = vpop.permute.xlu1 %785  ;;  %v6041_v39 = vpop.permute.xlu0 %791 }
  0xac   : > { %9015 = vst [vmem:[#allocation14_spill] sm:$0xff] %v6039_v1  ;;  %9016 = vst [vmem:[#allocation15_spill] sm:$0xff] %v6041_v39  ;;  %v6060_v1 = vld [vmem:[#allocation2 + $0x38] sm:$0xff] }
  0xad   : > { %965 = vrot.lane.b32.xlu1 %v6036_v34, %s5451_s17  ;;  %1035 = vrot.lane.b32.xlu0 %v6045_v62, %s5452_s18  ;;  %9022 = vst [vmem:[#allocation21_spill] sm:$0xff] %v6060_v1 }
  0xaf   : > { %v6049_v37 = vpop.permute.xlu1 %789  ;;  %v6051_v4 = vpop.permute.xlu0 %795 }
  0xb0   : > { %9018 = vst [vmem:[#allocation17_spill] sm:$0xff] %v6049_v37  ;;  %9019 = vst [vmem:[#allocation18_spill] sm:$0xff] %v6051_v4  ;;  %v6066_v37 = vld [vmem:[#allocation2 + $0x60] sm:$0xff]  ;;  %v6072_v4 = vld [vmem:[#allocation2 + $0x50] sm:$0xff] }
  0xb1   : > { %1033 = vrot.lane.b32.xlu1 %v457_v0, %s5452_s18  ;;  %1039 = vrot.lane.b32.xlu0 %v6054_v58, %s5452_s18  ;;  %9024 = vst [vmem:[#allocation23_spill] sm:$0xff] %v6066_v37  ;;  %9026 = vst [vmem:[#allocation25_spill] sm:$0xff] %v6072_v4 }
  0xb3   : > { %v6058_v39 = vpop.permute.xlu1 %793  ;;  %v6062_v34 = vpop.permute.xlu0 %799 }
  0xb4   : > { %9021 = vst [vmem:[#allocation20_spill] sm:$0xff] %v6058_v39  ;;  %9023 = vst [vmem:[#allocation22_spill] sm:$0xff] %v6062_v34  ;;  %v6078_v39 = vld [vmem:[#allocation2 + $0x78] sm:$0xff] }
  0xb5   : > { %1037 = vrot.lane.b32.xlu1 %v6060_v1, %s5452_s18  ;;  %1043 = vrot.lane.b32.xlu0 %v6066_v37, %s5452_s18  ;;  %9028 = vst [vmem:[#allocation27_spill] sm:$0xff] %v6078_v39  ;;  %v6084_v1 = vld [vmem:[#allocation2 + $0x68] sm:$0xff] }
  0xb6   : > { %9030 = vst [vmem:[#allocation29_spill] sm:$0xff] %v6084_v1 }
  0xb7   : > { %v6070_v0 = vpop.permute.xlu1 %797  ;;  %v6074_v62 = vpop.permute.xlu0 %803 }
  0xb8   : > { %9025 = vst [vmem:[#allocation24_spill] sm:$0xff] %v6070_v0  ;;  %9027 = vst [vmem:[#allocation26_spill] sm:$0xff] %v6074_v62  ;;  %v6090_v0 = vld [vmem:[#allocation2 + $0x90] sm:$0xff] }
  0xb9   : > { %1041 = vrot.lane.b32.xlu1 %v6072_v4, %s5452_s18  ;;  %1047 = vrot.lane.b32.xlu0 %v6078_v39, %s5452_s18  ;;  %9032 = vst [vmem:[#allocation31_spill] sm:$0xff] %v6090_v0  ;;  %v6096_v4 = vld [vmem:[#allocation2 + $0x80] sm:$0xff] }
  0xba   : > { %9034 = vst [vmem:[#allocation33_spill] sm:$0xff] %v6096_v4 }
  0xbb   : > { %v6082_v34 = vpop.permute.xlu1 %801  ;;  %v6086_v58 = vpop.permute.xlu0 %807 }
  0xbc   : > { %9029 = vst [vmem:[#allocation28_spill] sm:$0xff] %v6082_v34  ;;  %9031 = vst [vmem:[#allocation30_spill] sm:$0xff] %v6086_v58  ;;  %v6102_v34 = vld [vmem:[#allocation2 + $0xa8] sm:$0xff] }
  0xbd   : > { %1045 = vrot.lane.b32.xlu1 %v6084_v1, %s5452_s18  ;;  %1051 = vrot.lane.b32.xlu0 %v6090_v0, %s5452_s18  ;;  %9036 = vst [vmem:[#allocation35_spill] sm:$0xff] %v6102_v34  ;;  %v6108_v1 = vld [vmem:[#allocation2 + $0x98] sm:$0xff] }
  0xbe   : > { %9038 = vst [vmem:[#allocation37_spill] sm:$0xff] %v6108_v1 }
  0xbf   : > { %v6094_v62 = vpop.permute.xlu1 %805  ;;  %v6098_v37 = vpop.permute.xlu0 %811 }
  0xc0   : > { %9033 = vst [vmem:[#allocation32_spill] sm:$0xff] %v6094_v62  ;;  %9035 = vst [vmem:[#allocation34_spill] sm:$0xff] %v6098_v37  ;;  %v6114_v62 = vld [vmem:[#allocation2 + $0xc0] sm:$0xff] }
  0xc1   : > { %1049 = vrot.lane.b32.xlu1 %v6096_v4, %s5452_s18  ;;  %1055 = vrot.lane.b32.xlu0 %v6102_v34, %s5452_s18  ;;  %9040 = vst [vmem:[#allocation39_spill] sm:$0xff] %v6114_v62  ;;  %v6120_v4 = vld [vmem:[#allocation2 + $0xb0] sm:$0xff] }
  0xc2   : > { %9042 = vst [vmem:[#allocation41_spill] sm:$0xff] %v6120_v4 }
  0xc3   : > { %v6106_v58 = vpop.permute.xlu1 %809  ;;  %v6110_v39 = vpop.permute.xlu0 %815 }
  0xc4   : > { %9037 = vst [vmem:[#allocation36_spill] sm:$0xff] %v6106_v58  ;;  %9039 = vst [vmem:[#allocation38_spill] sm:$0xff] %v6110_v39  ;;  %v6126_v58 = vld [vmem:[#allocation2 + $0xd8] sm:$0xff] }
  0xc5   : > { %1053 = vrot.lane.b32.xlu1 %v6108_v1, %s5452_s18  ;;  %1059 = vrot.lane.b32.xlu0 %v6114_v62, %s5452_s18  ;;  %9044 = vst [vmem:[#allocation43_spill] sm:$0xff] %v6126_v58  ;;  %v6132_v1 = vld [vmem:[#allocation2 + $0xc8] sm:$0xff] }
  0xc6   : > { %9046 = vst [vmem:[#allocation45_spill] sm:$0xff] %v6132_v1 }
  0xc7   : > { %v6118_v37 = vpop.permute.xlu1 %813  ;;  %v6122_v0 = vpop.permute.xlu0 %819 }
  0xc8   : > { %9041 = vst [vmem:[#allocation40_spill] sm:$0xff] %v6118_v37  ;;  %9043 = vst [vmem:[#allocation42_spill] sm:$0xff] %v6122_v0  ;;  %v6138_v37 = vld [vmem:[#allocation2 + $0xf0] sm:$0xff] }
  0xc9   : > { %1057 = vrot.lane.b32.xlu1 %v6120_v4, %s5452_s18  ;;  %1063 = vrot.lane.b32.xlu0 %v6126_v58, %s5452_s18  ;;  %9048 = vst [vmem:[#allocation47_spill] sm:$0xff] %v6138_v37  ;;  %v6144_v4 = vld [vmem:[#allocation2 + $0xe0] sm:$0xff] }
  0xca   : > { %9050 = vst [vmem:[#allocation49_spill] sm:$0xff] %v6144_v4 }
  0xcb   : > { %v6130_v39 = vpop.permute.xlu1 %817  ;;  %v6134_v34 = vpop.permute.xlu0 %823 }
  0xcc   : > { %9045 = vst [vmem:[#allocation44_spill] sm:$0xff] %v6130_v39  ;;  %9047 = vst [vmem:[#allocation46_spill] sm:$0xff] %v6134_v34  ;;  %v6150_v39 = vld [vmem:[#allocation2 + $0x108] sm:$0xff] }
  0xcd   : > { %1061 = vrot.lane.b32.xlu1 %v6132_v1, %s5452_s18  ;;  %1067 = vrot.lane.b32.xlu0 %v6138_v37, %s5452_s18  ;;  %9052 = vst [vmem:[#allocation51_spill] sm:$0xff] %v6150_v39  ;;  %v6156_v1 = vld [vmem:[#allocation2 + $0xf8] sm:$0xff] }
  0xce   : > { %9054 = vst [vmem:[#allocation53_spill] sm:$0xff] %v6156_v1 }
  0xcf   : > { %v6142_v0 = vpop.permute.xlu1 %821  ;;  %v6146_v62 = vpop.permute.xlu0 %827 }
  0xd0   : > { %9049 = vst [vmem:[#allocation48_spill] sm:$0xff] %v6142_v0  ;;  %9051 = vst [vmem:[#allocation50_spill] sm:$0xff] %v6146_v62  ;;  %v6162_v0 = vld [vmem:[#allocation2 + $0x120] sm:$0xff] }
  0xd1   : > { %1065 = vrot.lane.b32.xlu1 %v6144_v4, %s5452_s18  ;;  %1071 = vrot.lane.b32.xlu0 %v6150_v39, %s5452_s18  ;;  %9056 = vst [vmem:[#allocation55_spill] sm:$0xff] %v6162_v0  ;;  %v6168_v4 = vld [vmem:[#allocation2 + $0x110] sm:$0xff] }
  0xd2   : > { %9058 = vst [vmem:[#allocation57_spill] sm:$0xff] %v6168_v4 }
  0xd3   : > { %v6154_v34 = vpop.permute.xlu1 %825  ;;  %v6158_v58 = vpop.permute.xlu0 %831 }
  0xd4   : > { %9053 = vst [vmem:[#allocation52_spill] sm:$0xff] %v6154_v34  ;;  %9055 = vst [vmem:[#allocation54_spill] sm:$0xff] %v6158_v58  ;;  %v6174_v34 = vld [vmem:[#allocation2 + $0x138] sm:$0xff] }
  0xd5   : > { %1069 = vrot.lane.b32.xlu1 %v6156_v1, %s5452_s18  ;;  %1075 = vrot.lane.b32.xlu0 %v6162_v0, %s5452_s18  ;;  %9060 = vst [vmem:[#allocation59_spill] sm:$0xff] %v6174_v34  ;;  %v6180_v1 = vld [vmem:[#allocation2 + $0x128] sm:$0xff] }
  0xd6   : > { %9062 = vst [vmem:[#allocation61_spill] sm:$0xff] %v6180_v1 }
  0xd7   : > { %v6166_v62 = vpop.permute.xlu1 %829  ;;  %v6170_v37 = vpop.permute.xlu0 %835 }
  0xd8   : > { %9057 = vst [vmem:[#allocation56_spill] sm:$0xff] %v6166_v62  ;;  %9059 = vst [vmem:[#allocation58_spill] sm:$0xff] %v6170_v37  ;;  %v6186_v62 = vld [vmem:[#allocation2 + $0x150] sm:$0xff] }
  0xd9   : > { %1073 = vrot.lane.b32.xlu1 %v6168_v4, %s5452_s18  ;;  %1079 = vrot.lane.b32.xlu0 %v6174_v34, %s5452_s18  ;;  %9064 = vst [vmem:[#allocation63_spill] sm:$0xff] %v6186_v62  ;;  %v6192_v4 = vld [vmem:[#allocation2 + $0x140] sm:$0xff] }
  0xda   : > { %9066 = vst [vmem:[#allocation65_spill] sm:$0xff] %v6192_v4  ;;  %v6206_v34 = vld [vmem:[#allocation2 + $0x180] sm:$0xff] }
  0xdb   : > { %v6178_v58 = vpop.permute.xlu1 %833  ;;  %v6182_v39 = vpop.permute.xlu0 %903 }
  0xdc   : > { %9061 = vst [vmem:[#allocation60_spill] sm:$0xff] %v6178_v58  ;;  %9063 = vst [vmem:[#allocation62_spill] sm:$0xff] %v6182_v39  ;;  %v6198_v58 = vld [vmem:[#allocation2 + $0x168] sm:$0xff] }
  0xdd   : > { %1077 = vrot.lane.b32.xlu1 %v6180_v1, %s5452_s18  ;;  %1083 = vrot.lane.b32.xlu0 %v6186_v62, %s5452_s18  ;;  %v6204_v1 = vld [vmem:[#allocation2 + $0x158] sm:$0xff] }
  0xde   : > { %9069 = vst [vmem:[#allocation68_spill] sm:$0xff] %v6204_v1 }
  0xdf   : > { %v6190_v37 = vpop.permute.xlu1 %837  ;;  %v6194_v0 = vpop.permute.xlu0 %907 }
  0xe0   : > { %9065 = vst [vmem:[#allocation64_spill] sm:$0xff] %v6190_v37  ;;  %9067 = vst [vmem:[#allocation66_spill] sm:$0xff] %v6194_v0  ;;  %v6216_v0 = vld [vmem:[#allocation2 + $0x170] sm:$0xff] }
  0xe1   : > { %1081 = vrot.lane.b32.xlu1 %v6192_v4, %s5452_s18  ;;  %1087 = vrot.lane.b32.xlu0 %v6198_v58, %s5452_s18 }
  0xe3   : > { %v6202_v39 = vpop.permute.xlu1 %905  ;;  %v6208_v62 = vpop.permute.xlu0 %911 }
  0xe4   : > { %9068 = vst [vmem:[#allocation67_spill] sm:$0xff] %v6202_v39  ;;  %9070 = vst [vmem:[#allocation69_spill] sm:$0xff] %v6208_v62  ;;  %v6222_v39 = vld [vmem:[#allocation2 + $0x188] sm:$0xff] }
  0xe5   : > { %1085 = vrot.lane.b32.xlu1 %v6204_v1, %s5452_s18  ;;  %1091 = vrot.lane.b32.xlu0 %v6206_v34, %s5452_s18 }
  0xe7   : > { %v6214_v37 = vpop.permute.xlu1 %909  ;;  %v6218_v4 = vpop.permute.xlu0 %915 }
  0xe8   : > { %9071 = vst [vmem:[#allocation70_spill] sm:$0xff] %v6214_v37  ;;  %9072 = vst [vmem:[#allocation71_spill] sm:$0xff] %v6218_v4 }
  0xe9   : > { %1089 = vrot.lane.b32.xlu1 %v6216_v0, %s5452_s18  ;;  %1159 = vrot.lane.b32.xlu0 %v5691_v25, %s5453_s19 }
  0xeb   : > { %v6226_v62 = vpop.permute.xlu1 %913  ;;  %v6228_v1 = vpop.permute.xlu0 %919 }
  0xec   : > { %9073 = vst [vmem:[#allocation72_spill] sm:$0xff] %v6226_v62  ;;  %9074 = vst [vmem:[#allocation73_spill] sm:$0xff] %v6228_v1 }
  0xed   : > { %1093 = vrot.lane.b32.xlu1 %v6222_v39, %s5452_s18  ;;  %1163 = vrot.lane.b32.xlu0 %v5693_v26, %s5453_s19  ;;  %s5459_s18 = smov 48  }
  0xef   : > { %v6234_v4 = vpop.permute.xlu1 %917  ;;  %v6236_v37 = vpop.permute.xlu0 %923 }
  0xf1   : > { %1161 = vrot.lane.b32.xlu1 %v5700_v27, %s5453_s19  ;;  %1167 = vrot.lane.b32.xlu0 %v5708_v30, %s5453_s19 }
  0xf3   : > { %v6242_v25 = vpop.permute.xlu1 %921  ;;  %v6244_v62 = vpop.permute.xlu0 %927 }
  0xf4   : > { %9075 = vst [vmem:[#allocation74_spill] sm:$0xff] %v6244_v62 }
  0xf5   : > { %1165 = vrot.lane.b32.xlu1 %v5712_v31, %s5453_s19  ;;  %1171 = vrot.lane.b32.xlu0 %v5716_v32, %s5453_s19 }
  0xf7   : > { %v6250_v26 = vpop.permute.xlu1 %925  ;;  %v6252_v1 = vpop.permute.xlu0 %931 }
  0xf8   : > { %9076 = vst [vmem:[#allocation75_spill] sm:$0xff] %v6252_v1 }
  0xf9   : > { %1169 = vrot.lane.b32.xlu1 %v5728_v38, %s5453_s19  ;;  %1175 = vrot.lane.b32.xlu0 %v5736_v40, %s5453_s19 }
  0xfb   : > { %v6258_v27 = vpop.permute.xlu1 %929  ;;  %v6260_v30 = vpop.permute.xlu0 %935 }
  0xfc   : > { %9077 = vst [vmem:[#allocation76_spill] sm:$0xff] %v6258_v27  ;;  %9078 = vst [vmem:[#allocation77_spill] sm:$0xff] %v6260_v30  ;;  %v715_v30 = vld [vmem:[#allocation2 + $0x62] sm:$0xff] }
  0xfd   : > { %1173 = vrot.lane.b32.xlu1 %v5740_v41, %s5453_s19  ;;  %1179 = vrot.lane.b32.xlu0 %v5744_v42, %s5453_s19 }
  0xff   : > { %v6266_v31 = vpop.permute.xlu1 %933  ;;  %v6268_v32 = vpop.permute.xlu0 %939 }
 0x100   : > { %9079 = vst [vmem:[#allocation78_spill] sm:$0xff] %v6266_v31  ;;  %9080 = vst [vmem:[#allocation79_spill] sm:$0xff] %v6268_v32  ;;  %v678_v32 = vld [vmem:[#allocation2 + $0x1a0] sm:$0xff] }
 0x101   : > { %1177 = vrot.lane.b32.xlu1 %v5748_v43, %s5453_s19  ;;  %1183 = vrot.lane.b32.xlu0 %v5752_v44, %s5453_s19  ;;  %v685_v31 = vld [vmem:[#allocation2 + $0x79] sm:$0xff] }
 0x103   : > { %v6274_v38 = vpop.permute.xlu1 %937  ;;  %v6276_v40 = vpop.permute.xlu0 %943 }
 0x104   : > { %9081 = vst [vmem:[#allocation80_spill] sm:$0xff] %v6274_v38  ;;  %9082 = vst [vmem:[#allocation81_spill] sm:$0xff] %v6276_v40 }
 0x105   : > { %1181 = vrot.lane.b32.xlu1 %v5756_v45, %s5453_s19  ;;  %1187 = vrot.lane.b32.xlu0 %v5760_v46, %s5453_s19 }
 0x107   : > { %v6282_v41 = vpop.permute.xlu1 %941  ;;  %v6284_v42 = vpop.permute.xlu0 %947 }
 0x108   : > { %9083 = vst [vmem:[#allocation82_spill] sm:$0xff] %v6282_v41  ;;  %9084 = vst [vmem:[#allocation83_spill] sm:$0xff] %v6284_v42 }
 0x109   : > { %1185 = vrot.lane.b32.xlu1 %v5764_v47, %s5453_s19  ;;  %1191 = vrot.lane.b32.xlu0 %v5768_v48, %s5453_s19 }
 0x10b   : > { %v6290_v43 = vpop.permute.xlu1 %945  ;;  %v6292_v44 = vpop.permute.xlu0 %951 }
 0x10c   : > { %9085 = vst [vmem:[#allocation84_spill] sm:$0xff] %v6290_v43  ;;  %9086 = vst [vmem:[#allocation85_spill] sm:$0xff] %v6292_v44  ;;  %v9124_v44 = vld [vmem:[#allocation25_spill] sm:$0xff] }
 0x10d   : > { %1189 = vrot.lane.b32.xlu1 %v5772_v49, %s5453_s19  ;;  %1195 = vrot.lane.b32.xlu0 %v5776_v50, %s5453_s19 }
 0x10f   : > { %v6298_v45 = vpop.permute.xlu1 %949  ;;  %v6300_v46 = vpop.permute.xlu0 %955 }
 0x110   : > { %9087 = vst [vmem:[#allocation86_spill] sm:$0xff] %v6298_v45  ;;  %9088 = vst [vmem:[#allocation87_spill] sm:$0xff] %v6300_v46 }
 0x111   : > { %1193 = vrot.lane.b32.xlu1 %v5780_v51, %s5453_s19  ;;  %1199 = vrot.lane.b32.xlu0 %v5784_v52, %s5453_s19 }
 0x113   : > { %v6306_v47 = vpop.permute.xlu1 %953  ;;  %v6308_v48 = vpop.permute.xlu0 %959 }
 0x114   : > { %9089 = vst [vmem:[#allocation88_spill] sm:$0xff] %v6306_v47  ;;  %9090 = vst [vmem:[#allocation89_spill] sm:$0xff] %v6308_v48  ;;  %v9122_v47 = vld [vmem:[#allocation23_spill] sm:$0xff] }
 0x115   : > { %1197 = vrot.lane.b32.xlu1 %v5788_v53, %s5453_s19  ;;  %1203 = vrot.lane.b32.xlu0 %v5792_v54, %s5453_s19 }
 0x117   : > { %v6314_v49 = vpop.permute.xlu1 %957  ;;  %v6316_v50 = vpop.permute.xlu0 %963 }
 0x118   : > { %9091 = vst [vmem:[#allocation90_spill] sm:$0xff] %v6314_v49  ;;  %9092 = vst [vmem:[#allocation91_spill] sm:$0xff] %v6316_v50 }
 0x119   : > { %1201 = vrot.lane.b32.xlu1 %v5796_v55, %s5453_s19  ;;  %1207 = vrot.lane.b32.xlu0 %v5800_v56, %s5453_s19  ;;  %v6340_v56 = vld [vmem:[#allocation2 + $0x181] sm:$0xff] }
 0x11b   : > { %v6322_v51 = vpop.permute.xlu1 %961  ;;  %v6324_v52 = vpop.permute.xlu0 %1031 }
 0x11c   : > { %9093 = vst [vmem:[#allocation92_spill] sm:$0xff] %v6322_v51 }
 0x11d   : > { %1205 = vrot.lane.b32.xlu1 %v5876_v57, %s5453_s19  ;;  %1211 = vrot.lane.b32.xlu0 %v5882_v59, %s5453_s19 }
 0x11f   : > { %v6330_v53 = vpop.permute.xlu1 %965  ;;  %v6332_v54 = vpop.permute.xlu0 %1035 }
 0x120   : > { %9094 = vst [vmem:[#allocation93_spill] sm:$0xff] %v6330_v53 }
 0x121   : > { %1209 = vrot.lane.b32.xlu1 %v5886_v60, %s5453_s19  ;;  %1215 = vrot.lane.b32.xlu0 %v5890_v61, %s5453_s19  ;;  %v6354_v60 = vld [vmem:[#allocation2 + $0x189] sm:$0xff] }
 0x123   : > { %v6338_v55 = vpop.permute.xlu1 %1033  ;;  %v6342_v50 = vpop.permute.xlu0 %1039 }
 0x125   : > { %1213 = vrot.lane.b32.xlu1 %v5896_v63, %s5453_s19  ;;  %1219 = vrot.lane.b32.xlu0 %v6340_v56, %s5453_s19 }
 0x127   : > { %v6348_v57 = vpop.permute.xlu1 %1037  ;;  %v6350_v59 = vpop.permute.xlu0 %1043 }
 0x129   : > { %1217 = vrot.lane.b32.xlu1 %v5902_v2, %s5453_s19  ;;  %1287 = vrot.lane.b32.xlu0 %v5905_v3, %s5454_s20 }
 0x12b   : > { %v6358_v61 = vpop.permute.xlu1 %1041  ;;  %v6360_v53 = vpop.permute.xlu0 %1047 }
 0x12d   : > { %1221 = vrot.lane.b32.xlu1 %v6354_v60, %s5453_s19  ;;  %1291 = vrot.lane.b32.xlu0 %v5911_v5, %s5454_s20 }
 0x12f   : > { %v6366_v63 = vpop.permute.xlu1 %1045  ;;  %v6368_v51 = vpop.permute.xlu0 %1051 }
 0x131   : > { %1289 = vrot.lane.b32.xlu1 %v5914_v6, %s5454_s20  ;;  %1295 = vrot.lane.b32.xlu0 %v5918_v7, %s5454_s20 }
 0x133   : > { %v6374_v2 = vpop.permute.xlu1 %1049  ;;  %v6376_v3 = vpop.permute.xlu0 %1055 }
 0x134   : > { %9095 = vst [vmem:[#allocation94_spill] sm:$0xff] %v6376_v3 }
 0x135   : > { %1293 = vrot.lane.b32.xlu1 %v5922_v8, %s5454_s20  ;;  %1299 = vrot.lane.b32.xlu0 %v5926_v9, %s5454_s20 }
 0x137   : > { %v6382_v5 = vpop.permute.xlu1 %1053  ;;  %v6384_v48 = vpop.permute.xlu0 %1059 }
 0x138   : > { %9096 = vst [vmem:[#allocation95_spill] sm:$0xff] %v6384_v48 }
 0x139   : > { %1297 = vrot.lane.b32.xlu1 %v5930_v10, %s5454_s20  ;;  %1303 = vrot.lane.b32.xlu0 %v5934_v11, %s5454_s20 }
 0x13b   : > { %v6390_v6 = vpop.permute.xlu1 %1057  ;;  %v6392_v7 = vpop.permute.xlu0 %1063 }
 0x13c   : > { %9097 = vst [vmem:[#allocation96_spill] sm:$0xff] %v6390_v6  ;;  %9098 = vst [vmem:[#allocation97_spill] sm:$0xff] %v6392_v7  ;;  %v683_v7 = vld [vmem:[#allocation2 + $0x61] sm:$0xff]  ;;  %v697_v6 = vld [vmem:[#allocation2 + $0x109] sm:$0xff] }
 0x13d   : > { %1301 = vrot.lane.b32.xlu1 %v5938_v12, %s5454_s20  ;;  %1307 = vrot.lane.b32.xlu0 %v5942_v13, %s5454_s20 }
 0x13f   : > { %v6398_v8 = vpop.permute.xlu1 %1061  ;;  %v6400_v9 = vpop.permute.xlu0 %1067 }
 0x140   : > { %9099 = vst [vmem:[#allocation98_spill] sm:$0xff] %v6398_v8  ;;  %9100 = vst [vmem:[#allocation99_spill] sm:$0xff] %v6400_v9 }
 0x141   : > { %1305 = vrot.lane.b32.xlu1 %v5946_v14, %s5454_s20  ;;  %1311 = vrot.lane.b32.xlu0 %v5950_v15, %s5454_s20 }
 0x143   : > { %v6406_v10 = vpop.permute.xlu1 %1065  ;;  %v6408_v11 = vpop.permute.xlu0 %1071 }
 0x144   : > { %9101 = vst [vmem:[#allocation100_spill] sm:$0xff] %v6406_v10  ;;  %9102 = vst [vmem:[#allocation101_spill] sm:$0xff] %v6408_v11  ;;  %v9136_v11 = vld [vmem:[#allocation37_spill] sm:$0xff]  ;;  %v682_v10 = vld [vmem:[#allocation2 + $0x51] sm:$0xff] }
 0x145   : > { %1309 = vrot.lane.b32.xlu1 %v5954_v16, %s5454_s20  ;;  %1315 = vrot.lane.b32.xlu0 %v5958_v17, %s5454_s20 }
 0x147   : > { %v6414_v12 = vpop.permute.xlu1 %1069  ;;  %v6416_v13 = vpop.permute.xlu0 %1075 }
 0x148   : > { %9103 = vst [vmem:[#allocation102_spill] sm:$0xff] %v6414_v12  ;;  %9104 = vst [vmem:[#allocation103_spill] sm:$0xff] %v6416_v13  ;;  %v9128_v13 = vld [vmem:[#allocation29_spill] sm:$0xff] }
 0x149   : > { %1313 = vrot.lane.b32.xlu1 %v5962_v18, %s5454_s20  ;;  %1319 = vrot.lane.b32.xlu0 %v5966_v19, %s5454_s20  ;;  %v9140_v12 = vld [vmem:[#allocation41_spill] sm:$0xff] }
 0x14b   : > { %v6422_v14 = vpop.permute.xlu1 %1073  ;;  %v6424_v15 = vpop.permute.xlu0 %1079 }
 0x14c   : > { %9105 = vst [vmem:[#allocation104_spill] sm:$0xff] %v6422_v14  ;;  %9106 = vst [vmem:[#allocation105_spill] sm:$0xff] %v6424_v15  ;;  %v9132_v14 = vld [vmem:[#allocation33_spill] sm:$0xff] }
 0x14d   : > { %1317 = vrot.lane.b32.xlu1 %v5970_v20, %s5454_s20  ;;  %1323 = vrot.lane.b32.xlu0 %v5974_v21, %s5454_s20 }
 0x14f   : > { %v6430_v16 = vpop.permute.xlu1 %1077  ;;  %v6432_v17 = vpop.permute.xlu0 %1083 }
 0x150   : > { %9107 = vst [vmem:[#allocation106_spill] sm:$0xff] %v6430_v16  ;;  %9108 = vst [vmem:[#allocation107_spill] sm:$0xff] %v6432_v17  ;;  %v9125_v16 = vld [vmem:[#allocation27_spill] sm:$0xff] }
 0x151   : > { %1321 = vrot.lane.b32.xlu1 %v5978_v22, %s5454_s20  ;;  %1327 = vrot.lane.b32.xlu0 %v5982_v23, %s5454_s20 }
 0x153   : > { %v6438_v18 = vpop.permute.xlu1 %1081  ;;  %v6440_v19 = vpop.permute.xlu0 %1087 }
 0x154   : > { %9109 = vst [vmem:[#allocation108_spill] sm:$0xff] %v6438_v18  ;;  %9110 = vst [vmem:[#allocation109_spill] sm:$0xff] %v6440_v19 }
 0x155   : > { %1325 = vrot.lane.b32.xlu1 %v5986_v24, %s5454_s20  ;;  %1331 = vrot.lane.b32.xlu0 %v5990_v28, %s5454_s20 }
 0x157   : > { %v6446_v20 = vpop.permute.xlu1 %1085  ;;  %v6448_v21 = vpop.permute.xlu0 %1091 }
 0x158   : > { %9111 = vst [vmem:[#allocation110_spill] sm:$0xff] %v6446_v20  ;;  %9112 = vst [vmem:[#allocation111_spill] sm:$0xff] %v6448_v21  ;;  %v9115_v21 = vld [vmem:[#allocation6_spill] sm:$0xff]  ;;  %v9119_v20 = vld [vmem:[#allocation16_spill] sm:$0xff] }
 0x159   : > { %1329 = vrot.lane.b32.xlu1 %v5994_v29, %s5454_s20  ;;  %1335 = vrot.lane.b32.xlu0 %v5998_v33, %s5454_s20  ;;  %v9116_v29 = vld [vmem:[#allocation8_spill] sm:$0xff] }
 0x15b   : > { %v6454_v22 = vpop.permute.xlu1 %1089  ;;  %v6456_v23 = vpop.permute.xlu0 %1159 }
 0x15c   : > { %9113 = vst [vmem:[#allocation112_spill] sm:$0xff] %v6454_v22  ;;  %v6472_v22 = vld [vmem:[#allocation2 + $0x182] sm:$0xff] }
 0x15d   : > { %1333 = vrot.lane.b32.xlu1 %v6004_v35, %s5454_s20  ;;  %1339 = vrot.lane.b32.xlu0 %v6008_v36, %s5454_s20  ;;  %v9117_v35 = vld [vmem:[#allocation10_spill] sm:$0xff] }
 0x15f   : > { %v6462_v24 = vpop.permute.xlu1 %1093  ;;  %v6464_v28 = vpop.permute.xlu0 %1163 }
 0x160   : > { %9114 = vst [vmem:[#allocation113_spill] sm:$0xff] %v6462_v24 }
 0x161   : > { %1337 = vrot.lane.b32.xlu1 %v9115_v21, %s5454_s20  ;;  %1343 = vrot.lane.b32.xlu0 %v9116_v29, %s5454_s20  ;;  %v9118_v21 = vld [vmem:[#allocation13_spill] sm:$0xff] }
 0x162   : > { %v6486_v29 = vld [vmem:[#allocation2 + $0x18a] sm:$0xff] }
 0x163   : > { %v6470_v33 = vpop.permute.xlu1 %1161  ;;  %v6474_v19 = vpop.permute.xlu0 %1167 }
 0x165   : > { %1341 = vrot.lane.b32.xlu1 %v9117_v35, %s5454_s20  ;;  %1347 = vrot.lane.b32.xlu0 %v6472_v22, %s5454_s20  ;;  %v9120_v35 = vld [vmem:[#allocation19_spill] sm:$0xff] }
 0x167   : > { %v6480_v36 = vpop.permute.xlu1 %1165  ;;  %v6482_v24 = vpop.permute.xlu0 %1171 }
 0x169   : > { %1345 = vrot.lane.b32.xlu1 %v9118_v21, %s5454_s20  ;;  %1415 = vrot.lane.b32.xlu0 %v9119_v20, %s5455_s21  ;;  %v9121_v21 = vld [vmem:[#allocation21_spill] sm:$0xff] }
 0x16b   : > { %v6490_v49 = vpop.permute.xlu1 %1169  ;;  %v6492_v17 = vpop.permute.xlu0 %1175 }
 0x16d   : > { %1349 = vrot.lane.b32.xlu1 %v6486_v29, %s5454_s20  ;;  %1419 = vrot.lane.b32.xlu0 %v9120_v35, %s5455_s21 }
 0x16f   : > { %v6498_v46 = vpop.permute.xlu1 %1173  ;;  %v6500_v18 = vpop.permute.xlu0 %1179 }
 0x171   : > { %1417 = vrot.lane.b32.xlu1 %v9121_v21, %s5455_s21  ;;  %1423 = vrot.lane.b32.xlu0 %v9122_v47, %s5455_s21  ;;  %v9129_v21 = vld [vmem:[#allocation31_spill] sm:$0xff] }
 0x173   : > { %v6506_v20 = vpop.permute.xlu1 %1177  ;;  %v6508_v15 = vpop.permute.xlu0 %1183 }
 0x174   : > { %9123 = vst [vmem:[#allocation6_spill] sm:$0xff] %v6508_v15 }
 0x175   : > { %1421 = vrot.lane.b32.xlu1 %v9124_v44, %s5455_s21  ;;  %1427 = vrot.lane.b32.xlu0 %v9125_v16, %s5455_s21  ;;  %v9133_v44 = vld [vmem:[#allocation35_spill] sm:$0xff] }
 0x177   : > { %v6514_v35 = vpop.permute.xlu1 %1181  ;;  %v6516_v45 = vpop.permute.xlu0 %1187 }
 0x178   : > { %9126 = vst [vmem:[#allocation8_spill] sm:$0xff] %v6514_v35  ;;  %9127 = vst [vmem:[#allocation10_spill] sm:$0xff] %v6516_v45  ;;  %v731_v35 = vld [vmem:[#allocation2 + $0x122] sm:$0xff] }
 0x179   : > { %1425 = vrot.lane.b32.xlu1 %v9128_v13, %s5455_s21  ;;  %1431 = vrot.lane.b32.xlu0 %v9129_v21, %s5455_s21  ;;  %v9137_v13 = vld [vmem:[#allocation39_spill] sm:$0xff] }
 0x17b   : > { %v6522_v47 = vpop.permute.xlu1 %1185  ;;  %v6524_v42 = vpop.permute.xlu0 %1191 }
 0x17c   : > { %9130 = vst [vmem:[#allocation13_spill] sm:$0xff] %v6522_v47  ;;  %9131 = vst [vmem:[#allocation16_spill] sm:$0xff] %v6524_v42  ;;  %v713_v42 = vld [vmem:[#allocation2 + $0x4a] sm:$0xff]  ;;  %v727_v47 = vld [vmem:[#allocation2 + $0xf2] sm:$0xff] }
 0x17d   : > { %1429 = vrot.lane.b32.xlu1 %v9132_v14, %s5455_s21  ;;  %1435 = vrot.lane.b32.xlu0 %v9133_v44, %s5455_s21  ;;  %v9141_v14 = vld [vmem:[#allocation43_spill] sm:$0xff] }
 0x17f   : > { %v6530_v16 = vpop.permute.xlu1 %1189  ;;  %v6532_v43 = vpop.permute.xlu0 %1195 }
 0x180   : > { %9134 = vst [vmem:[#allocation19_spill] sm:$0xff] %v6530_v16  ;;  %9135 = vst [vmem:[#allocation21_spill] sm:$0xff] %v6532_v43  ;;  %v9144_v43 = vld [vmem:[#allocation45_spill] sm:$0xff] }
 0x181   : > { %1433 = vrot.lane.b32.xlu1 %v9136_v11, %s5455_s21  ;;  %1439 = vrot.lane.b32.xlu0 %v9137_v13, %s5455_s21  ;;  %v9145_v11 = vld [vmem:[#allocation47_spill] sm:$0xff] }
 0x183   : > { %v6538_v21 = vpop.permute.xlu1 %1193  ;;  %v6540_v40 = vpop.permute.xlu0 %1199 }
 0x184   : > { %9138 = vst [vmem:[#allocation23_spill] sm:$0xff] %v6538_v21  ;;  %9139 = vst [vmem:[#allocation25_spill] sm:$0xff] %v6540_v40  ;;  %v9148_v40 = vld [vmem:[#allocation49_spill] sm:$0xff] }
 0x185   : > { %1437 = vrot.lane.b32.xlu1 %v9140_v12, %s5455_s21  ;;  %1443 = vrot.lane.b32.xlu0 %v9141_v14, %s5455_s21  ;;  %v9149_v12 = vld [vmem:[#allocation51_spill] sm:$0xff] }
 0x187   : > { %v6546_v44 = vpop.permute.xlu1 %1197  ;;  %v6548_v41 = vpop.permute.xlu0 %1203 }
 0x188   : > { %9142 = vst [vmem:[#allocation27_spill] sm:$0xff] %v6546_v44  ;;  %9143 = vst [vmem:[#allocation29_spill] sm:$0xff] %v6548_v41  ;;  %v9152_v41 = vld [vmem:[#allocation53_spill] sm:$0xff] }
 0x189   : > { %1441 = vrot.lane.b32.xlu1 %v9144_v43, %s5455_s21  ;;  %1447 = vrot.lane.b32.xlu0 %v9145_v11, %s5455_s21  ;;  %v9153_v43 = vld [vmem:[#allocation55_spill] sm:$0xff] }
 0x18b   : > { %v6554_v13 = vpop.permute.xlu1 %1201  ;;  %v6556_v9 = vpop.permute.xlu0 %1207 }
 0x18c   : > { %9146 = vst [vmem:[#allocation31_spill] sm:$0xff] %v6554_v13  ;;  %9147 = vst [vmem:[#allocation33_spill] sm:$0xff] %v6556_v9  ;;  %v9156_v9 = vld [vmem:[#allocation57_spill] sm:$0xff] }
 0x18d   : > { %1445 = vrot.lane.b32.xlu1 %v9148_v40, %s5455_s21  ;;  %1451 = vrot.lane.b32.xlu0 %v9149_v12, %s5455_s21  ;;  %v9157_v40 = vld [vmem:[#allocation59_spill] sm:$0xff] }
 0x18f   : > { %v6562_v14 = vpop.permute.xlu1 %1205  ;;  %v6564_v44 = vpop.permute.xlu0 %1211 }
 0x190   : > { %9150 = vst [vmem:[#allocation35_spill] sm:$0xff] %v6562_v14  ;;  %9151 = vst [vmem:[#allocation37_spill] sm:$0xff] %v6564_v44  ;;  %v9160_v44 = vld [vmem:[#allocation61_spill] sm:$0xff] }
 0x191   : > { %1449 = vrot.lane.b32.xlu1 %v9152_v41, %s5455_s21  ;;  %1455 = vrot.lane.b32.xlu0 %v9153_v43, %s5455_s21  ;;  %v9161_v41 = vld [vmem:[#allocation63_spill] sm:$0xff] }
 0x193   : > { %v6570_v11 = vpop.permute.xlu1 %1209  ;;  %v6572_v13 = vpop.permute.xlu0 %1215 }
 0x194   : > { %9154 = vst [vmem:[#allocation39_spill] sm:$0xff] %v6570_v11  ;;  %9155 = vst [vmem:[#allocation41_spill] sm:$0xff] %v6572_v13  ;;  %v9163_v13 = vld [vmem:[#allocation65_spill] sm:$0xff] }
 0x195   : > { %1453 = vrot.lane.b32.xlu1 %v9156_v9, %s5455_s21  ;;  %1459 = vrot.lane.b32.xlu0 %v9157_v40, %s5455_s21  ;;  %v2030_v40 = vld [vmem:[%s8957_s1] sm:$0xff] }
 0x197   : > { %v6578_v12 = vpop.permute.xlu1 %1213  ;;  %v6580_v14 = vpop.permute.xlu0 %1219 }
 0x198   : > { %9158 = vst [vmem:[#allocation43_spill] sm:$0xff] %v6578_v12  ;;  %9159 = vst [vmem:[#allocation45_spill] sm:$0xff] %v6580_v14  ;;  %v9165_v14 = vld [vmem:[#allocation68_spill] sm:$0xff]  ;;  %v2033_v12 = vld [vmem:[%s8957_s1 + $0x18] sm:$0xff] }
 0x199   : > { %1457 = vrot.lane.b32.xlu1 %v9160_v44, %s5455_s21  ;;  %1463 = vrot.lane.b32.xlu0 %v9161_v41, %s5455_s21  ;;  %v2031_v44 = vld [vmem:[%s8957_s1 + $0x8] sm:$0xff] }
 0x19b   : > { %v6586_v43 = vpop.permute.xlu1 %1217  ;;  %v6588_v11 = vpop.permute.xlu0 %1287 }
 0x19c   : > { %9162 = vst [vmem:[#allocation47_spill] sm:$0xff] %v6586_v43  ;;  %v5345_v43 = vpack.c.bf16 %v2031_v44, %v2030_v40  ;;  %v679_v40 = vld [vmem:[#allocation2 + $0x31] sm:$0xff] }
 0x19d   : > { %1461 = vrot.lane.b32.xlu1 %v9163_v13, %s5455_s21  ;;  %1467 = vrot.lane.b32.xlu0 %v6198_v58, %s5455_s21  ;;  %v677_v13 = vld [vmem:[#allocation2 + $0x198] sm:$0xff] }
 0x19e   : > { %5346 = vmatprep.subr.bf16.mxu0 %v5345_v43  ;;  %5377 = vmatprep.subr.bf16.mxu1 %v5345_v43 }
 0x19f   : > { %v6594_v9 = vpop.permute.xlu1 %1221  ;;  %v6602_v41 = vpop.permute.xlu0 %1291  ;;  %5348 = vmatpush3.bf16.msra.mxu0 %v5345_v43  ;;  %5380 = vmatpush3.bf16.msra.mxu1 %v5345_v43  ;;  %v681_v43 = vld [vmem:[#allocation2 + $0x49] sm:$0xff] }
 0x1a0   : > { %9164 = vst [vmem:[#allocation49_spill] sm:$0xff] %v6594_v9  ;;  %v2032_v9 = vld [vmem:[%s8957_s1 + $0x10] sm:$0xff] }
 0x1a1   : > { %1465 = vrot.lane.b32.xlu1 %v9165_v14, %s5455_s21  ;;  %1471 = vrot.lane.b32.xlu0 %v6206_v34, %s5455_s21  ;;  %v5349_v34 = vpack.c.bf16 %v2033_v12, %v2032_v9  ;;  %v680_v9 = vld [vmem:[#allocation2 + $0x39] sm:$0xff] }
 0x1a3   : > { %v6608_v58 = vpop.permute.xlu1 %1289  ;;  %v6616_v21 = vpop.permute.xlu0 %1295  ;;  %5350 = vmatprep.subr.bf16.mxu0 %v5349_v34  ;;  %5378 = vmatprep.subr.bf16.mxu1 %v5349_v34 }
 0x1a4   : > { %5352 = vmatpush3.bf16.msra.mxu0 %v5349_v34  ;;  %5381 = vmatpush3.bf16.msra.mxu1 %v5349_v34  ;;  %v711_v34 = vld [vmem:[#allocation2 + $0x32] sm:$0xff] }
 0x1a5   : > { %1469 = vrot.lane.b32.xlu1 %v6216_v0, %s5455_s21  ;;  %1475 = vrot.lane.b32.xlu0 %v677_v13, %s5455_s21  ;;  %v2034_v0 = vld [vmem:[%s8957_s1 + $0x20] sm:$0xf] }
 0x1a6   : > { %5171 = vmatprep.subr.msk.mxu0 %vm2139_vm3, %v2034_v0  ;;  %5379 = vmatprep.subr.msk.mxu1 %vm2139_vm3, %v2034_v0 }
 0x1a7   : > { %v6621_v14 = vpop.permute.xlu1 %1293  ;;  %v6623_v44 = vpop.permute.xlu0 %1299 }
 0x1a8   : > { %5172 = vmatpush3.msk.msra.mxu0 %vm2139_vm3, %v2034_v0  ;;  %5382 = vmatpush3.msk.msra.mxu1 %vm2139_vm3, %v2034_v0  ;;  %v712_v0 = vld [vmem:[#allocation2 + $0x3a] sm:$0xff] }
 0x1a9   : > { %1473 = vrot.lane.b32.xlu1 %v6222_v39, %s5455_s21  ;;  %1543 = vrot.lane.b32.xlu0 %v679_v40, %s5456_s14 }
 0x1ab   : > { %v6631_v12 = vpop.permute.xlu1 %1297  ;;  %v6636_v39 = vpop.permute.xlu0 %1303 }
 0x1ad   : > { %1477 = vrot.lane.b32.xlu1 %v678_v32, %s5455_s21  ;;  %1547 = vrot.lane.b32.xlu0 %v681_v43, %s5456_s14 }
 0x1af   : > { %v6641_v13 = vpop.permute.xlu1 %1301  ;;  %v6643_v40 = vpop.permute.xlu0 %1307 }
 0x1b1   : > { %1545 = vrot.lane.b32.xlu1 %v680_v9, %s5456_s14  ;;  %1671 = vrot.lane.b32.xlu0 %v711_v34, %s5457_s15  ;;  %v714_v9 = vld [vmem:[#allocation2 + $0x52] sm:$0xff] }
 0x1b3   : > { %v6647_v38 = vpop.permute.xlu1 %1305  ;;  %v6649_v32 = vpop.permute.xlu0 %1311 }
 0x1b4   : > { %9166 = vst [vmem:[#allocation51_spill] sm:$0xff] %v6649_v32  ;;  %v729_v32 = vld [vmem:[#allocation2 + $0x10a] sm:$0xff] }
 0x1b5   : > { %1549 = vrot.lane.b32.xlu1 %v682_v10, %s5456_s14  ;;  %1675 = vrot.lane.b32.xlu0 %v713_v42, %s5457_s15  ;;  %v684_v10 = vld [vmem:[#allocation2 + $0x69] sm:$0xff] }
 0x1b7   : > { %v6653_v43 = vpop.permute.xlu1 %1309  ;;  %v6655_v16 = vpop.permute.xlu0 %1315 }
 0x1b8   : > { %9167 = vst [vmem:[#allocation53_spill] sm:$0xff] %v6653_v43  ;;  %9168 = vst [vmem:[#allocation55_spill] sm:$0xff] %v6655_v16  ;;  %v717_v16 = vld [vmem:[#allocation2 + $0x7a] sm:$0xff] }
 0x1b9   : > { %1673 = vrot.lane.b32.xlu1 %v712_v0, %s5457_s15  ;;  %1551 = vrot.lane.b32.xlu0 %v683_v7, %s5456_s14  ;;  %v716_v0 = vld [vmem:[#allocation2 + $0x6a] sm:$0xff]  ;;  %v699_v43 = vld [vmem:[#allocation2 + $0x121] sm:$0xff] }
 0x1bb   : > { %v6659_v34 = vpop.permute.xlu1 %1313  ;;  %v6661_v8 = vpop.permute.xlu0 %1319 }
 0x1bc   : > { %9169 = vst [vmem:[#allocation57_spill] sm:$0xff] %v6659_v34  ;;  %9170 = vst [vmem:[#allocation59_spill] sm:$0xff] %v6661_v8  ;;  %v687_v8 = vld [vmem:[#allocation2 + $0x91] sm:$0xff] }
 0x1bd   : > { %1677 = vrot.lane.b32.xlu1 %v714_v9, %s5457_s15  ;;  %1679 = vrot.lane.b32.xlu0 %v715_v30, %s5457_s15  ;;  %v686_v9 = vld [vmem:[#allocation2 + $0x81] sm:$0xff] }
 0x1bf   : > { %v6665_v42 = vpop.permute.xlu1 %1317  ;;  %v6667_v45 = vpop.permute.xlu0 %1323 }
 0x1c0   : > { %9171 = vst [vmem:[#allocation61_spill] sm:$0xff] %v6665_v42  ;;  %9172 = vst [vmem:[#allocation63_spill] sm:$0xff] %v6667_v45  ;;  %v719_v45 = vld [vmem:[#allocation2 + $0x92] sm:$0xff] }
 0x1c1   : > { %1553 = vrot.lane.b32.xlu1 %v684_v10, %s5456_s14  ;;  %1555 = vrot.lane.b32.xlu0 %v685_v31, %s5456_s14  ;;  %v718_v10 = vld [vmem:[#allocation2 + $0x82] sm:$0xff] }
 0x1c3   : > { %v6671_v7 = vpop.permute.xlu1 %1321  ;;  %v6673_v34 = vpop.permute.xlu0 %1327 }
 0x1c4   : > { %9173 = vst [vmem:[#allocation65_spill] sm:$0xff] %v6671_v7  ;;  %9174 = vst [vmem:[#allocation68_spill] sm:$0xff] %v6673_v34  ;;  %v689_v34 = vld [vmem:[#allocation2 + $0xa9] sm:$0xff] }
 0x1c5   : > { %1681 = vrot.lane.b32.xlu1 %v716_v0, %s5457_s15  ;;  %1683 = vrot.lane.b32.xlu0 %v717_v16, %s5457_s15  ;;  %v688_v0 = vld [vmem:[#allocation2 + $0x99] sm:$0xff] }
 0x1c7   : > { %v6677_v30 = vpop.permute.xlu1 %1325  ;;  %v6679_v42 = vpop.permute.xlu0 %1331 }
 0x1c8   : > { %9175 = vst [vmem:[#allocation114_spill] sm:$0xff] %v6677_v30  ;;  %9176 = vst [vmem:[#allocation115_spill] sm:$0xff] %v6679_v42  ;;  %v721_v42 = vld [vmem:[#allocation2 + $0xaa] sm:$0xff] }
 0x1c9   : > { %1557 = vrot.lane.b32.xlu1 %v686_v9, %s5456_s14  ;;  %1559 = vrot.lane.b32.xlu0 %v687_v8, %s5456_s14  ;;  %v720_v9 = vld [vmem:[#allocation2 + $0x9a] sm:$0xff] }
 0x1cb   : > { %v6683_v31 = vpop.permute.xlu1 %1329  ;;  %v6685_v7 = vpop.permute.xlu0 %1335 }
 0x1cc   : > { %9177 = vst [vmem:[#allocation116_spill] sm:$0xff] %v6683_v31  ;;  %9178 = vst [vmem:[#allocation117_spill] sm:$0xff] %v6685_v7  ;;  %v691_v7 = vld [vmem:[#allocation2 + $0xc1] sm:$0xff] }
 0x1cd   : > { %1685 = vrot.lane.b32.xlu1 %v718_v10, %s5457_s15  ;;  %1687 = vrot.lane.b32.xlu0 %v719_v45, %s5457_s15  ;;  %v690_v10 = vld [vmem:[#allocation2 + $0xb1] sm:$0xff] }
 0x1cf   : > { %v6689_v16 = vpop.permute.xlu1 %1333  ;;  %v6691_v30 = vpop.permute.xlu0 %1339 }
 0x1d0   : > { %9179 = vst [vmem:[#allocation118_spill] sm:$0xff] %v6689_v16  ;;  %9180 = vst [vmem:[#allocation119_spill] sm:$0xff] %v6691_v30  ;;  %v723_v30 = vld [vmem:[#allocation2 + $0xc2] sm:$0xff] }
 0x1d1   : > { %1561 = vrot.lane.b32.xlu1 %v688_v0, %s5456_s14  ;;  %1563 = vrot.lane.b32.xlu0 %v689_v34, %s5456_s14  ;;  %v722_v0 = vld [vmem:[#allocation2 + $0xb2] sm:$0xff] }
 0x1d3   : > { %v6695_v8 = vpop.permute.xlu1 %1337  ;;  %v6697_v31 = vpop.permute.xlu0 %1343 }
 0x1d4   : > { %9181 = vst [vmem:[#allocation120_spill] sm:$0xff] %v6695_v8  ;;  %9182 = vst [vmem:[#allocation121_spill] sm:$0xff] %v6697_v31  ;;  %v693_v31 = vld [vmem:[#allocation2 + $0xd9] sm:$0xff] }
 0x1d5   : > { %1689 = vrot.lane.b32.xlu1 %v720_v9, %s5457_s15  ;;  %1691 = vrot.lane.b32.xlu0 %v721_v42, %s5457_s15  ;;  %v692_v9 = vld [vmem:[#allocation2 + $0xc9] sm:$0xff] }
 0x1d7   : > { %v6701_v45 = vpop.permute.xlu1 %1341  ;;  %v6703_v16 = vpop.permute.xlu0 %1347 }
 0x1d8   : > { %9183 = vst [vmem:[#allocation122_spill] sm:$0xff] %v6701_v45  ;;  %9184 = vst [vmem:[#allocation123_spill] sm:$0xff] %v6703_v16  ;;  %v725_v16 = vld [vmem:[#allocation2 + $0xda] sm:$0xff] }
 0x1d9   : > { %1565 = vrot.lane.b32.xlu1 %v690_v10, %s5456_s14  ;;  %1567 = vrot.lane.b32.xlu0 %v691_v7, %s5456_s14  ;;  %v724_v10 = vld [vmem:[#allocation2 + $0xca] sm:$0xff] }
 0x1db   : > { %v6707_v34 = vpop.permute.xlu1 %1345  ;;  %v6709_v8 = vpop.permute.xlu0 %1415 }
 0x1dc   : > { %9185 = vst [vmem:[#allocation124_spill] sm:$0xff] %v6707_v34 }
 0x1dd   : > { %1693 = vrot.lane.b32.xlu1 %v722_v0, %s5457_s15  ;;  %1695 = vrot.lane.b32.xlu0 %v723_v30, %s5457_s15  ;;  %v694_v0 = vld [vmem:[#allocation2 + $0xe1] sm:$0xff] }
 0x1df   : > { %v6713_v42 = vpop.permute.xlu1 %1349  ;;  %v6715_v45 = vpop.permute.xlu0 %1419 }
 0x1e0   : > { %9186 = vst [vmem:[#allocation125_spill] sm:$0xff] %v6713_v42  ;;  %v695_v42 = vld [vmem:[#allocation2 + $0xf1] sm:$0xff] }
 0x1e1   : > { %1569 = vrot.lane.b32.xlu1 %v692_v9, %s5456_s14  ;;  %1571 = vrot.lane.b32.xlu0 %v693_v31, %s5456_s14  ;;  %v726_v9 = vld [vmem:[#allocation2 + $0xe2] sm:$0xff] }
 0x1e3   : > { %v6719_v7 = vpop.permute.xlu1 %1417  ;;  %v6721_v34 = vpop.permute.xlu0 %1423 }
 0x1e5   : > { %1697 = vrot.lane.b32.xlu1 %v724_v10, %s5457_s15  ;;  %1699 = vrot.lane.b32.xlu0 %v725_v16, %s5457_s15  ;;  %v696_v10 = vld [vmem:[#allocation2 + $0xf9] sm:$0xff] }
 0x1e7   : > { %v6725_v30 = vpop.permute.xlu1 %1421  ;;  %v6727_v48 = vpop.permute.xlu0 %1427 }
 0x1e9   : > { %1573 = vrot.lane.b32.xlu1 %v694_v0, %s5456_s14  ;;  %1575 = vrot.lane.b32.xlu0 %v695_v42, %s5456_s14  ;;  %v728_v0 = vld [vmem:[#allocation2 + $0xfa] sm:$0xff] }
 0x1eb   : > { %v6731_v31 = vpop.permute.xlu1 %1425  ;;  %v6733_v1 = vpop.permute.xlu0 %1431 }
 0x1ed   : > { %1701 = vrot.lane.b32.xlu1 %v726_v9, %s5457_s15  ;;  %1703 = vrot.lane.b32.xlu0 %v727_v47, %s5457_s15  ;;  %v698_v9 = vld [vmem:[#allocation2 + $0x111] sm:$0xff] }
 0x1ef   : > { %v6737_v16 = vpop.permute.xlu1 %1429  ;;  %v6739_v27 = vpop.permute.xlu0 %1435 }
 0x1f1   : > { %1577 = vrot.lane.b32.xlu1 %v696_v10, %s5456_s14  ;;  %1579 = vrot.lane.b32.xlu0 %v697_v6, %s5456_s14  ;;  %v730_v10 = vld [vmem:[#allocation2 + $0x112] sm:$0xff] }
 0x1f3   : > { %v6743_v42 = vpop.permute.xlu1 %1433  ;;  %v6745_v15 = vpop.permute.xlu0 %1439 }
 0x1f4   : > { %9187 = vst [vmem:[#allocation126_spill] sm:$0xff] %v6745_v15  ;;  %v701_v15 = vld [vmem:[#allocation2 + $0x139] sm:$0xff] }
 0x1f5   : > { %1705 = vrot.lane.b32.xlu1 %v728_v0, %s5457_s15  ;;  %1707 = vrot.lane.b32.xlu0 %v729_v32, %s5457_s15  ;;  %v700_v0 = vld [vmem:[#allocation2 + $0x129] sm:$0xff] }
 0x1f7   : > { %v6749_v47 = vpop.permute.xlu1 %1437  ;;  %v6751_v3 = vpop.permute.xlu0 %1443 }
 0x1f8   : > { %9188 = vst [vmem:[#allocation127_spill] sm:$0xff] %v6749_v47  ;;  %9189 = vst [vmem:[#allocation128_spill] sm:$0xff] %v6751_v3  ;;  %v733_v3 = vld [vmem:[#allocation2 + $0x13a] sm:$0xff] }
 0x1f9   : > { %1581 = vrot.lane.b32.xlu1 %v698_v9, %s5456_s14  ;;  %1583 = vrot.lane.b32.xlu0 %v699_v43, %s5456_s14  ;;  %v732_v9 = vld [vmem:[#allocation2 + $0x12a] sm:$0xff] }
 0x1fb   : > { %v6755_v6 = vpop.permute.xlu1 %1441  ;;  %v6757_v62 = vpop.permute.xlu0 %1447 }
 0x1fc   : > { %9190 = vst [vmem:[#allocation129_spill] sm:$0xff] %v6755_v6  ;;  %9191 = vst [vmem:[#allocation130_spill] sm:$0xff] %v6757_v62  ;;  %v703_v62 = vld [vmem:[#allocation2 + $0x151] sm:$0xff] }
 0x1fd   : > { %1709 = vrot.lane.b32.xlu1 %v730_v10, %s5457_s15  ;;  %1711 = vrot.lane.b32.xlu0 %v731_v35, %s5457_s15  ;;  %v702_v10 = vld [vmem:[#allocation2 + $0x141] sm:$0xff] }
 0x1ff   : > { %v6761_v32 = vpop.permute.xlu1 %1445  ;;  %v6763_v47 = vpop.permute.xlu0 %1451 }
 0x200   : > { %9192 = vst [vmem:[#allocation131_spill] sm:$0xff] %v6761_v32  ;;  %9193 = vst [vmem:[#allocation132_spill] sm:$0xff] %v6763_v47  ;;  %v735_v47 = vld [vmem:[#allocation2 + $0x152] sm:$0xff] }
 0x201   : > { %1585 = vrot.lane.b32.xlu1 %v700_v0, %s5456_s14  ;;  %1587 = vrot.lane.b32.xlu0 %v701_v15, %s5456_s14  ;;  %v734_v0 = vld [vmem:[#allocation2 + $0x142] sm:$0xff] }
 0x203   : > { %v6767_v43 = vpop.permute.xlu1 %1449  ;;  %v6769_v6 = vpop.permute.xlu0 %1455 }
 0x204   : > { %9194 = vst [vmem:[#allocation133_spill] sm:$0xff] %v6767_v43  ;;  %9195 = vst [vmem:[#allocation134_spill] sm:$0xff] %v6769_v6  ;;  %v705_v6 = vld [vmem:[#allocation2 + $0x169] sm:$0xff] }
 0x205   : > { %1713 = vrot.lane.b32.xlu1 %v732_v9, %s5457_s15  ;;  %1715 = vrot.lane.b32.xlu0 %v733_v3, %s5457_s15  ;;  %v704_v9 = vld [vmem:[#allocation2 + $0x159] sm:$0xff] }
 0x207   : > { %v6773_v35 = vpop.permute.xlu1 %1453  ;;  %v6775_v32 = vpop.permute.xlu0 %1459 }
 0x208   : > { %9196 = vst [vmem:[#allocation135_spill] sm:$0xff] %v6773_v35  ;;  %9197 = vst [vmem:[#allocation136_spill] sm:$0xff] %v6775_v32  ;;  %v737_v32 = vld [vmem:[#allocation2 + $0x16a] sm:$0xff] }
 0x209   : > { %1589 = vrot.lane.b32.xlu1 %v702_v10, %s5456_s14  ;;  %1591 = vrot.lane.b32.xlu0 %v703_v62, %s5456_s14  ;;  %v736_v10 = vld [vmem:[#allocation2 + $0x15a] sm:$0xff] }
 0x20b   : > { %v6779_v15 = vpop.permute.xlu1 %1457  ;;  %v6781_v43 = vpop.permute.xlu0 %1463 }
 0x20c   : > { %9198 = vst [vmem:[#allocation137_spill] sm:$0xff] %v6779_v15  ;;  %9199 = vst [vmem:[#allocation138_spill] sm:$0xff] %v6781_v43  ;;  %v9208_v43 = vld [vmem:[#allocation4_spill] sm:$0xff] }
 0x20d   : > { %1717 = vrot.lane.b32.xlu1 %v734_v0, %s5457_s15  ;;  %1719 = vrot.lane.b32.xlu0 %v735_v47, %s5457_s15  ;;  %v706_v0 = vld [vmem:[#allocation2 + $0x171] sm:$0xff] }
 0x20f   : > { %v6785_v3 = vpop.permute.xlu1 %1461  ;;  %v6787_v35 = vpop.permute.xlu0 %1467 }
 0x210   : > { %9200 = vst [vmem:[#allocation139_spill] sm:$0xff] %v6785_v3  ;;  %9201 = vst [vmem:[#allocation140_spill] sm:$0xff] %v6787_v35  ;;  %v2471_v35 = vld [vmem:[%s8963_s7] sm:$0xff] }
 0x211   : > { %1593 = vrot.lane.b32.xlu1 %v704_v9, %s5456_s14  ;;  %1595 = vrot.lane.b32.xlu0 %v705_v6, %s5456_s14  ;;  %v2472_v6 = vld [vmem:[%s8963_s7 + $0x8] sm:$0xff] }
 0x213   : > { %v6791_v62 = vpop.permute.xlu1 %1465  ;;  %v6793_v15 = vpop.permute.xlu0 %1471 }
 0x214   : > { %9202 = vst [vmem:[#allocation141_spill] sm:$0xff] %v6791_v62  ;;  %9203 = vst [vmem:[#allocation142_spill] sm:$0xff] %v6793_v15  ;;  %v6808_v15 = vpack.c.bf16 %v2472_v6, %v2471_v35  ;;  %v709_v6 = vld [vmem:[#allocation2 + $0x199] sm:$0xff] }
 0x215   : > { %1721 = vrot.lane.b32.xlu1 %v736_v10, %s5457_s15  ;;  %1723 = vrot.lane.b32.xlu0 %v737_v32, %s5457_s15  ;;  %v738_v10 = vld [vmem:[#allocation2 + $0x172] sm:$0xff] }
 0x216   : > { %9206 = vst [vmem:[#allocation145_spill] sm:$0xff] %v6808_v15  ;;  %5354 = vmatprep.subr.bf16.mxu1 %v6808_v15  ;;  %v9214_v15 = vld [vmem:[#allocation66_spill] sm:$0xff] }
 0x217   : > { %v6797_v47 = vpop.permute.xlu1 %1469  ;;  %v6805_v9 = vpop.permute.xlu0 %1475 }
 0x218   : > { %9204 = vst [vmem:[#allocation143_spill] sm:$0xff] %v6797_v47  ;;  %9205 = vst [vmem:[#allocation144_spill] sm:$0xff] %v6805_v9  ;;  %v454_v47 = vld [vmem:[#allocation2] sm:$0xff] }
 0x219   : > { %1597 = vrot.lane.b32.xlu1 %v706_v0, %s5456_s14  ;;  %1599 = vrot.lane.b32.xlu0 %v6340_v56, %s5456_s14  ;;  %v1767_v9 = vsel %vm333_vm0, %v454_v47, %v9208_v43  ;;  %v9210_v0 = vld [vmem:[#allocation62_spill] sm:$0xff]  ;;  %v455_v43 = vld [vmem:[#allocation2 + $0x8] sm:$0xff] }
 0x21a   : > { %v1800_v56 = vsel %vm1799_vm2, %v1767_v9, %v9210_v0  ;;  %v741_v0 = vld [vmem:[#allocation2 + $0x19a] sm:$0xff] }
 0x21b   : > { %v6812_v32 = vpop.permute.xlu1 %1473  ;;  %v1544_v62 = vpop.permute.xlu0 %1543 }
 0x21c   : > { %9207 = vst [vmem:[#allocation146_spill] sm:$0xff] %v6812_v32  ;;  %v1833_v32 = vsel %vm1832_vm4, %v1800_v56, %v6324_v52  ;;  %v9211_v56 = vld [vmem:[#allocation5_spill] sm:$0xff] }
 0x21d   : > { %1725 = vrot.lane.b32.xlu1 %v738_v10, %s5457_s15  ;;  %1727 = vrot.lane.b32.xlu0 %v6472_v22, %s5457_s15  ;;  %v1866_v47 = vsel %vm1865_vm5, %v1833_v32, %v6456_v23  ;;  %v5404_v23 = vld [vmem:[#allocation2 + $0x18] sm:$0xff] }
 0x21e   : > { %v1899_v22 = vsel %vm1898_vm6, %v1866_v47, %v6588_v11  ;;  %v9212_v11 = vld [vmem:[#allocation7_spill] sm:$0xff] }
 0x21f   : > { %v6820_v35 = vpop.permute.xlu1 %1477  ;;  %v1548_v10 = vpop.permute.xlu0 %1547  ;;  %v1932_v52 = vsel %vm1931_vm7, %v1899_v22, %v6709_v8  ;;  %v1769_v32 = vsel %vm333_vm0, %v5404_v23, %v9212_v11  ;;  %v710_v22 = vld [vmem:[#allocation2 + $0x1a1] sm:$0xff]  ;;  %v9216_v23 = vld [vmem:[#allocation70_spill] sm:$0xff] }
 0x220   : > { %9209 = vst [vmem:[#allocation4_spill] sm:$0xff] %v6820_v35  ;;  %v1965_v35 = vsel %vm1964_vm8, %v1932_v52, %v1544_v62 }
 0x221   : > { %1601 = vrot.lane.b32.xlu1 %v6354_v60, %s5456_s14  ;;  %1603 = vrot.lane.b32.xlu0 %v709_v6, %s5456_s14  ;;  %v1768_v60 = vsel %vm333_vm0, %v455_v43, %v9211_v56  ;;  %v9213_v6 = vld [vmem:[#allocation67_spill] sm:$0xff]  ;;  %v1802_v43 = vsel %vm1799_vm2, %v1769_v32, %v9214_v15  ;;  %v742_v32 = vld [vmem:[#allocation2 + $0x1a2] sm:$0xff] }
 0x222   : > { %v1801_v47 = vsel %vm1799_vm2, %v1768_v60, %v9213_v6  ;;  %v1835_v52 = vsel %vm1832_vm4, %v1802_v43, %v6332_v54  ;;  %v9215_v56 = vld [vmem:[#allocation11_spill] sm:$0xff]  ;;  %v5406_v6 = vld [vmem:[#allocation2 + $0x30] sm:$0xff] }
 0x223   : > { %v1546_v9 = vpop.permute.xlu1 %1545  ;;  %v1672_v3 = vpop.permute.xlu0 %1671  ;;  %v1834_v62 = vsel %vm1832_vm4, %v1801_v47, %v6338_v55  ;;  %v1868_v15 = vsel %vm1865_vm5, %v1835_v52, %v6464_v28  ;;  %v9217_v47 = vld [vmem:[#allocation9_spill] sm:$0xff] }
 0x224   : > { %v6845_v8 = vsel %vm1997_vm9, %v1965_v35, %v1672_v3  ;;  %v1867_v3 = vsel %vm1865_vm5, %v1834_v62, %v6470_v33  ;;  %v5405_v35 = vld [vmem:[#allocation2 + $0x20] sm:$0xff]  ;;  %v1901_v54 = vsel %vm1898_vm6, %v1868_v15, %v6602_v41  ;;  %v1771_v28 = vsel %vm333_vm0, %v5406_v6, %v9217_v47  ;;  %v9218_v52 = vld [vmem:[#allocation69_spill] sm:$0xff] }
 0x225   : > { %1729 = vrot.lane.b32.xlu1 %v6486_v29, %s5457_s15  ;;  %1731 = vrot.lane.b32.xlu0 %v741_v0, %s5457_s15  ;;  %v1770_v60 = vsel %vm333_vm0, %v5405_v35, %v9215_v56  ;;  %v1900_v55 = vsel %vm1898_vm6, %v1867_v3, %v6608_v58  ;;  %v1804_v41 = vsel %vm1799_vm2, %v1771_v28, %v9218_v52  ;;  %v9222_v28 = vld [vmem:[#allocation71_spill] sm:$0xff] }
 0x226   : > { %5173 = vmatprep.mubr.msk.f32.mxu0 %vm2042_vm10, %v6845_v8  ;;  %v1803_v11 = vsel %vm1799_vm2, %v1770_v60, %v9216_v23  ;;  %v1933_v33 = vsel %vm1931_vm7, %v1900_v55, %v6719_v7 }
 0x227   : > { %v1550_v29 = vpop.permute.xlu1 %1549  ;;  %v1676_v0 = vpop.permute.xlu0 %1675  ;;  %v1836_v58 = vsel %vm1832_vm4, %v1803_v11, %v6348_v57  ;;  %v1966_v43 = vsel %vm1964_vm8, %v1933_v33, %v1546_v9  ;;  %v1837_v57 = vsel %vm1832_vm4, %v1804_v41, %v6342_v50  ;;  %v9221_v33 = vld [vmem:[#allocation12_spill] sm:$0xff] }
 0x228   : > { %v1869_v7 = vsel %vm1865_vm5, %v1836_v58, %v6480_v36  ;;  %v1870_v36 = vsel %vm1865_vm5, %v1837_v57, %v6474_v19  ;;  %v9219_v19 = vld [vmem:[#allocation14_spill] sm:$0xff] }
 0x229   : > { %1605 = vrot.lane.b32.xlu1 %v710_v22, %s5456_s14  ;;  %v1934_v22 = vsel %vm1931_vm7, %v1901_v54, %v6715_v45  ;;  %v1902_v45 = vsel %vm1898_vm6, %v1869_v7, %v6621_v14  ;;  %v1903_v50 = vsel %vm1898_vm6, %v1870_v36, %v6616_v21  ;;  %v9220_v21 = vld [vmem:[#allocation72_spill] sm:$0xff] }
 0x22a   : > { %v1967_v3 = vsel %vm1964_vm8, %v1934_v22, %v1548_v10  ;;  %v1935_v10 = vsel %vm1931_vm7, %v1902_v45, %v6725_v30  ;;  %v1936_v15 = vsel %vm1931_vm7, %v1903_v50, %v6721_v34  ;;  %v5408_v34 = vld [vmem:[#allocation2 + $0x48] sm:$0xff] }
 0x22b   : > { %v1674_v62 = vpop.permute.xlu1 %1673  ;;  %v6891_v9 = vsel %vm1997_vm9, %v1967_v3, %v1676_v0  ;;  %v1552_v56 = vpop.permute.xlu0 %1551  ;;  %v1968_v14 = vsel %vm1964_vm8, %v1935_v10, %v1550_v29  ;;  %v5407_v0 = vld [vmem:[#allocation2 + $0x38] sm:$0xff]  ;;  %v9223_v45 = vld [vmem:[#allocation17_spill] sm:$0xff] }
 0x22c   : > { %v6884_v35 = vsel %vm1997_vm9, %v1966_v43, %v1674_v62  ;;  %v1772_v23 = vsel %vm333_vm0, %v5407_v0, %v9219_v19  ;;  %v1969_v30 = vsel %vm1964_vm8, %v1936_v15, %v1552_v56  ;;  %v9224_v10 = vld [vmem:[#allocation15_spill] sm:$0xff]  ;;  %v9225_v15 = vld [vmem:[#allocation73_spill] sm:$0xff] }
 0x22d   : > { %1733 = vrot.lane.b32.xlu1 %v742_v32, %s5457_s15  ;;  %5174 = vmatmul.mubr.msk.f32.vlgmr.msra.gmra.mrb[0].mxu0 %vm2042_vm10, %v6884_v35  ;;  %v1805_v29 = vsel %vm1799_vm2, %v1772_v23, %v9220_v21  ;;  %v1773_v32 = vsel %vm333_vm0, %v5408_v34, %v9221_v33  ;;  %v9226_v33 = vld [vmem:[#allocation20_spill] sm:$0xff] }
 0x22e   : > { %5176 = vmatprep.mubr.msk.f32.mxu0 %vm2042_vm10, %v6891_v9  ;;  %v1838_v6 = vsel %vm1832_vm4, %v1805_v29, %v6358_v61  ;;  %v1806_v58 = vsel %vm1799_vm2, %v1773_v32, %v9222_v28 }
 0x22f   : > { %v1678_v60 = vpop.permute.xlu1 %1677  ;;  %v1680_v11 = vpop.permute.xlu0 %1679  ;;  %v1871_v22 = vsel %vm1865_vm5, %v1838_v6, %v6490_v49  ;;  %v1839_v43 = vsel %vm1832_vm4, %v1806_v58, %v6350_v59 }
 0x230   : > { %v6908_v55 = vsel %vm1997_vm9, %v1968_v14, %v1678_v60  ;;  %v6918_v54 = vsel %vm1997_vm9, %v1969_v30, %v1680_v11  ;;  %v1904_v62 = vsel %vm1898_vm6, %v1871_v22, %v6631_v12  ;;  %v1872_v61 = vsel %vm1865_vm5, %v1839_v43, %v6482_v24  ;;  %v5409_v12 = vld [vmem:[#allocation2 + $0x50] sm:$0xff] }
 0x231   : > { %5177 = vmatmul.mubr.msk.f32.gmra.mrb[2].mxu0 %vm2042_vm10, %v6908_v55  ;;  %v1937_v41 = vsel %vm1931_vm7, %v1904_v62, %v6731_v31  ;;  %v1905_v7 = vsel %vm1898_vm6, %v1872_v61, %v6623_v44  ;;  %v1774_v56 = vsel %vm333_vm0, %v5409_v12, %v9223_v45  ;;  %v9229_v45 = vld [vmem:[#allocation22_spill] sm:$0xff] }
 0x232   : > { %5179 = vmatprep.mubr.msk.f32.mxu0 %vm2042_vm10, %v6918_v54  ;;  %v1938_v49 = vsel %vm1931_vm7, %v1905_v7, %v6727_v48  ;;  %v1807_v44 = vsel %vm1799_vm2, %v1774_v56, %v6234_v4  ;;  %v5410_v48 = vld [vmem:[#allocation2 + $0x60] sm:$0xff] }
 0x233   : > { %v1554_v47 = vpop.permute.xlu1 %1553  ;;  %v1556_v52 = vpop.permute.xlu0 %1555  ;;  %v1775_v50 = vsel %vm333_vm0, %v5410_v48, %v9224_v10  ;;  %v1840_v14 = vsel %vm1832_vm4, %v1807_v44, %v6366_v63  ;;  %v9230_v44 = vld [vmem:[#allocation74_spill] sm:$0xff]  ;;  %v9231_v10 = vld [vmem:[#allocation8_spill] sm:$0xff] }
 0x234   : > { %v1970_v3 = vsel %vm1964_vm8, %v1937_v41, %v1554_v47  ;;  %v1971_v24 = vsel %vm1964_vm8, %v1938_v49, %v1556_v52  ;;  %v1808_v0 = vsel %vm1799_vm2, %v1775_v50, %v9225_v15  ;;  %v1873_v4 = vsel %vm1865_vm5, %v1840_v14, %v6498_v46  ;;  %v9227_v47 = vld [vmem:[#allocation18_spill] sm:$0xff] }
 0x235   : > { %v1841_v19 = vsel %vm1832_vm4, %v1808_v0, %v6360_v53  ;;  %v1906_v23 = vsel %vm1898_vm6, %v1873_v4, %v6641_v13  ;;  %v5411_v13 = vld [vmem:[#allocation2 + $0x68] sm:$0xff]  ;;  %v9232_v50 = vld [vmem:[#allocation94_spill] sm:$0xff] }
 0x236   : > { %v1874_v63 = vsel %vm1865_vm5, %v1841_v19, %v6492_v17  ;;  %v1939_v11 = vsel %vm1931_vm7, %v1906_v23, %v6737_v16  ;;  %v1776_v32 = vsel %vm333_vm0, %v5411_v13, %v9226_v33  ;;  %v9234_v4 = vld [vmem:[#allocation6_spill] sm:$0xff]  ;;  %v9235_v19 = vld [vmem:[#allocation127_spill] sm:$0xff]  ;;  %v9238_v33 = vld [vmem:[#allocation28_spill] sm:$0xff] }
 0x237   : > { %v1682_v57 = vpop.permute.xlu1 %1681  ;;  %v1684_v36 = vpop.permute.xlu0 %1683  ;;  %v1907_v21 = vsel %vm1898_vm6, %v1874_v63, %v6636_v39  ;;  %v1809_v39 = vsel %vm1799_vm2, %v1776_v32, %v6242_v25  ;;  %v5415_v13 = vld [vmem:[#allocation2 + $0x98] sm:$0xff] }
 0x238   : > { %v6944_v59 = vsel %vm1997_vm9, %v1970_v3, %v1682_v57  ;;  %v6954_v31 = vsel %vm1997_vm9, %v1971_v24, %v1684_v36  ;;  %v1940_v46 = vsel %vm1931_vm7, %v1907_v21, %v6733_v1  ;;  %v5412_v1 = vld [vmem:[#allocation2 + $0x78] sm:$0xff]  ;;  %v1842_v58 = vsel %vm1832_vm4, %v1809_v39, %v6374_v2  ;;  %v9228_v57 = vld [vmem:[#allocation24_spill] sm:$0xff] }
 0x239   : > { %5180 = vmatmul.mubr.msk.f32.gmra.mrb[4].mxu0 %vm2042_vm10, %v6944_v59  ;;  %v1777_v28 = vsel %vm333_vm0, %v5412_v1, %v9227_v47  ;;  %v1875_v25 = vsel %vm1865_vm5, %v1842_v58, %v6506_v20  ;;  %v1780_v32 = vsel %vm333_vm0, %v5415_v13, %v9238_v33  ;;  %v9239_v39 = vld [vmem:[#allocation76_spill] sm:$0xff]  ;;  %v9240_v58 = vld [vmem:[#allocation26_spill] sm:$0xff]  ;;  %v9256_v13 = vld [vmem:[#allocation97_spill] sm:$0xff] }
 0x23a   : > { %5182 = vmatprep.mubr.msk.f32.mxu0 %vm2042_vm10, %v6954_v31  ;;  %v1810_v43 = vsel %vm1799_vm2, %v1777_v28, %v6236_v37  ;;  %v1908_v52 = vsel %vm1898_vm6, %v1875_v25, %v6647_v38  ;;  %v5413_v38 = vld [vmem:[#allocation2 + $0x80] sm:$0xff]  ;;  %v1813_v1 = vsel %vm1799_vm2, %v1780_v32, %v9239_v39  ;;  %v5416_v28 = vld [vmem:[#allocation2 + $0xa8] sm:$0xff] }
 0x23b   : > { %v1558_v60 = vpop.permute.xlu1 %1557  ;;  %v1560_v30 = vpop.permute.xlu0 %1559  ;;  %v1843_v62 = vsel %vm1832_vm4, %v1810_v43, %v6368_v51  ;;  %v1941_v41 = vsel %vm1931_vm7, %v1908_v52, %v6743_v42  ;;  %v1778_v49 = vsel %vm333_vm0, %v5413_v38, %v9228_v57  ;;  %v9241_v43 = vld [vmem:[#allocation96_spill] sm:$0xff]  ;;  %v9242_v52 = vld [vmem:[#allocation75_spill] sm:$0xff]  ;;  %v9246_v57 = vld [vmem:[#allocation10_spill] sm:$0xff] }
 0x23c   : > { %v1972_v29 = vsel %vm1964_vm8, %v1939_v11, %v1558_v60  ;;  %v1973_v17 = vsel %vm1964_vm8, %v1940_v46, %v1560_v30  ;;  %v1876_v2 = vsel %vm1865_vm5, %v1843_v62, %v6500_v18  ;;  %v9233_v60 = vld [vmem:[#allocation53_spill] sm:$0xff]  ;;  %v9236_v30 = vld [vmem:[#allocation51_spill] sm:$0xff]  ;;  %v1846_v25 = vsel %vm1832_vm4, %v1813_v1, %v9241_v43  ;;  %v9258_v39 = vld [vmem:[#allocation16_spill] sm:$0xff] }
 0x23d   : > { %v1909_v7 = vsel %vm1898_vm6, %v1876_v2, %v6643_v40  ;;  %v1811_v40 = vsel %vm1799_vm2, %v1778_v49, %v6250_v26  ;;  %v9243_v2 = vld [vmem:[#allocation13_spill] sm:$0xff] }
 0x23e   : > { %v1942_v20 = vsel %vm1931_vm7, %v1909_v7, %v6739_v27  ;;  %v5414_v27 = vld [vmem:[#allocation2 + $0x90] sm:$0xff]  ;;  %v1844_v24 = vsel %vm1832_vm4, %v1811_v40, %v6382_v5  ;;  %v9244_v7 = vld [vmem:[#allocation95_spill] sm:$0xff]  ;;  %v9257_v32 = vld [vmem:[#allocation61_spill] sm:$0xff] }
 0x23f   : > { %v1686_v34 = vpop.permute.xlu1 %1685  ;;  %v1688_v6 = vpop.permute.xlu0 %1687  ;;  %v1779_v56 = vsel %vm333_vm0, %v5414_v27, %v9229_v45  ;;  %v1877_v26 = vsel %vm1865_vm5, %v1844_v24, %v9231_v10  ;;  %v9248_v40 = vld [vmem:[#allocation55_spill] sm:$0xff]  ;;  %v9249_v24 = vld [vmem:[#allocation128_spill] sm:$0xff] }
 0x240   : > { %v6980_v53 = vsel %vm1997_vm9, %v1972_v29, %v1686_v34  ;;  %v6990_v16 = vsel %vm1997_vm9, %v1973_v17, %v1688_v6  ;;  %v1812_v48 = vsel %vm1799_vm2, %v1779_v56, %v9230_v44  ;;  %v1910_v15 = vsel %vm1898_vm6, %v1877_v26, %v9233_v60  ;;  %v9237_v29 = vld [vmem:[#allocation126_spill] sm:$0xff]  ;;  %v9250_v10 = vld [vmem:[#allocation32_spill] sm:$0xff] }
 0x241   : > { %5183 = vmatmul.mubr.msk.f32.gmra.mrb[6].mxu0 %vm2042_vm10, %v6980_v53  ;;  %v1845_v14 = vsel %vm1832_vm4, %v1812_v48, %v9232_v50  ;;  %v1943_v23 = vsel %vm1931_vm7, %v1910_v15, %v9235_v19  ;;  %v5417_v48 = vld [vmem:[#allocation2 + $0xb0] sm:$0xff] }
 0x242   : > { %5185 = vmatprep.mubr.msk.f32.mxu0 %vm2042_vm10, %v6990_v16  ;;  %v1878_v5 = vsel %vm1865_vm5, %v1845_v14, %v9234_v4  ;;  %v1782_v26 = vsel %vm333_vm0, %v5417_v48, %v9250_v10  ;;  %v9251_v60 = vld [vmem:[#allocation78_spill] sm:$0xff]  ;;  %v5418_v4 = vld [vmem:[#allocation2 + $0xc0] sm:$0xff]  ;;  %v9267_v48 = vld [vmem:[#allocation23_spill] sm:$0xff] }
 0x243   : > { %v1562_v22 = vpop.permute.xlu1 %1561  ;;  %v1564_v61 = vpop.permute.xlu0 %1563  ;;  %v1911_v63 = vsel %vm1898_vm6, %v1878_v5, %v9236_v30  ;;  %v1815_v15 = vsel %vm1799_vm2, %v1782_v26, %v9251_v60  ;;  %v9252_v5 = vld [vmem:[#allocation30_spill] sm:$0xff] }
 0x244   : > { %v1974_v37 = vsel %vm1964_vm8, %v1941_v41, %v1562_v22  ;;  %v1975_v18 = vsel %vm1964_vm8, %v1942_v20, %v1564_v61  ;;  %v1944_v34 = vsel %vm1931_vm7, %v1911_v63, %v9237_v29  ;;  %v1781_v22 = vsel %vm333_vm0, %v5416_v28, %v9240_v58  ;;  %v9255_v29 = vld [vmem:[#allocation19_spill] sm:$0xff]  ;;  %v2473_v26 = vld [vmem:[%s8963_s7 + $0x10] sm:$0xff] }
 0x245   : > { %v1814_v61 = vsel %vm1799_vm2, %v1781_v22, %v9242_v52  ;;  %v1879_v41 = vsel %vm1865_vm5, %v1846_v25, %v9243_v2  ;;  %v1783_v19 = vsel %vm333_vm0, %v5418_v4, %v9252_v5  ;;  %v9259_v28 = vld [vmem:[#allocation131_spill] sm:$0xff]  ;;  %v9261_v52 = vld [vmem:[#allocation130_spill] sm:$0xff] }
 0x246   : > { %v9260_v22 = vld [vmem:[#allocation59_spill] sm:$0xff] }
 0x247   : > { %v1690_v3 = vpop.permute.xlu1 %1689  ;;  %v1692_v12 = vpop.permute.xlu0 %1691 }
 0x248   : > { %v7016_v51 = vsel %vm1997_vm9, %v1974_v37, %v1690_v3  ;;  %v7026_v42 = vsel %vm1997_vm9, %v1975_v18, %v1692_v12  ;;  %v1847_v37 = vsel %vm1832_vm4, %v1814_v61, %v9244_v7  ;;  %v9245_v3 = vld [vmem:[#allocation57_spill] sm:$0xff]  ;;  %v9262_v7 = vld [vmem:[#allocation36_spill] sm:$0xff] }
 0x249   : > { %5186 = vmatmul.mubr.msk.f32.gmra.mrb[8].mxu0 %vm2042_vm10, %v7016_v51  ;;  %v1912_v20 = vsel %vm1898_vm6, %v1879_v41, %v9245_v3  ;;  %v1880_v49 = vsel %vm1865_vm5, %v1847_v37, %v9246_v57  ;;  %v9247_v18 = vld [vmem:[#allocation129_spill] sm:$0xff] }
 0x24a   : > { %5188 = vmatprep.mubr.msk.f32.mxu0 %vm2042_vm10, %v7026_v42  ;;  %v1945_v12 = vsel %vm1931_vm7, %v1912_v20, %v9247_v18  ;;  %v1913_v27 = vsel %vm1898_vm6, %v1880_v49, %v9248_v40  ;;  %v5419_v41 = vld [vmem:[#allocation2 + $0xc8] sm:$0xff]  ;;  %v5420_v18 = vld [vmem:[#allocation2 + $0xd8] sm:$0xff] }
 0x24b   : > { %v1566_v36 = vpop.permute.xlu1 %1565  ;;  %v1568_v0 = vpop.permute.xlu0 %1567  ;;  %v1784_v37 = vsel %vm333_vm0, %v5419_v41, %v9262_v7  ;;  %v9278_v7 = vld [vmem:[#allocation102_spill] sm:$0xff] }
 0x24c   : > { %v1976_v11 = vsel %vm1964_vm8, %v1943_v23, %v1566_v36  ;;  %v1977_v17 = vsel %vm1964_vm8, %v1944_v34, %v1568_v0  ;;  %v1946_v36 = vsel %vm1931_vm7, %v1913_v27, %v9249_v24  ;;  %v9253_v23 = vld [vmem:[#allocation98_spill] sm:$0xff]  ;;  %v9265_v27 = vld [vmem:[#allocation100_spill] sm:$0xff]  ;;  %v9266_v24 = vld [vmem:[#allocation79_spill] sm:$0xff] }
 0x24d   : > { %v1848_v30 = vsel %vm1832_vm4, %v1815_v15, %v9253_v23  ;;  %v9269_v15 = vld [vmem:[#allocation65_spill] sm:$0xff] }
 0x24e   : > { %v1881_v34 = vsel %vm1865_vm5, %v1848_v30, %v9255_v29  ;;  %v9271_v30 = vld [vmem:[#allocation133_spill] sm:$0xff] }
 0x24f   : > { %v1694_v21 = vpop.permute.xlu1 %1693  ;;  %v1696_v6 = vpop.permute.xlu0 %1695 }
 0x250   : > { %v7052_v46 = vsel %vm1997_vm9, %v1976_v11, %v1694_v21  ;;  %v7062_v47 = vsel %vm1997_vm9, %v1977_v17, %v1696_v6  ;;  %v9254_v11 = vld [vmem:[#allocation77_spill] sm:$0xff]  ;;  %v1914_v17 = vsel %vm1898_vm6, %v1881_v34, %v9257_v32 }
 0x251   : > { %5189 = vmatmul.mubr.msk.f32.gmra.mrb[10].mxu0 %vm2042_vm10, %v7052_v46  ;;  %v1816_v21 = vsel %vm1799_vm2, %v1783_v19, %v9254_v11  ;;  %v1947_v58 = vsel %vm1931_vm7, %v1914_v17, %v9259_v28  ;;  %v9270_v19 = vld [vmem:[#allocation21_spill] sm:$0xff]  ;;  %v9272_v11 = vld [vmem:[#allocation63_spill] sm:$0xff] }
 0x252   : > { %5191 = vmatprep.mubr.msk.f32.mxu0 %vm2042_vm10, %v7062_v47  ;;  %v1849_v33 = vsel %vm1832_vm4, %v1816_v21, %v9256_v13 }
 0x253   : > { %v1570_v62 = vpop.permute.xlu1 %1569  ;;  %v1572_v38 = vpop.permute.xlu0 %1571  ;;  %v1882_v1 = vsel %vm1865_vm5, %v1849_v33, %v9258_v39  ;;  %v9273_v33 = vld [vmem:[#allocation132_spill] sm:$0xff] }
 0x254   : > { %v1978_v45 = vsel %vm1964_vm8, %v1945_v12, %v1570_v62  ;;  %v1979_v50 = vsel %vm1964_vm8, %v1946_v36, %v1572_v38  ;;  %v1915_v43 = vsel %vm1898_vm6, %v1882_v1, %v9260_v22  ;;  %v9263_v38 = vld [vmem:[#allocation80_spill] sm:$0xff]  ;;  %v9264_v12 = vld [vmem:[#allocation34_spill] sm:$0xff] }
 0x255   : > { %v1948_v61 = vsel %vm1931_vm7, %v1915_v43, %v9261_v52  ;;  %v1817_v57 = vsel %vm1799_vm2, %v1784_v37, %v9263_v38  ;;  %v1785_v40 = vsel %vm333_vm0, %v5420_v18, %v9264_v12  ;;  %v9274_v39 = vld [vmem:[#allocation40_spill] sm:$0xff]  ;;  %v9275_v22 = vld [vmem:[#allocation82_spill] sm:$0xff] }
 0x256   : > { %v1818_v36 = vsel %vm1799_vm2, %v1785_v40, %v9266_v24  ;;  %v5422_v52 = vld [vmem:[#allocation2 + $0xf0] sm:$0xff]  ;;  %v2475_v12 = vld [vmem:[%s8963_s7 + $0x20] sm:$0xf]  ;;  %v9281_v40 = vld [vmem:[#allocation101_spill] sm:$0xff] }
 0x257   : > { %v1698_v56 = vpop.permute.xlu1 %1697  ;;  %v1700_v14 = vpop.permute.xlu0 %1699 }
 0x258   : > { %v7088_v44 = vsel %vm1997_vm9, %v1978_v45, %v1698_v56  ;;  %v7098_v0 = vsel %vm1997_vm9, %v1979_v50, %v1700_v14  ;;  %v1850_v45 = vsel %vm1832_vm4, %v1817_v57, %v9265_v27  ;;  %v2474_v50 = vld [vmem:[%s8963_s7 + $0x18] sm:$0xff] }
 0x259   : > { %5192 = vmatmul.mubr.msk.f32.gmra.mrb[12].mxu0 %vm2042_vm10, %v7088_v44  ;;  %v1883_v10 = vsel %vm1865_vm5, %v1850_v45, %v9267_v48  ;;  %v9268_v14 = vld [vmem:[#allocation99_spill] sm:$0xff]  ;;  %v5357_v13 = vpack.c.bf16 %v2474_v50, %v2473_v26  ;;  %v9282_v45 = vld [vmem:[#allocation114_spill] sm:$0xff]  ;;  %v9285_v50 = vld [vmem:[#allocation68_spill] sm:$0xff] }
 0x25a   : > { %5194 = vmatprep.mubr.msk.f32.mxu0 %vm2042_vm10, %v7098_v0  ;;  %v1851_v60 = vsel %vm1832_vm4, %v1818_v36, %v9268_v14  ;;  %v1916_v4 = vsel %vm1898_vm6, %v1883_v10, %v9269_v15  ;;  %v9280_v57 = vld [vmem:[#allocation27_spill] sm:$0xff]  ;;  %v9283_v36 = vld [vmem:[#allocation25_spill] sm:$0xff] }
 0x25b   : > { %v1574_v63 = vpop.permute.xlu1 %1573  ;;  %v1576_v6 = vpop.permute.xlu0 %1575  ;;  %v1884_v23 = vsel %vm1865_vm5, %v1851_v60, %v9270_v19  ;;  %v9284_v10 = vld [vmem:[#allocation135_spill] sm:$0xff] }
 0x25c   : > { %v1980_v25 = vsel %vm1964_vm8, %v1947_v58, %v1574_v63  ;;  %v1981_v3 = vsel %vm1964_vm8, %v1948_v61, %v1576_v6  ;;  %v1949_v63 = vsel %vm1931_vm7, %v1916_v4, %v9271_v30  ;;  %v1917_v21 = vsel %vm1898_vm6, %v1884_v23, %v9272_v11  ;;  %v5421_v6 = vld [vmem:[#allocation2 + $0xe0] sm:$0xff]  ;;  %v9277_v61 = vld [vmem:[#allocation38_spill] sm:$0xff]  ;;  %v5423_v23 = vld [vmem:[#allocation2 + $0xf8] sm:$0xff] }
 0x25d   : > { %v1950_v32 = vsel %vm1931_vm7, %v1917_v21, %v9273_v33  ;;  %v1786_v1 = vsel %vm333_vm0, %v5421_v6, %v9274_v39  ;;  %v1787_v41 = vsel %vm333_vm0, %v5422_v52, %v9277_v61  ;;  %v9286_v4 = vld [vmem:[#allocation134_spill] sm:$0xff]  ;;  %v9287_v30 = vld [vmem:[#allocation44_spill] sm:$0xff]  ;;  %v5424_v33 = vld [vmem:[#allocation2 + $0x108] sm:$0xff] }
 0x25e   : > { %v1819_v43 = vsel %vm1799_vm2, %v1786_v1, %v9275_v22  ;;  %v9290_v39 = vld [vmem:[#allocation104_spill] sm:$0xff]  ;;  %v9293_v52 = vld [vmem:[#allocation103_spill] sm:$0xff] }
 0x25f   : > { %v1702_v62 = vpop.permute.xlu1 %1701  ;;  %v1704_v20 = vpop.permute.xlu0 %1703  ;;  %v1852_v37 = vsel %vm1832_vm4, %v1819_v43, %v9278_v7  ;;  %v9292_v43 = vld [vmem:[#allocation31_spill] sm:$0xff] }
 0x260   : > { %v7124_v2 = vsel %vm1997_vm9, %v1980_v25, %v1702_v62  ;;  %v7134_v49 = vsel %vm1997_vm9, %v1981_v3, %v1704_v20  ;;  %v9276_v62 = vld [vmem:[#allocation145_spill] sm:$0xff]  ;;  %v1885_v18 = vsel %vm1865_vm5, %v1852_v37, %v9280_v57 }
 0x261   : > { %5195 = vmatmul.mubr.msk.f32.gmra.mrb[14].mxu0 %vm2042_vm10, %v7124_v2  ;;  %5197 = vmatprep.mubr.msk.f32.mxu1 %vm2042_vm10, %v7134_v49  ;;  %v9279_v20 = vld [vmem:[#allocation81_spill] sm:$0xff] }
 0x262   : > { %v1820_v38 = vsel %vm1799_vm2, %v1787_v41, %v9279_v20  ;;  %v9294_v41 = vld [vmem:[#allocation116_spill] sm:$0xff] }
 0x263   : > { %v1578_v56 = vpop.permute.xlu1 %1577  ;;  %v1580_v5 = vpop.permute.xlu0 %1579  ;;  %v1853_v27 = vsel %vm1832_vm4, %v1820_v38, %v9281_v40  ;;  %v9296_v38 = vld [vmem:[#allocation137_spill] sm:$0xff] }
 0x264   : > { %v1982_v29 = vsel %vm1964_vm8, %v1949_v63, %v1578_v56  ;;  %v1983_v28 = vsel %vm1964_vm8, %v1950_v32, %v1580_v5  ;;  %v1918_v56 = vsel %vm1898_vm6, %v1885_v18, %v9282_v45  ;;  %v1886_v48 = vsel %vm1865_vm5, %v1853_v27, %v9283_v36  ;;  %v9289_v32 = vld [vmem:[#allocation42_spill] sm:$0xff]  ;;  %v9297_v18 = vld [vmem:[#allocation115_spill] sm:$0xff]  ;;  %v9298_v45 = vld [vmem:[#allocation136_spill] sm:$0xff] }
 0x265   : > { %v1951_v26 = vsel %vm1931_vm7, %v1918_v56, %v9284_v10  ;;  %v1919_v14 = vsel %vm1898_vm6, %v1886_v48, %v9285_v50  ;;  %v1788_v63 = vsel %vm333_vm0, %v5423_v23, %v9287_v30  ;;  %v1789_v6 = vsel %vm333_vm0, %v5424_v33, %v9289_v32  ;;  %v5425_v36 = vld [vmem:[#allocation2 + $0x110] sm:$0xff]  ;;  %v9299_v48 = vld [vmem:[#allocation48_spill] sm:$0xff]  ;;  %v9305_v32 = vld [vmem:[#allocation105_spill] sm:$0xff] }
 0x266   : > { %v1952_v5 = vsel %vm1931_vm7, %v1919_v14, %v9286_v4  ;;  %v1790_v10 = vsel %vm333_vm0, %v5425_v36, %v9299_v48  ;;  %v9300_v14 = vld [vmem:[#allocation86_spill] sm:$0xff]  ;;  %v5426_v4 = vld [vmem:[#allocation2 + $0x120] sm:$0xff]  ;;  %v9313_v36 = vmov 0.0   ;;  %v5428_v48 = vld [vmem:[#allocation2 + $0x138] sm:$0xff] }
 0x267   : > { %v1706_v34 = vpop.permute.xlu1 %1705  ;;  %v1708_v58 = vpop.permute.xlu0 %1707  ;;  %v9302_v30 = vld [vmem:[#allocation106_spill] sm:$0xff]  ;;  %2717 = vst.msk [vmem:[#allocation3 + $0x28] sm:$0x3] %vm2713_vm11, %v9313_v36  ;;  %2714 = vst.msk [vmem:[#allocation3 + $0x10] sm:$0x3] %vm2713_vm11, %v9313_v36 }
 0x268   : > { %v7166_v17 = vsel %vm1997_vm9, %v1982_v29, %v1706_v34  ;;  %v7176_v25 = vsel %vm1997_vm9, %v1983_v28, %v1708_v58  ;;  %v9288_v29 = vld [vmem:[#allocation84_spill] sm:$0xff]  ;;  %v9291_v58 = vld [vmem:[#allocation83_spill] sm:$0xff]  ;;  %2720 = vst.msk [vmem:[#allocation3 + $0x40] sm:$0x3] %vm2713_vm11, %v9313_v36  ;;  %2723 = vst.msk [vmem:[#allocation3 + $0x58] sm:$0x3] %vm2713_vm11, %v9313_v36 }
 0x269   : > { %5198 = vmatmul.mubr.msk.f32.vlgmr.msra.gmra.mrb[0].mxu1 %vm2042_vm10, %v7166_v17  ;;  %v1821_v34 = vsel %vm1799_vm2, %v1788_v63, %v9288_v29  ;;  %v1822_v22 = vsel %vm1799_vm2, %v1789_v6, %v9291_v58  ;;  %v9307_v58 = vld [vmem:[#allocation33_spill] sm:$0xff]  ;;  %2726 = vst.msk [vmem:[#allocation3 + $0x70] sm:$0x3] %vm2713_vm11, %v9313_v36  ;;  %2729 = vst.msk [vmem:[#allocation3 + $0x88] sm:$0x3] %vm2713_vm11, %v9313_v36 }
 0x26a   : > { %5356 = vmatpush3.bf16.msra.mxu1 %v9276_v62  ;;  %5200 = vmatprep.mubr.msk.f32.mxu1 %vm2042_vm10, %v7176_v25  ;;  %v1854_v1 = vsel %vm1832_vm4, %v1821_v34, %v9290_v39  ;;  %v1855_v61 = vsel %vm1832_vm4, %v1822_v22, %v9293_v52  ;;  %v9304_v34 = vld [vmem:[#allocation35_spill] sm:$0xff]  ;;  %v9306_v39 = vld [vmem:[#allocation118_spill] sm:$0xff]  ;;  %v9309_v52 = vld [vmem:[#allocation117_spill] sm:$0xff]  ;;  %2732 = vst.msk [vmem:[#allocation3 + $0xa0] sm:$0x3] %vm2713_vm11, %v9313_v36 }
 0x26b   : > { %v1582_v3 = vpop.permute.xlu1 %1581  ;;  %5358 = vmatprep.subr.bf16.mxu1 %v5357_v13  ;;  %v1584_v24 = vpop.permute.xlu0 %1583  ;;  %v1887_v62 = vsel %vm1865_vm5, %v1854_v1, %v9292_v43  ;;  %v9308_v43 = vld [vmem:[#allocation139_spill] sm:$0xff]  ;;  %2735 = vst.msk [vmem:[#allocation3 + $0xb8] sm:$0x3] %vm2713_vm11, %v9313_v36  ;;  %2738 = vst.msk [vmem:[#allocation3 + $0xd0] sm:$0x3] %vm2713_vm11, %v9313_v36 }
 0x26c   : > { %v1984_v60 = vsel %vm1964_vm8, %v1951_v26, %v1582_v3  ;;  %v1985_v11 = vsel %vm1964_vm8, %v1952_v5, %v1584_v24  ;;  %v1920_v7 = vsel %vm1898_vm6, %v1887_v62, %v9294_v41  ;;  %v9295_v3 = vld [vmem:[#allocation29_spill] sm:$0xff]  ;;  %v9301_v5 = vld [vmem:[#allocation46_spill] sm:$0xff]  ;;  %2741 = vst.msk [vmem:[#allocation3 + $0xe8] sm:$0x3] %vm2713_vm11, %v9313_v36  ;;  %2744 = vst.msk [vmem:[#allocation3 + $0x100] sm:$0x3] %vm2713_vm11, %v9313_v36 }
 0x26d   : > { %v1888_v20 = vsel %vm1865_vm5, %v1855_v61, %v9295_v3  ;;  %v1953_v57 = vsel %vm1931_vm7, %v1920_v7, %v9296_v38  ;;  %v1791_v23 = vsel %vm333_vm0, %v5426_v4, %v9301_v5  ;;  %v5427_v38 = vld [vmem:[#allocation2 + $0x128] sm:$0xff]  ;;  %2747 = vst.msk [vmem:[#allocation3 + $0x118] sm:$0x3] %vm2713_vm11, %v9313_v36  ;;  %2750 = vst.msk [vmem:[#allocation3 + $0x130] sm:$0x3] %vm2713_vm11, %v9313_v36  ;;  %v9316_v4 = vld [vmem:[#allocation87_spill] sm:$0xff] }
 0x26e   : > { %5360 = vmatpush3.bf16.msra.mxu1 %v5357_v13  ;;  %2753 = vst.msk [vmem:[#allocation3 + $0x148] sm:$0x3] %vm2713_vm11, %v9313_v36  ;;  %2756 = vst.msk [vmem:[#allocation3 + $0x160] sm:$0x3] %vm2713_vm11, %v9313_v36 }
 0x26f   : > { %v1710_v15 = vpop.permute.xlu1 %1709  ;;  %5229 = vmatprep.subr.msk.mxu1 %vm2139_vm3, %v2475_v12  ;;  %v1712_v21 = vpop.permute.xlu0 %1711  ;;  %2759 = vst.msk [vmem:[#allocation3 + $0x178] sm:$0x3] %vm2713_vm11, %v9313_v36  ;;  %2762 = vst.msk [vmem:[#allocation3 + $0x190] sm:$0x3] %vm2713_vm11, %v9313_v36 }
 0x270   : > { %v7207_v19 = vsel %vm1997_vm9, %v1984_v60, %v1710_v15  ;;  %v7217_v13 = vsel %vm1997_vm9, %v1985_v11, %v1712_v21  ;;  %v1823_v60 = vsel %vm1799_vm2, %v1790_v10, %v9300_v14  ;;  %v9303_v21 = vld [vmem:[#allocation85_spill] sm:$0xff]  ;;  %2765 = vst.msk [vmem:[#allocation3 + $0x1a8] sm:$0x3] %vm2713_vm11, %v9313_v36  ;;  %v9314_v10 = vld [vmem:[#allocation50_spill] sm:$0xff] }
 0x271   : > { %5201 = vmatmul.mubr.msk.f32.gmra.mrb[2].mxu1 %vm2042_vm10, %v7207_v19  ;;  %v1856_v63 = vsel %vm1832_vm4, %v1823_v60, %v9302_v30  ;;  %v1824_v29 = vsel %vm1799_vm2, %v1791_v23, %v9303_v21  ;;  %v9317_v23 = vld [vmem:[#allocation39_spill] sm:$0xff]  ;;  %v9319_v21 = vld [vmem:[#allocation120_spill] sm:$0xff] }
 0x272   : > { %5230 = vmatpush3.msk.msra.mxu1 %vm2139_vm3, %v2475_v12  ;;  %5203 = vmatprep.mubr.msk.f32.mxu1 %vm2042_vm10, %v7217_v13  ;;  %v1921_v12 = vsel %vm1898_vm6, %v1888_v20, %v9297_v18  ;;  %v1889_v33 = vsel %vm1865_vm5, %v1856_v63, %v9304_v34  ;;  %v1857_v6 = vsel %vm1832_vm4, %v1824_v29, %v9305_v32  ;;  %v9318_v63 = vld [vmem:[#allocation107_spill] sm:$0xff] }
 0x273   : > { %v1586_v28 = vpop.permute.xlu1 %1585  ;;  %v1588_v37 = vpop.permute.xlu0 %1587  ;;  %v1954_v56 = vsel %vm1931_vm7, %v1921_v12, %v9298_v45  ;;  %v1922_v1 = vsel %vm1898_vm6, %v1889_v33, %v9306_v39  ;;  %v1890_v22 = vsel %vm1865_vm5, %v1857_v6, %v9307_v58  ;;  %v9320_v33 = vld [vmem:[#allocation37_spill] sm:$0xff] }
 0x274   : > { %v1986_v40 = vsel %vm1964_vm8, %v1953_v57, %v1586_v28  ;;  %v1987_v26 = vsel %vm1964_vm8, %v1954_v56, %v1588_v37  ;;  %v1955_v62 = vsel %vm1931_vm7, %v1922_v1, %v9308_v43  ;;  %v1923_v61 = vsel %vm1898_vm6, %v1890_v22, %v9309_v52  ;;  %v9310_v37 = vld [vmem:[#allocation138_spill] sm:$0xff]  ;;  %v9311_v57 = vld [vmem:[#allocation52_spill] sm:$0xff]  ;;  %v9321_v6 = vld [vmem:[#allocation141_spill] sm:$0xff] }
 0x275   : > { %v1956_v3 = vsel %vm1931_vm7, %v1923_v61, %v9310_v37  ;;  %v1792_v18 = vsel %vm333_vm0, %v5427_v38, %v9311_v57  ;;  %v9322_v1 = vld [vmem:[#allocation119_spill] sm:$0xff]  ;;  %v9323_v43 = vld [vmem:[#allocation140_spill] sm:$0xff]  ;;  %v9325_v57 = vld [vmem:[#allocation90_spill] sm:$0xff] }
 0x276   : > { %v5429_v61 = vld [vmem:[#allocation2 + $0x140] sm:$0xff] }
 0x277   : > { %v1714_v27 = vpop.permute.xlu1 %1713  ;;  %v1716_v50 = vpop.permute.xlu0 %1715  ;;  %v2832_v38 = vld [vmem:[#allocation3 + $0x9] sm:$0xff] }
 0x278   : > { %v7244_v24 = vsel %vm1997_vm9, %v1986_v40, %v1714_v27  ;;  %v7254_v15 = vsel %vm1997_vm9, %v1987_v26, %v1716_v50  ;;  %v9312_v27 = vld [vmem:[#allocation88_spill] sm:$0xff]  ;;  %v1793_v26 = vsel %vm333_vm0, %v5428_v48, %v9314_v10  ;;  %3122 = vrot.lane.b32.xlu1 %v2832_v38, %s5451_s17  ;;  %v9327_v48 = vld [vmem:[#allocation110_spill] sm:$0xff] }
 0x279   : > { %5204 = vmatmul.mubr.msk.f32.gmra.mrb[4].mxu1 %vm2042_vm10, %v7244_v24  ;;  %v1825_v45 = vsel %vm1799_vm2, %v1792_v18, %v9312_v27  ;;  %v9315_v50 = vld [vmem:[#allocation108_spill] sm:$0xff]  ;;  %v1826_v5 = vsel %vm1799_vm2, %v1793_v26, %v9316_v4  ;;  %v5430_v27 = vld [vmem:[#allocation2 + $0x150] sm:$0xff] }
 0x27a   : > { %5206 = vmatprep.mubr.msk.f32.mxu1 %vm2042_vm10, %v7254_v15  ;;  %v1858_v14 = vsel %vm1832_vm4, %v1825_v45, %v9315_v50  ;;  %v9326_v45 = vld [vmem:[#allocation54_spill] sm:$0xff]  ;;  %v9328_v50 = vld [vmem:[#allocation89_spill] sm:$0xff] }
 0x27b   : > { %v1590_v11 = vpop.permute.xlu1 %1589  ;;  %v1592_v28 = vpop.permute.xlu0 %1591  ;;  %v1891_v30 = vsel %vm1865_vm5, %v1858_v14, %v9317_v23  ;;  %v1795_v36 = vsel %vm333_vm0, %v5430_v27, %v9326_v45  ;;  %v9339_v27 = vld [vmem:[#allocation112_spill] sm:$0xff] }
 0x27c   : > { %v1988_v41 = vsel %vm1964_vm8, %v1955_v62, %v1590_v11  ;;  %v1989_v12 = vsel %vm1964_vm8, %v1956_v3, %v1592_v28  ;;  %v1859_v11 = vsel %vm1832_vm4, %v1826_v5, %v9318_v63  ;;  %v1924_v29 = vsel %vm1898_vm6, %v1891_v30, %v9319_v21  ;;  %v9330_v5 = vld [vmem:[#allocation109_spill] sm:$0xff]  ;;  %v9331_v30 = vld [vmem:[#allocation122_spill] sm:$0xff] }
 0x27d   : > { %v1892_v32 = vsel %vm1865_vm5, %v1859_v11, %v9320_v33  ;;  %v1957_v39 = vsel %vm1931_vm7, %v1924_v29, %v9321_v6  ;;  %v1828_v14 = vsel %vm1799_vm2, %v1795_v36, %v9328_v50  ;;  %v9332_v21 = vld [vmem:[#allocation41_spill] sm:$0xff] }
 0x27e   : > { %v1925_v28 = vsel %vm1898_vm6, %v1892_v32, %v9322_v1  ;;  %v1861_v23 = vsel %vm1832_vm4, %v1828_v14, %v9330_v5  ;;  %v9334_v32 = vld [vmem:[#allocation121_spill] sm:$0xff]  ;;  %v9342_v14 = vld [vmem:[#allocation111_spill] sm:$0xff] }
 0x27f   : > { %v1718_v7 = vpop.permute.xlu1 %1717  ;;  %v1720_v40 = vpop.permute.xlu0 %1719  ;;  %v1958_v62 = vsel %vm1931_vm7, %v1925_v28, %v9323_v43  ;;  %v1894_v29 = vsel %vm1865_vm5, %v1861_v23, %v9332_v21  ;;  %v9335_v28 = vld [vmem:[#allocation142_spill] sm:$0xff]  ;;  %v5431_v43 = vld [vmem:[#allocation2 + $0x158] sm:$0xff] }
 0x280   : > { %v7280_v20 = vsel %vm1997_vm9, %v1988_v41, %v1718_v7  ;;  %v7290_v56 = vsel %vm1997_vm9, %v1989_v12, %v1720_v40  ;;  %v9324_v41 = vld [vmem:[#allocation56_spill] sm:$0xff]  ;;  %v2831_v40 = vld [vmem:[#allocation3 + $0x1] sm:$0xff]  ;;  %v1927_v6 = vsel %vm1898_vm6, %v1894_v29, %v9334_v32 }
 0x281   : > { %5207 = vmatmul.mubr.msk.f32.gmra.mrb[6].mxu1 %vm2042_vm10, %v7280_v20  ;;  %v1794_v7 = vsel %vm333_vm0, %v5429_v61, %v9324_v41  ;;  %3120 = vrot.lane.b32.xlu0 %v2831_v40, %s5451_s17  ;;  %v9346_v29 = vld [vmem:[#allocation123_spill] sm:$0xff] }
 0x282   : > { %5209 = vmatprep.mubr.msk.f32.mxu1 %vm2042_vm10, %v7290_v56  ;;  %v1827_v18 = vsel %vm1799_vm2, %v1794_v7, %v9325_v57  ;;  %v5432_v57 = vld [vmem:[#allocation2 + $0x168] sm:$0xff] }
 0x283   : > { %v1594_v60 = vpop.permute.xlu1 %1593  ;;  %v1596_v34 = vpop.permute.xlu0 %1595  ;;  %v1860_v10 = vsel %vm1832_vm4, %v1827_v18, %v9327_v48  ;;  %v9338_v18 = vld [vmem:[#allocation58_spill] sm:$0xff]  ;;  %v9340_v48 = vld [vmem:[#allocation91_spill] sm:$0xff] }
 0x284   : > { %v1990_v58 = vsel %vm1964_vm8, %v1957_v39, %v1594_v60  ;;  %v1991_v37 = vsel %vm1964_vm8, %v1958_v62, %v1596_v34  ;;  %v9329_v60 = vld [vmem:[#allocation43_spill] sm:$0xff]  ;;  %v9336_v62 = vld [vmem:[#allocation60_spill] sm:$0xff]  ;;  %v1797_v40 = vsel %vm333_vm0, %v5432_v57, %v9338_v18 }
 0x285   : > { %v1893_v4 = vsel %vm1865_vm5, %v1860_v10, %v9329_v60  ;;  %v9333_v34 = vld [vmem:[#allocation143_spill] sm:$0xff]  ;;  %v1796_v61 = vsel %vm333_vm0, %v5431_v43, %v9336_v62  ;;  %v1830_v10 = vsel %vm1799_vm2, %v1797_v40, %v9340_v48  ;;  %v9351_v40 = vld [vmem:[#allocation49_spill] sm:$0xff]  ;;  %v9353_v48 = vld [vmem:[#allocation4_spill] sm:$0xff] }
 0x286   : > { %v1926_v63 = vsel %vm1898_vm6, %v1893_v4, %v9331_v30  ;;  %v1863_v60 = vsel %vm1832_vm4, %v1830_v10, %v9342_v14  ;;  %v9343_v4 = vld [vmem:[#allocation124_spill] sm:$0xff]  ;;  %v9344_v30 = vld [vmem:[#allocation45_spill] sm:$0xff] }
 0x287   : > { %v1722_v22 = vpop.permute.xlu1 %1721  ;;  %v1724_v3 = vpop.permute.xlu0 %1723  ;;  %v1959_v33 = vsel %vm1931_vm7, %v1926_v63, %v9333_v34  ;;  %v1896_v63 = vsel %vm1865_vm5, %v1863_v60, %v9344_v30 }
 0x288   : > { %v7352_v52 = vsel %vm1997_vm9, %v1990_v58, %v1722_v22  ;;  %v7362_v12 = vsel %vm1997_vm9, %v1991_v37, %v1724_v3  ;;  %v1960_v58 = vsel %vm1931_vm7, %v1927_v6, %v9335_v28  ;;  %v9337_v37 = vld [vmem:[#allocation92_spill] sm:$0xff]  ;;  %v1929_v34 = vsel %vm1898_vm6, %v1896_v63, %v9346_v29  ;;  %v5433_v28 = vld [vmem:[#allocation2 + $0x170] sm:$0xff] }
 0x289   : > { %5210 = vmatmul.mubr.msk.f32.gmra.mrb[8].mxu1 %vm2042_vm10, %v7352_v52  ;;  %v1829_v3 = vsel %vm1799_vm2, %v1796_v61, %v9337_v37  ;;  %v9347_v6 = vld [vmem:[#allocation144_spill] sm:$0xff] }
 0x28a   : > { %5212 = vmatprep.mubr.msk.f32.mxu1 %vm2042_vm10, %v7362_v12  ;;  %v1862_v45 = vsel %vm1832_vm4, %v1829_v3, %v9339_v27  ;;  %v9350_v3 = vld [vmem:[#allocation113_spill] sm:$0xff] }
 0x28b   : > { %v1598_v26 = vpop.permute.xlu1 %1597  ;;  %v1600_v11 = vpop.permute.xlu0 %1599 }
 0x28c   : > { %v1992_v39 = vsel %vm1964_vm8, %v1959_v33, %v1598_v26  ;;  %v1993_v41 = vsel %vm1964_vm8, %v1960_v58, %v1600_v11  ;;  %v9341_v26 = vld [vmem:[#allocation47_spill] sm:$0xff]  ;;  %v9345_v11 = vld [vmem:[#allocation146_spill] sm:$0xff]  ;;  %v9348_v58 = vld [vmem:[#allocation64_spill] sm:$0xff] }
 0x28d   : > { %v1895_v50 = vsel %vm1865_vm5, %v1862_v45, %v9341_v26  ;;  %v1798_v43 = vsel %vm333_vm0, %v5433_v28, %v9348_v58  ;;  %v9352_v45 = vld [vmem:[#allocation125_spill] sm:$0xff] }
 0x28e   : > { %v1928_v5 = vsel %vm1898_vm6, %v1895_v50, %v9343_v4 }
 0x28f   : > { %v1726_v1 = vpop.permute.xlu1 %1725  ;;  %v1728_v7 = vpop.permute.xlu0 %1727  ;;  %v1961_v21 = vsel %vm1931_vm7, %v1928_v5, %v9345_v11 }
 0x290   : > { %v7390_v22 = vsel %vm1997_vm9, %v1992_v39, %v1726_v1  ;;  %v7400_v38 = vsel %vm1997_vm9, %v1993_v41, %v1728_v7  ;;  %v1962_v39 = vsel %vm1931_vm7, %v1929_v34, %v9347_v6  ;;  %v9349_v41 = vld [vmem:[#allocation93_spill] sm:$0xff] }
 0x291   : > { %5213 = vmatmul.mubr.msk.f32.gmra.mrb[10].mxu1 %vm2042_vm10, %v7390_v22  ;;  %v1831_v7 = vsel %vm1799_vm2, %v1798_v43, %v9349_v41 }
 0x292   : > { %5215 = vmatprep.mubr.msk.f32.mxu1 %vm2042_vm10, %v7400_v38  ;;  %v1864_v57 = vsel %vm1832_vm4, %v1831_v7, %v9350_v3 }
 0x293   : > { %v1602_v36 = vpop.permute.xlu1 %1601  ;;  %v1604_v23 = vpop.permute.xlu0 %1603  ;;  %v1897_v27 = vsel %vm1865_vm5, %v1864_v57, %v9351_v40 }
 0x294   : > { %v1994_v33 = vsel %vm1964_vm8, %v1961_v21, %v1602_v36  ;;  %v1995_v62 = vsel %vm1964_vm8, %v1962_v39, %v1604_v23  ;;  %v1930_v36 = vsel %vm1898_vm6, %v1897_v27, %v9352_v45 }
 0x295   : > { %v1963_v10 = vsel %vm1931_vm7, %v1930_v36, %v9353_v48 }
 0x297   : > { %v1730_v32 = vpop.permute.xlu1 %1729  ;;  %v1732_v61 = vpop.permute.xlu0 %1731 }
 0x298   : > { %v2027_v1 = vsel %vm1997_vm9, %v1994_v33, %v1730_v32  ;;  %v2028_v37 = vsel %vm1997_vm9, %v1995_v62, %v1732_v61 }
 0x299   : > { %5216 = vmatmul.mubr.msk.f32.gmra.mrb[12].mxu1 %vm2042_vm10, %v2027_v1 }
 0x29a   : > { %5218 = vmatprep.mubr.msk.f32.mxu1 %vm2042_vm10, %v2028_v37 }
 0x29b   : > { %v1606_v18 = vpop.permute.xlu1 %1605 }
 0x29c   : > { %v1996_v26 = vsel %vm1964_vm8, %v1963_v10, %v1606_v18 }
 0x29f   : > { %v1734_v50 = vpop.permute.xlu1 %1733 }
 0x2a0   : > { %v2029_v14 = vsel %vm1997_vm9, %v1996_v26, %v1734_v50 }
 0x2a1   : > { %5219 = vmatmul.mubr.msk.f32.gmra.mrb[14].mxu1 %vm2042_vm10, %v2029_v14 }
 0x2a2   : > { %5231 = vmatprep.mubr.msk.f32.mxu1 %vm2042_vm10, %v6845_v8  ;;  %v7509_v8 = vld [vmem:[%s8958_s2] ss:$0 sm:$0xff] }
 0x2a5   : > { %5232 = vmatmul.mubr.msk.f32.vlgmr.msra.gmra.mrb[16].mxu1 %vm2042_vm10, %v6884_v35 }
 0x2a6   : > { %5234 = vmatprep.mubr.msk.f32.mxu1 %vm2042_vm10, %v6891_v9  ;;  %v7514_v9 = vld [vmem:[%s8959_s3] ss:$0 sm:$0xff] }
 0x2a9   : > { %5235 = vmatmul.mubr.msk.f32.gmra.mrb[18].mxu1 %vm2042_vm10, %v6908_v55 }
 0x2aa   : > { %5237 = vmatprep.mubr.msk.f32.mxu1 %vm2042_vm10, %v6918_v54 }
 0x2ad   : > { %5238 = vmatmul.mubr.msk.f32.gmra.mrb[20].mxu1 %vm2042_vm10, %v6944_v59 }
 0x2ae   : > { %5240 = vmatprep.mubr.msk.f32.mxu1 %vm2042_vm10, %v6954_v31 }
 0x2b1   : > { %5241 = vmatmul.mubr.msk.f32.gmra.mrb[22].mxu1 %vm2042_vm10, %v6980_v53 }
 0x2b2   : > { %5243 = vmatprep.mubr.msk.f32.mxu1 %vm2042_vm10, %v6990_v16 }
 0x2b5   : > { %5244 = vmatmul.mubr.msk.f32.gmra.mrb[24].mxu1 %vm2042_vm10, %v7016_v51 }
 0x2b6   : > { %5246 = vmatprep.mubr.msk.f32.mxu1 %vm2042_vm10, %v7026_v42 }
 0x2b9   : > { %5247 = vmatmul.mubr.msk.f32.gmra.mrb[26].mxu1 %vm2042_vm10, %v7052_v46 }
 0x2ba   : > { %5249 = vmatprep.mubr.msk.f32.mxu1 %vm2042_vm10, %v7062_v47 }
 0x2bd   : > { %5250 = vmatmul.mubr.msk.f32.gmra.mrb[28].mxu1 %vm2042_vm10, %v7088_v44 }
 0x2be   : > { %5252 = vmatprep.mubr.msk.f32.mxu1 %vm2042_vm10, %v7098_v0 }
 0x2c1   : > { %5253 = vmatmul.mubr.msk.f32.gmra.mrb[30].mxu1 %vm2042_vm10, %v7124_v2 }
 0x2c2   : > { %5255 = vmatprep.mubr.msk.f32.mxu1 %vm2042_vm10, %v7134_v49 }
 0x2c5   : > { %5256 = vmatmul.mubr.msk.f32.gmra.mrb[32].mxu1 %vm2042_vm10, %v7166_v17 }
 0x2c6   : > { %5258 = vmatprep.mubr.msk.f32.mxu1 %vm2042_vm10, %v7176_v25 }
 0x2c9   : > { %5259 = vmatmul.mubr.msk.f32.gmra.mrb[34].mxu1 %vm2042_vm10, %v7207_v19 }
 0x2ca   : > { %5261 = vmatprep.mubr.msk.f32.mxu1 %vm2042_vm10, %v7217_v13 }
 0x2cd   : > { %5262 = vmatmul.mubr.msk.f32.gmra.mrb[36].mxu1 %vm2042_vm10, %v7244_v24 }
 0x2ce   : > { %5264 = vmatprep.mubr.msk.f32.mxu1 %vm2042_vm10, %v7254_v15 }
 0x2d1   : > { %5265 = vmatmul.mubr.msk.f32.gmra.mrb[38].mxu1 %vm2042_vm10, %v7280_v20 }
 0x2d2   : > { %5267 = vmatprep.mubr.msk.f32.mxu1 %vm2042_vm10, %v7290_v56 }
 0x2d5   : > { %5268 = vmatmul.mubr.msk.f32.gmra.mrb[40].mxu1 %vm2042_vm10, %v7352_v52 }
 0x2d6   : > { %5270 = vmatprep.mubr.msk.f32.mxu1 %vm2042_vm10, %v7362_v12 }
 0x2d9   : > { %5271 = vmatmul.mubr.msk.f32.gmra.mrb[42].mxu1 %vm2042_vm10, %v7390_v22 }
 0x2da   : > { %5273 = vmatprep.mubr.msk.f32.mxu1 %vm2042_vm10, %v7400_v38 }
 0x2dd   : > { %5274 = vmatmul.mubr.msk.f32.gmra.mrb[44].mxu1 %vm2042_vm10, %v2027_v1 }
 0x2de   : > { %5276 = vmatprep.mubr.msk.f32.mxu1 %vm2042_vm10, %v2028_v37 }
 0x2e1   : > { %5277 = vmatmul.mubr.msk.f32.gmra.mrb[46].mxu1 %vm2042_vm10, %v2029_v14 }
 0x300   : > { %v5175_v35 = vpop.f32.mrb[0].mxu0 }
 0x301   : > { %v2215_v55 = vadd.f32 %v5175_v35, %v7509_v8  ;;  %v2209_v54 = vpop.f32.mrb[1].mxu0 }
 0x302   : > { %v2210_v59 = vadd.f32 %v7509_v8, %v2209_v54 }
 0x303   : > { %vm2369_vm12 = vcmp.gt.f32.partialorder %v2215_v55, 0.0  ;;  %v2408_v31 = vmul.f32 %v7514_v9, %v2215_v55 }
 0x304   : > { %vm2368_vm13 = vcmp.gt.f32.partialorder %v2210_v59, 0.0  ;;  %v2407_v53 = vmul.f32 %v7514_v9, %v2210_v59  ;;  %v5178_v16 = vpop.f32.mrb[2].mxu0 }
 0x305   : > { %v2440_v51 = vsel %vm2369_vm12, %v2215_v55, %v2408_v31  ;;  %v2225_v42 = vadd.f32 %v5178_v16, %v7509_v8  ;;  %v2219_v46 = vpop.f32.mrb[3].mxu0 }
 0x306   : > { %2768 = vst.msk [vmem:[#allocation3 + $0x21] sm:$0xff] %vm1799_vm2, %v2440_v51  ;;  %v2439_v47 = vsel %vm2368_vm13, %v2210_v59, %v2407_v53  ;;  %v2220_v44 = vadd.f32 %v7509_v8, %v2219_v46 }
 0x307   : > { %2767 = vst.msk [vmem:[#allocation3 + $0x19] sm:$0xff] %vm1799_vm2, %v2439_v47  ;;  %vm2371_vm14 = vcmp.gt.f32.partialorder %v2225_v42, 0.0  ;;  %v2410_v0 = vmul.f32 %v7514_v9, %v2225_v42 }
 0x308   : > { %vm2370_vm15 = vcmp.gt.f32.partialorder %v2220_v44, 0.0  ;;  %v2409_v2 = vmul.f32 %v7514_v9, %v2220_v44 }
 0x309   : > { %v2442_v49 = vsel %vm2371_vm14, %v2225_v42, %v2410_v0 }
 0x30a   : > { %2770 = vst.msk [vmem:[#allocation3 + $0x39] sm:$0xff] %vm1799_vm2, %v2442_v49  ;;  %v2441_v17 = vsel %vm2370_vm15, %v2220_v44, %v2409_v2 }
 0x30b   : > { %2769 = vst.msk [vmem:[#allocation3 + $0x31] sm:$0xff] %vm1799_vm2, %v2441_v17 }
 0x30c   : > { %v5181_v25 = vpop.f32.mrb[4].mxu0 }
 0x30d   : > { %v2235_v19 = vadd.f32 %v5181_v25, %v7509_v8  ;;  %v2229_v13 = vpop.f32.mrb[5].mxu0  ;;  %v7529_v24 = vld [vmem:[#allocation3 + $0x21] sm:$0xff] }
 0x30e   : > { %v2230_v15 = vadd.f32 %v7509_v8, %v2229_v13  ;;  %3126 = vrot.lane.b32.xlu1 %v7529_v24, %s5451_s17  ;;  %v7534_v20 = vld [vmem:[#allocation3 + $0x19] sm:$0xff] }
 0x30f   : > { %vm2373_vm0 = vcmp.gt.f32.partialorder %v2235_v19, 0.0  ;;  %v2412_v56 = vmul.f32 %v7514_v9, %v2235_v19  ;;  %3124 = vrot.lane.b32.xlu0 %v7534_v20, %s5451_s17 }
 0x310   : > { %vm2372_vm1 = vcmp.gt.f32.partialorder %v2230_v15, 0.0  ;;  %v2411_v52 = vmul.f32 %v7514_v9, %v2230_v15 }
 0x311   : > { %v2444_v12 = vsel %vm2373_vm0, %v2235_v19, %v2412_v56  ;;  %v7540_v22 = vld [vmem:[#allocation3 + $0x39] sm:$0xff] }
 0x312   : > { %2772 = vst.msk [vmem:[#allocation3 + $0x51] sm:$0xff] %vm1799_vm2, %v2444_v12  ;;  %v2443_v38 = vsel %vm2372_vm1, %v2230_v15, %v2411_v52  ;;  %3130 = vrot.lane.b32.xlu1 %v7540_v22, %s5451_s17  ;;  %v7545_v60 = vld [vmem:[#allocation3 + $0x31] sm:$0xff] }
 0x313   : > { %2771 = vst.msk [vmem:[#allocation3 + $0x49] sm:$0xff] %vm1799_vm2, %v2443_v38  ;;  %3128 = vrot.lane.b32.xlu0 %v7545_v60, %s5451_s17 }
 0x314   : > { %v5184_v4 = vpop.f32.mrb[6].mxu0 }
 0x315   : > { %v2245_v5 = vadd.f32 %v5184_v4, %v7509_v8  ;;  %v2239_v23 = vpop.f32.mrb[7].mxu0 }
 0x316   : > { %v2240_v30 = vadd.f32 %v7509_v8, %v2239_v23 }
 0x317   : > { %vm2375_vm3 = vcmp.gt.f32.partialorder %v2245_v5, 0.0  ;;  %v2414_v63 = vmul.f32 %v7514_v9, %v2245_v5 }
 0x318   : > { %vm2374_vm4 = vcmp.gt.f32.partialorder %v2240_v30, 0.0  ;;  %v2413_v11 = vmul.f32 %v7514_v9, %v2240_v30 }
 0x319   : > { %v2446_v21 = vsel %vm2375_vm3, %v2245_v5, %v2414_v63  ;;  %v2838_v29 = vld [vmem:[#allocation3 + $0x51] sm:$0xff] }
 0x31a   : > { %2774 = vst.msk [vmem:[#allocation3 + $0x69] sm:$0xff] %vm1799_vm2, %v2446_v21  ;;  %v2445_v34 = vsel %vm2374_vm4, %v2240_v30, %v2413_v11  ;;  %3134 = vrot.lane.b32.xlu1 %v2838_v29, %s5451_s17  ;;  %v2837_v33 = vld [vmem:[#allocation3 + $0x49] sm:$0xff] }
 0x31b   : > { %2773 = vst.msk [vmem:[#allocation3 + $0x61] sm:$0xff] %vm1799_vm2, %v2445_v34  ;;  %3132 = vrot.lane.b32.xlu0 %v2837_v33, %s5451_s17 }
 0x31c   : > { %v5187_v32 = vpop.f32.mrb[8].mxu0 }
 0x31d   : > { %v2255_v6 = vadd.f32 %v5187_v32, %v7509_v8  ;;  %v2249_v39 = vpop.f32.mrb[9].mxu0 }
 0x31e   : > { %v2250_v1 = vadd.f32 %v7509_v8, %v2249_v39 }
 0x31f   : > { %vm2377_vm6 = vcmp.gt.f32.partialorder %v2255_v6, 0.0  ;;  %v2416_v28 = vmul.f32 %v7514_v9, %v2255_v6 }
 0x320   : > { %vm2376_vm8 = vcmp.gt.f32.partialorder %v2250_v1, 0.0  ;;  %v2415_v58 = vmul.f32 %v7514_v9, %v2250_v1 }
 0x321   : > { %v2448_v43 = vsel %vm2377_vm6, %v2255_v6, %v2416_v28  ;;  %v2840_v62 = vld [vmem:[#allocation3 + $0x69] sm:$0xff] }
 0x322   : > { %2776 = vst.msk [vmem:[#allocation3 + $0x81] sm:$0xff] %vm1799_vm2, %v2448_v43  ;;  %v2447_v61 = vsel %vm2376_vm8, %v2250_v1, %v2415_v58  ;;  %3138 = vrot.lane.b32.xlu1 %v2840_v62, %s5451_s17  ;;  %v2839_v41 = vld [vmem:[#allocation3 + $0x61] sm:$0xff] }
 0x323   : > { %2775 = vst.msk [vmem:[#allocation3 + $0x79] sm:$0xff] %vm1799_vm2, %v2447_v61  ;;  %3136 = vrot.lane.b32.xlu0 %v2839_v41, %s5451_s17 }
 0x324   : > { %v5190_v7 = vpop.f32.mrb[10].mxu0 }
 0x325   : > { %v2265_v37 = vadd.f32 %v5190_v7, %v7509_v8  ;;  %v2259_v3 = vpop.f32.mrb[11].mxu0 }
 0x326   : > { %v2260_v57 = vadd.f32 %v7509_v8, %v2259_v3 }
 0x327   : > { %vm2379_vm10 = vcmp.gt.f32.partialorder %v2265_v37, 0.0  ;;  %v2418_v18 = vmul.f32 %v7514_v9, %v2265_v37 }
 0x328   : > { %vm2378_vm11 = vcmp.gt.f32.partialorder %v2260_v57, 0.0  ;;  %v2417_v40 = vmul.f32 %v7514_v9, %v2260_v57 }
 0x329   : > { %v2450_v27 = vsel %vm2379_vm10, %v2265_v37, %v2418_v18  ;;  %v2842_v45 = vld [vmem:[#allocation3 + $0x81] sm:$0xff] }
 0x32a   : > { %2778 = vst.msk [vmem:[#allocation3 + $0x99] sm:$0xff] %vm1799_vm2, %v2450_v27  ;;  %v2449_v36 = vsel %vm2378_vm11, %v2260_v57, %v2417_v40  ;;  %3142 = vrot.lane.b32.xlu1 %v2842_v45, %s5451_s17  ;;  %v2841_v48 = vld [vmem:[#allocation3 + $0x79] sm:$0xff] }
 0x32b   : > { %2777 = vst.msk [vmem:[#allocation3 + $0x91] sm:$0xff] %vm1799_vm2, %v2449_v36  ;;  %3140 = vrot.lane.b32.xlu0 %v2841_v48, %s5451_s17 }
 0x32c   : > { %v5193_v10 = vpop.f32.mrb[12].mxu0 }
 0x32d   : > { %v2275_v26 = vadd.f32 %v5193_v10, %v7509_v8  ;;  %v2269_v50 = vpop.f32.mrb[13].mxu0 }
 0x32e   : > { %v2270_v14 = vadd.f32 %v7509_v8, %v2269_v50 }
 0x32f   : > { %vm2381_vm12 = vcmp.gt.f32.partialorder %v2275_v26, 0.0  ;;  %v2420_v35 = vmul.f32 %v7514_v9, %v2275_v26 }
 0x330   : > { %vm2380_vm13 = vcmp.gt.f32.partialorder %v2270_v14, 0.0  ;;  %v2419_v55 = vmul.f32 %v7514_v9, %v2270_v14 }
 0x331   : > { %v2452_v54 = vsel %vm2381_vm12, %v2275_v26, %v2420_v35  ;;  %v2844_v59 = vld [vmem:[#allocation3 + $0x99] sm:$0xff] }
 0x332   : > { %2780 = vst.msk [vmem:[#allocation3 + $0xb1] sm:$0xff] %vm1799_vm2, %v2452_v54  ;;  %v2451_v31 = vsel %vm2380_vm13, %v2270_v14, %v2419_v55  ;;  %3146 = vrot.lane.b32.xlu1 %v2844_v59, %s5451_s17  ;;  %v2843_v53 = vld [vmem:[#allocation3 + $0x91] sm:$0xff] }
 0x333   : > { %2779 = vst.msk [vmem:[#allocation3 + $0xa9] sm:$0xff] %vm1799_vm2, %v2451_v31  ;;  %3144 = vrot.lane.b32.xlu0 %v2843_v53, %s5451_s17 }
 0x334   : > { %v5196_v16 = vpop.f32.mrb[14].mxu0 }
 0x335   : > { %v2285_v51 = vadd.f32 %v5196_v16, %v7509_v8  ;;  %v2279_v42 = vpop.f32.mrb[15].mxu0 }
 0x336   : > { %v2280_v46 = vadd.f32 %v7509_v8, %v2279_v42 }
 0x337   : > { %vm2383_vm14 = vcmp.gt.f32.partialorder %v2285_v51, 0.0  ;;  %v2422_v47 = vmul.f32 %v7514_v9, %v2285_v51 }
 0x338   : > { %vm2382_vm15 = vcmp.gt.f32.partialorder %v2280_v46, 0.0  ;;  %v2421_v44 = vmul.f32 %v7514_v9, %v2280_v46 }
 0x339   : > { %v2454_v0 = vsel %vm2383_vm14, %v2285_v51, %v2422_v47  ;;  %v2846_v2 = vld [vmem:[#allocation3 + $0xb1] sm:$0xff] }
 0x33a   : > { %2782 = vst.msk [vmem:[#allocation3 + $0xc9] sm:$0xff] %vm1799_vm2, %v2454_v0  ;;  %v2453_v49 = vsel %vm2382_vm15, %v2280_v46, %v2421_v44  ;;  %3150 = vrot.lane.b32.xlu1 %v2846_v2, %s5451_s17  ;;  %v2845_v17 = vld [vmem:[#allocation3 + $0xa9] sm:$0xff] }
 0x33b   : > { %2781 = vst.msk [vmem:[#allocation3 + $0xc1] sm:$0xff] %vm1799_vm2, %v2453_v49  ;;  %3148 = vrot.lane.b32.xlu0 %v2845_v17, %s5451_s17 }
 0x33c   : > { %v5199_v25 = vpop.f32.mrb[0].mxu1 }
 0x33d   : > { %v2295_v19 = vadd.f32 %v5199_v25, %v7509_v8  ;;  %v2289_v13 = vpop.f32.mrb[1].mxu1 }
 0x33e   : > { %v2290_v15 = vadd.f32 %v7509_v8, %v2289_v13 }
 0x33f   : > { %vm2385_vm0 = vcmp.gt.f32.partialorder %v2295_v19, 0.0  ;;  %v2424_v56 = vmul.f32 %v7514_v9, %v2295_v19 }
 0x340   : > { %vm2384_vm1 = vcmp.gt.f32.partialorder %v2290_v15, 0.0  ;;  %v2423_v52 = vmul.f32 %v7514_v9, %v2290_v15 }
 0x341   : > { %v2456_v12 = vsel %vm2385_vm0, %v2295_v19, %v2424_v56  ;;  %v2848_v38 = vld [vmem:[#allocation3 + $0xc9] sm:$0xff] }
 0x342   : > { %2784 = vst.msk [vmem:[#allocation3 + $0xe1] sm:$0xff] %vm1799_vm2, %v2456_v12  ;;  %v2455_v4 = vsel %vm2384_vm1, %v2290_v15, %v2423_v52  ;;  %3154 = vrot.lane.b32.xlu1 %v2848_v38, %s5451_s17  ;;  %v2847_v5 = vld [vmem:[#allocation3 + $0xc1] sm:$0xff] }
 0x343   : > { %2783 = vst.msk [vmem:[#allocation3 + $0xd9] sm:$0xff] %vm1799_vm2, %v2455_v4  ;;  %3152 = vrot.lane.b32.xlu0 %v2847_v5, %s5451_s17 }
 0x344   : > { %v5202_v23 = vpop.f32.mrb[2].mxu1 }
 0x345   : > { %v2305_v30 = vadd.f32 %v5202_v23, %v7509_v8  ;;  %v2299_v63 = vpop.f32.mrb[3].mxu1 }
 0x346   : > { %v2300_v11 = vadd.f32 %v7509_v8, %v2299_v63 }
 0x347   : > { %vm2387_vm3 = vcmp.gt.f32.partialorder %v2305_v30, 0.0  ;;  %v2426_v21 = vmul.f32 %v7514_v9, %v2305_v30 }
 0x348   : > { %vm2386_vm4 = vcmp.gt.f32.partialorder %v2300_v11, 0.0  ;;  %v2425_v29 = vmul.f32 %v7514_v9, %v2300_v11 }
 0x349   : > { %v2458_v34 = vsel %vm2387_vm3, %v2305_v30, %v2426_v21  ;;  %v2850_v33 = vld [vmem:[#allocation3 + $0xe1] sm:$0xff] }
 0x34a   : > { %2786 = vst.msk [vmem:[#allocation3 + $0xf9] sm:$0xff] %vm1799_vm2, %v2458_v34  ;;  %v2457_v32 = vsel %vm2386_vm4, %v2300_v11, %v2425_v29  ;;  %3158 = vrot.lane.b32.xlu1 %v2850_v33, %s5451_s17  ;;  %v2849_v6 = vld [vmem:[#allocation3 + $0xd9] sm:$0xff] }
 0x34b   : > { %2785 = vst.msk [vmem:[#allocation3 + $0xf1] sm:$0xff] %vm1799_vm2, %v2457_v32  ;;  %3156 = vrot.lane.b32.xlu0 %v2849_v6, %s5451_s17 }
 0x34c   : > { %v5205_v39 = vpop.f32.mrb[4].mxu1 }
 0x34d   : > { %v2315_v1 = vadd.f32 %v5205_v39, %v7509_v8  ;;  %v2309_v28 = vpop.f32.mrb[5].mxu1 }
 0x34e   : > { %v2310_v58 = vadd.f32 %v7509_v8, %v2309_v28 }
 0x34f   : > { %vm2389_vm6 = vcmp.gt.f32.partialorder %v2315_v1, 0.0  ;;  %v2428_v43 = vmul.f32 %v7514_v9, %v2315_v1 }
 0x350   : > { %vm2388_vm8 = vcmp.gt.f32.partialorder %v2310_v58, 0.0  ;;  %v2427_v62 = vmul.f32 %v7514_v9, %v2310_v58 }
 0x351   : > { %v2460_v61 = vsel %vm2389_vm6, %v2315_v1, %v2428_v43  ;;  %v2852_v41 = vld [vmem:[#allocation3 + $0xf9] sm:$0xff]  ;;  %vm4240_vm6 = vcmask 326656  }
 0x352   : > { %2788 = vst.msk [vmem:[#allocation3 + $0x111] sm:$0xff] %vm1799_vm2, %v2460_v61  ;;  %v2459_v7 = vsel %vm2388_vm8, %v2310_v58, %v2427_v62  ;;  %3162 = vrot.lane.b32.xlu1 %v2852_v41, %s5451_s17  ;;  %v2851_v37 = vld [vmem:[#allocation3 + $0xf1] sm:$0xff]  ;;  %vm4273_vm8 = vcmask 392192  }
 0x353   : > { %2787 = vst.msk [vmem:[#allocation3 + $0x109] sm:$0xff] %vm1799_vm2, %v2459_v7  ;;  %3160 = vrot.lane.b32.xlu0 %v2851_v37, %s5451_s17  ;;  %v7668_v7 = vld [vmem:[#allocation3 + $0x22] sm:$0xff]  ;;  %v7672_v37 = vld [vmem:[#allocation3 + $0x1a] sm:$0xff] }
 0x354   : > { %v5208_v3 = vpop.f32.mrb[6].mxu1 }
 0x355   : > { %v2325_v57 = vadd.f32 %v5208_v3, %v7509_v8  ;;  %v2319_v18 = vpop.f32.mrb[7].mxu1 }
 0x356   : > { %v2320_v40 = vadd.f32 %v7509_v8, %v2319_v18  ;;  %v7680_v18 = vld [vmem:[#allocation3 + $0x3a] sm:$0xff] }
 0x357   : > { %vm2391_vm10 = vcmp.gt.f32.partialorder %v2325_v57, 0.0  ;;  %v2430_v27 = vmul.f32 %v7514_v9, %v2325_v57 }
 0x358   : > { %vm2390_vm11 = vcmp.gt.f32.partialorder %v2320_v40, 0.0  ;;  %v2429_v45 = vmul.f32 %v7514_v9, %v2320_v40 }
 0x359   : > { %v2462_v36 = vsel %vm2391_vm10, %v2325_v57, %v2430_v27  ;;  %v2854_v48 = vld [vmem:[#allocation3 + $0x111] sm:$0xff]  ;;  %v7691_v27 = vld [vmem:[%s8964_s8] ss:$0 sm:$0xff]  ;;  %vm4306_vm10 = vcmask 457728  }
 0x35a   : > { %2790 = vst.msk [vmem:[#allocation3 + $0x129] sm:$0xff] %vm1799_vm2, %v2462_v36  ;;  %v2461_v10 = vsel %vm2390_vm11, %v2320_v40, %v2429_v45  ;;  %3166 = vrot.lane.b32.xlu1 %v2854_v48, %s5451_s17  ;;  %v2853_v26 = vld [vmem:[#allocation3 + $0x109] sm:$0xff]  ;;  %v7684_v40 = vld [vmem:[#allocation3 + $0x32] sm:$0xff]  ;;  %vm4339_vm11 = vcmask 523264  }
 0x35b   : > { %2789 = vst.msk [vmem:[#allocation3 + $0x121] sm:$0xff] %vm1799_vm2, %v2461_v10  ;;  %3164 = vrot.lane.b32.xlu0 %v2853_v26, %s5451_s17  ;;  %v7696_v10 = vld [vmem:[#allocation3 + $0x52] sm:$0xff] }
 0x35c   : > { %v5211_v50 = vpop.f32.mrb[8].mxu1 }
 0x35d   : > { %v2335_v14 = vadd.f32 %v5211_v50, %v7509_v8  ;;  %v2329_v35 = vpop.f32.mrb[9].mxu1  ;;  %v7703_v50 = vld [vmem:[#allocation3 + $0x4a] sm:$0xff] }
 0x35e   : > { %v2330_v55 = vadd.f32 %v7509_v8, %v2329_v35 }
 0x35f   : > { %vm2393_vm12 = vcmp.gt.f32.partialorder %v2335_v14, 0.0  ;;  %v2432_v54 = vmul.f32 %v7514_v9, %v2335_v14 }
 0x360   : > { %vm2392_vm13 = vcmp.gt.f32.partialorder %v2330_v55, 0.0  ;;  %v2431_v59 = vmul.f32 %v7514_v9, %v2330_v55 }
 0x361   : > { %v2464_v31 = vsel %vm2393_vm12, %v2335_v14, %v2432_v54  ;;  %v2856_v53 = vld [vmem:[#allocation3 + $0x129] sm:$0xff]  ;;  %vm4388_vm12 = vcmask 588800  }
 0x362   : > { %2792 = vst.msk [vmem:[#allocation3 + $0x141] sm:$0xff] %vm1799_vm2, %v2464_v31  ;;  %v2463_v16 = vsel %vm2392_vm13, %v2330_v55, %v2431_v59  ;;  %3170 = vrot.lane.b32.xlu1 %v2856_v53, %s5451_s17  ;;  %v2855_v51 = vld [vmem:[#allocation3 + $0x121] sm:$0xff]  ;;  %v7710_v54 = vld [vmem:[#allocation3 + $0x6a] sm:$0xff] }
 0x363   : > { %2791 = vst.msk [vmem:[#allocation3 + $0x139] sm:$0xff] %vm1799_vm2, %v2463_v16  ;;  %3168 = vrot.lane.b32.xlu0 %v2855_v51, %s5451_s17  ;;  %v7717_v31 = vld [vmem:[#allocation3 + $0x62] sm:$0xff] }
 0x364   : > { %v5214_v42 = vpop.f32.mrb[10].mxu1 }
 0x365   : > { %v2345_v46 = vadd.f32 %v5214_v42, %v7509_v8  ;;  %v2339_v47 = vpop.f32.mrb[11].mxu1  ;;  %v7724_v42 = vld [vmem:[#allocation3 + $0x82] sm:$0xff] }
 0x366   : > { %v2340_v44 = vadd.f32 %v7509_v8, %v2339_v47  ;;  %v7731_v47 = vld [vmem:[#allocation3 + $0x7a] sm:$0xff] }
 0x367   : > { %vm2395_vm14 = vcmp.gt.f32.partialorder %v2345_v46, 0.0  ;;  %v2434_v0 = vmul.f32 %v7514_v9, %v2345_v46 }
 0x368   : > { %vm2394_vm15 = vcmp.gt.f32.partialorder %v2340_v44, 0.0  ;;  %v2433_v2 = vmul.f32 %v7514_v9, %v2340_v44 }
 0x369   : > { %v2466_v49 = vsel %vm2395_vm14, %v2345_v46, %v2434_v0  ;;  %v2858_v17 = vld [vmem:[#allocation3 + $0x141] sm:$0xff] }
 0x36a   : > { %2794 = vst.msk [vmem:[#allocation3 + $0x159] sm:$0xff] %vm1799_vm2, %v2466_v49  ;;  %v2465_v25 = vsel %vm2394_vm15, %v2340_v44, %v2433_v2  ;;  %3174 = vrot.lane.b32.xlu1 %v2858_v17, %s5451_s17  ;;  %v2857_v19 = vld [vmem:[#allocation3 + $0x139] sm:$0xff] }
 0x36b   : > { %2793 = vst.msk [vmem:[#allocation3 + $0x151] sm:$0xff] %vm1799_vm2, %v2465_v25  ;;  %3172 = vrot.lane.b32.xlu0 %v2857_v19, %s5451_s17  ;;  %v7738_v49 = vld [vmem:[#allocation3 + $0x9a] sm:$0xff]  ;;  %v7745_v25 = vld [vmem:[#allocation3 + $0x92] sm:$0xff] }
 0x36c   : > { %v5217_v13 = vpop.f32.mrb[12].mxu1 }
 0x36d   : > { %v2355_v15 = vadd.f32 %v5217_v13, %v7509_v8  ;;  %v2349_v56 = vpop.f32.mrb[13].mxu1 }
 0x36e   : > { %v2350_v52 = vadd.f32 %v7509_v8, %v2349_v56  ;;  %v7752_v56 = vld [vmem:[#allocation3 + $0xb2] sm:$0xff] }
 0x36f   : > { %vm2397_vm0 = vcmp.gt.f32.partialorder %v2355_v15, 0.0  ;;  %v2436_v12 = vmul.f32 %v7514_v9, %v2355_v15 }
 0x370   : > { %vm2396_vm1 = vcmp.gt.f32.partialorder %v2350_v52, 0.0  ;;  %v2435_v38 = vmul.f32 %v7514_v9, %v2350_v52 }
 0x371   : > { %v2468_v4 = vsel %vm2397_vm0, %v2355_v15, %v2436_v12  ;;  %v2860_v5 = vld [vmem:[#allocation3 + $0x159] sm:$0xff]  ;;  %v7759_v12 = vld [vmem:[#allocation3 + $0xaa] sm:$0xff] }
 0x372   : > { %2796 = vst.msk [vmem:[#allocation3 + $0x171] sm:$0xff] %vm1799_vm2, %v2468_v4  ;;  %v2467_v23 = vsel %vm2396_vm1, %v2350_v52, %v2435_v38  ;;  %3178 = vrot.lane.b32.xlu1 %v2860_v5, %s5451_s17  ;;  %v2859_v30 = vld [vmem:[#allocation3 + $0x151] sm:$0xff] }
 0x373   : > { %2795 = vst.msk [vmem:[#allocation3 + $0x169] sm:$0xff] %vm1799_vm2, %v2467_v23  ;;  %3176 = vrot.lane.b32.xlu0 %v2859_v30, %s5451_s17  ;;  %v7766_v23 = vld [vmem:[#allocation3 + $0xca] sm:$0xff] }
 0x374   : > { %v5220_v63 = vpop.f32.mrb[14].mxu1 }
 0x375   : > { %v2365_v11 = vadd.f32 %v5220_v63, %v7509_v8  ;;  %v2359_v21 = vpop.f32.mrb[15].mxu1  ;;  %v7773_v63 = vld [vmem:[#allocation3 + $0xc2] sm:$0xff] }
 0x376   : > { %v2360_v29 = vadd.f32 %v7509_v8, %v2359_v21  ;;  %v2864_v8 = vld [vmem:[#allocation3 + $0xa] sm:$0xff] }
 0x377   : > { %vm2399_vm3 = vcmp.gt.f32.partialorder %v2365_v11, 0.0  ;;  %v2438_v34 = vmul.f32 %v7514_v9, %v2365_v11 }
 0x378   : > { %vm2398_vm4 = vcmp.gt.f32.partialorder %v2360_v29, 0.0  ;;  %v2437_v33 = vmul.f32 %v7514_v9, %v2360_v29  ;;  %v7650_v32 = vpop.f32.mrb[16].mxu1  ;;  %v2863_v9 = vld [vmem:[#allocation3 + $0x2] sm:$0xff] }
 0x379   : > { %9354 = vst [vmem:[#allocation62_spill] sm:$0xff] %v7650_v32  ;;  %v2470_v6 = vsel %vm2399_vm3, %v2365_v11, %v2438_v34  ;;  %v7652_v39 = vpop.f32.mrb[17].mxu1  ;;  %v2862_v1 = vld [vmem:[#allocation3 + $0x171] sm:$0xff]  ;;  %v7780_v34 = vld [vmem:[#allocation3 + $0xe2] sm:$0xff] }
 0x37a   : > { %9355 = vst [vmem:[#allocation5_spill] sm:$0xff] %v7652_v39  ;;  %2798 = vst.msk [vmem:[#allocation3 + $0x189] sm:$0xff] %vm1799_vm2, %v2470_v6  ;;  %v2469_v28 = vsel %vm2398_vm4, %v2360_v29, %v2437_v33  ;;  %3182 = vrot.lane.b32.xlu1 %v2862_v1, %s5451_s17  ;;  %v2861_v58 = vld [vmem:[#allocation3 + $0x169] sm:$0xff]  ;;  %v7787_v6 = vld [vmem:[#allocation3 + $0xda] sm:$0xff] }
 0x37b   : > { %2797 = vst.msk [vmem:[#allocation3 + $0x181] sm:$0xff] %vm1799_vm2, %v2469_v28  ;;  %3180 = vrot.lane.b32.xlu0 %v2861_v58, %s5451_s17  ;;  %v7947_v32 = vld [vmem:[#allocation3 + $0xd8] sm:$0xff] }
 0x37c   : > { %v7658_v43 = vpop.f32.mrb[18].mxu1 }
 0x37d   : > { %9356 = vst [vmem:[#allocation7_spill] sm:$0xff] %v7658_v43  ;;  %v7660_v62 = vpop.f32.mrb[19].mxu1  ;;  %v7943_v43 = vld [vmem:[#allocation3 + $0xe0] sm:$0xff] }
 0x37e   : > { %9357 = vst [vmem:[#allocation67_spill] sm:$0xff] %v7660_v62  ;;  %3250 = vrot.lane.b32.xlu1 %v2864_v8, %s5453_s19  ;;  %v2884_v8 = vld [vmem:[#allocation3 + $0xfa] sm:$0xff] }
 0x37f   : > { %3248 = vrot.lane.b32.xlu0 %v2863_v9, %s5453_s19 }
 0x380   : > { %v7664_v61 = vpop.f32.mrb[20].mxu1 }
 0x381   : > { %9358 = vst [vmem:[#allocation66_spill] sm:$0xff] %v7664_v61  ;;  %v7666_v41 = vpop.f32.mrb[21].mxu1  ;;  %v7935_v61 = vld [vmem:[#allocation3 + $0xc0] sm:$0xff] }
 0x382   : > { %9359 = vst [vmem:[#allocation11_spill] sm:$0xff] %v7666_v41  ;;  %3254 = vrot.lane.b32.xlu1 %v7668_v7, %s5453_s19 }
 0x383   : > { %3252 = vrot.lane.b32.xlu0 %v7672_v37, %s5453_s19 }
 0x384   : > { %v7676_v3 = vpop.f32.mrb[22].mxu1 }
 0x385   : > { %9360 = vst [vmem:[#allocation70_spill] sm:$0xff] %v7676_v3  ;;  %v7678_v57 = vpop.f32.mrb[23].mxu1  ;;  %v7931_v3 = vld [vmem:[#allocation3 + $0xc8] sm:$0xff] }
 0x386   : > { %9361 = vst [vmem:[#allocation9_spill] sm:$0xff] %v7678_v57  ;;  %3258 = vrot.lane.b32.xlu1 %v7680_v18, %s5453_s19 }
 0x387   : > { %3256 = vrot.lane.b32.xlu0 %v7684_v40, %s5453_s19 }
 0x388   : > { %v5245_v45 = vpop.f32.mrb[24].mxu1 }
 0x389   : > { %v7694_v36 = vadd.f32 %v5245_v45, %v7691_v27  ;;  %v2592_v48 = vpop.f32.mrb[25].mxu1  ;;  %v2883_v45 = vld [vmem:[#allocation3 + $0xf2] sm:$0xff] }
 0x38a   : > { %v7699_v26 = vadd.f32 %v7691_v27, %v2592_v48  ;;  %3262 = vrot.lane.b32.xlu1 %v7696_v10, %s5453_s19 }
 0x38b   : > { %9362 = vst [vmem:[#allocation69_spill] sm:$0xff] %v7694_v36  ;;  %3260 = vrot.lane.b32.xlu0 %v7703_v50, %s5453_s19  ;;  %v7923_v36 = vld [vmem:[#allocation3 + $0xa8] sm:$0xff] }
 0x38c   : > { %9363 = vst [vmem:[#allocation14_spill] sm:$0xff] %v7699_v26  ;;  %v5248_v14 = vpop.f32.mrb[26].mxu1  ;;  %9399 = vst [vmem:[#allocation19_spill] sm:$0xff] %v7923_v36 }
 0x38d   : > { %v7708_v35 = vadd.f32 %v5248_v14, %v7691_v27  ;;  %v2602_v55 = vpop.f32.mrb[27].mxu1 }
 0x38e   : > { %v7713_v59 = vadd.f32 %v7691_v27, %v2602_v55  ;;  %3266 = vrot.lane.b32.xlu1 %v7710_v54, %s5453_s19 }
 0x38f   : > { %9364 = vst [vmem:[#allocation72_spill] sm:$0xff] %v7708_v35  ;;  %3264 = vrot.lane.b32.xlu0 %v7717_v31, %s5453_s19  ;;  %v7919_v35 = vld [vmem:[#allocation3 + $0xb0] sm:$0xff] }
 0x390   : > { %9365 = vst [vmem:[#allocation12_spill] sm:$0xff] %v7713_v59  ;;  %v5251_v53 = vpop.f32.mrb[28].mxu1  ;;  %9397 = vst [vmem:[#allocation98_spill] sm:$0xff] %v7919_v35 }
 0x391   : > { %v7722_v16 = vadd.f32 %v5251_v53, %v7691_v27  ;;  %v2612_v51 = vpop.f32.mrb[29].mxu1  ;;  %v2886_v53 = vld [vmem:[#allocation3 + $0x112] sm:$0xff] }
 0x392   : > { %v7727_v46 = vadd.f32 %v7691_v27, %v2612_v51  ;;  %3270 = vrot.lane.b32.xlu1 %v7724_v42, %s5453_s19 }
 0x393   : > { %9366 = vst [vmem:[#allocation71_spill] sm:$0xff] %v7722_v16  ;;  %3268 = vrot.lane.b32.xlu0 %v7731_v47, %s5453_s19  ;;  %v7911_v16 = vld [vmem:[#allocation3 + $0x90] sm:$0xff] }
 0x394   : > { %9367 = vst [vmem:[#allocation17_spill] sm:$0xff] %v7727_v46  ;;  %v5254_v44 = vpop.f32.mrb[30].mxu1  ;;  %9395 = vst [vmem:[#allocation78_spill] sm:$0xff] %v7911_v16 }
 0x395   : > { %v7736_v0 = vadd.f32 %v5254_v44, %v7691_v27  ;;  %v2622_v2 = vpop.f32.mrb[31].mxu1  ;;  %v2885_v44 = vld [vmem:[#allocation3 + $0x10a] sm:$0xff] }
 0x396   : > { %v7741_v17 = vadd.f32 %v7691_v27, %v2622_v2  ;;  %3274 = vrot.lane.b32.xlu1 %v7738_v49, %s5453_s19  ;;  %v7807_v2 = vpop.permute.xlu1 %3122 }
 0x397   : > { %9368 = vst [vmem:[#allocation15_spill] sm:$0xff] %v7736_v0  ;;  %3272 = vrot.lane.b32.xlu0 %v7745_v25, %s5453_s19  ;;  %v7907_v0 = vld [vmem:[#allocation3 + $0x98] sm:$0xff] }
 0x398   : > { %9369 = vst [vmem:[#allocation73_spill] sm:$0xff] %v7741_v17  ;;  %v5257_v19 = vpop.f32.mrb[32].mxu1  ;;  %9393 = vst [vmem:[#allocation128_spill] sm:$0xff] %v7907_v0 }
 0x399   : > { %v7750_v13 = vadd.f32 %v5257_v19, %v7691_v27  ;;  %v2632_v15 = vpop.f32.mrb[33].mxu1 }
 0x39a   : > { %v7755_v52 = vadd.f32 %v7691_v27, %v2632_v15  ;;  %3278 = vrot.lane.b32.xlu1 %v7752_v56, %s5453_s19  ;;  %v7809_v15 = vpop.permute.xlu0 %3120 }
 0x39b   : > { %9370 = vst [vmem:[#allocation20_spill] sm:$0xff] %v7750_v13  ;;  %3276 = vrot.lane.b32.xlu0 %v7759_v12, %s5453_s19  ;;  %v7899_v13 = vld [vmem:[#allocation3 + $0x78] sm:$0xff] }
 0x39c   : > { %9371 = vst [vmem:[#allocation18_spill] sm:$0xff] %v7755_v52  ;;  %v5260_v38 = vpop.f32.mrb[34].mxu1 }
 0x39d   : > { %v7764_v4 = vadd.f32 %v5260_v38, %v7691_v27  ;;  %v2642_v5 = vpop.f32.mrb[35].mxu1 }
 0x39e   : > { %v7769_v30 = vadd.f32 %v7691_v27, %v2642_v5  ;;  %3282 = vrot.lane.b32.xlu1 %v7766_v23, %s5453_s19 }
 0x39f   : > { %9372 = vst [vmem:[#allocation24_spill] sm:$0xff] %v7764_v4  ;;  %3280 = vrot.lane.b32.xlu0 %v7773_v63, %s5453_s19  ;;  %v7895_v4 = vld [vmem:[#allocation3 + $0x80] sm:$0xff] }
 0x3a0   : > { %9373 = vst [vmem:[#allocation22_spill] sm:$0xff] %v7769_v30  ;;  %v5263_v11 = vpop.f32.mrb[36].mxu1  ;;  %9390 = vst [vmem:[#allocation10_spill] sm:$0xff] %v7895_v4 }
 0x3a1   : > { %v7778_v21 = vadd.f32 %v5263_v11, %v7691_v27  ;;  %v2652_v29 = vpop.f32.mrb[37].mxu1  ;;  %v2888_v11 = vld [vmem:[#allocation3 + $0x12a] sm:$0xff] }
 0x3a2   : > { %v7783_v33 = vadd.f32 %v7691_v27, %v2652_v29  ;;  %3286 = vrot.lane.b32.xlu1 %v7780_v34, %s5453_s19 }
 0x3a3   : > { %9374 = vst [vmem:[#allocation74_spill] sm:$0xff] %v7778_v21  ;;  %3284 = vrot.lane.b32.xlu0 %v7787_v6, %s5453_s19  ;;  %v7887_v21 = vld [vmem:[#allocation3 + $0x60] sm:$0xff] }
 0x3a4   : > { %9375 = vst [vmem:[#allocation8_spill] sm:$0xff] %v7783_v33  ;;  %v5266_v1 = vpop.f32.mrb[38].mxu1 }
 0x3a5   : > { %v7792_v28 = vadd.f32 %v5266_v1, %v7691_v27  ;;  %v2662_v58 = vpop.f32.mrb[39].mxu1  ;;  %v2887_v1 = vld [vmem:[#allocation3 + $0x122] sm:$0xff] }
 0x3a6   : > { %v7795_v9 = vadd.f32 %v7691_v27, %v2662_v58  ;;  %3290 = vrot.lane.b32.xlu1 %v2884_v8, %s5453_s19 }
 0x3a7   : > { %9376 = vst [vmem:[#allocation94_spill] sm:$0xff] %v7792_v28  ;;  %3288 = vrot.lane.b32.xlu0 %v2883_v45, %s5453_s19  ;;  %v7883_v28 = vld [vmem:[#allocation3 + $0x68] sm:$0xff] }
 0x3a8   : > { %9377 = vst [vmem:[#allocation53_spill] sm:$0xff] %v7795_v9  ;;  %v5269_v48 = vpop.f32.mrb[40].mxu1 }
 0x3a9   : > { %v7800_v14 = vadd.f32 %v5269_v48, %v7691_v27  ;;  %v2672_v55 = vpop.f32.mrb[41].mxu1  ;;  %v2890_v48 = vld [vmem:[#allocation3 + $0x142] sm:$0xff] }
 0x3aa   : > { %v7803_v51 = vadd.f32 %v7691_v27, %v2672_v55  ;;  %3294 = vrot.lane.b32.xlu1 %v2886_v53, %s5453_s19  ;;  %v7822_v55 = vpop.permute.xlu1 %3126 }
 0x3ab   : > { %9378 = vst [vmem:[#allocation6_spill] sm:$0xff] %v7800_v14  ;;  %3292 = vrot.lane.b32.xlu0 %v2885_v44, %s5453_s19  ;;  %v2889_v44 = vld [vmem:[#allocation3 + $0x13a] sm:$0xff]  ;;  %v7875_v14 = vld [vmem:[#allocation3 + $0x48] sm:$0xff] }
 0x3ac   : > { %9379 = vst [vmem:[#allocation127_spill] sm:$0xff] %v7803_v51  ;;  %v5272_v19 = vpop.f32.mrb[42].mxu1 }
 0x3ad   : > { %v7812_v38 = vadd.f32 %v5272_v19, %v7691_v27  ;;  %v2682_v5 = vpop.f32.mrb[43].mxu1  ;;  %v7828_v19 = vpop.permute.xlu0 %3124 }
 0x3ae   : > { %v7815_v29 = vadd.f32 %v7691_v27, %v2682_v5  ;;  %3298 = vrot.lane.b32.xlu1 %v2888_v11, %s5453_s19 }
 0x3af   : > { %9380 = vst [vmem:[#allocation51_spill] sm:$0xff] %v7812_v38  ;;  %3296 = vrot.lane.b32.xlu0 %v2887_v1, %s5453_s19  ;;  %v7871_v38 = vld [vmem:[#allocation3 + $0x50] sm:$0xff] }
 0x3b0   : > { %9381 = vst [vmem:[#allocation126_spill] sm:$0xff] %v7815_v29  ;;  %v5275_v58 = vpop.f32.mrb[44].mxu1  ;;  %v2894_v29 = vld [vmem:[#allocation3 + $0x172] sm:$0xff] }
 0x3b1   : > { %v7820_v8 = vadd.f32 %v5275_v58, %v7691_v27  ;;  %v2692_v45 = vpop.f32.mrb[45].mxu1  ;;  %v2892_v58 = vld [vmem:[#allocation3 + $0x15a] sm:$0xff] }
 0x3b2   : > { %v7825_v53 = vadd.f32 %v7691_v27, %v2692_v45  ;;  %3302 = vrot.lane.b32.xlu1 %v2890_v48, %s5453_s19  ;;  %v2891_v45 = vld [vmem:[#allocation3 + $0x152] sm:$0xff]  ;;  %v7839_v48 = vpop.permute.xlu1 %3130 }
 0x3b3   : > { %9382 = vst [vmem:[#allocation28_spill] sm:$0xff] %v7820_v8  ;;  %3300 = vrot.lane.b32.xlu0 %v2889_v44, %s5453_s19  ;;  %v2893_v44 = vld [vmem:[#allocation3 + $0x16a] sm:$0xff] }
 0x3b4   : > { %9383 = vst [vmem:[#allocation76_spill] sm:$0xff] %v7825_v53  ;;  %v5278_v5 = vpop.f32.mrb[46].mxu1  ;;  %v7841_v53 = vpop.permute.xlu0 %3128 }
 0x3b5   : > { %v7832_v11 = vadd.f32 %v5278_v5, %v7691_v27  ;;  %v2702_v1 = vpop.f32.mrb[47].mxu1 }
 0x3b6   : > { %v7835_v8 = vadd.f32 %v7691_v27, %v2702_v1  ;;  %3306 = vrot.lane.b32.xlu1 %v2892_v58, %s5453_s19  ;;  %v7845_v5 = vpop.permute.xlu1 %3134  ;;  %v7851_v1 = vld [vmem:[#allocation3 + $0x18] sm:$0xff] }
 0x3b7   : > { %9384 = vst [vmem:[#allocation26_spill] sm:$0xff] %v7832_v11  ;;  %3304 = vrot.lane.b32.xlu0 %v2891_v45, %s5453_s19  ;;  %v7847_v11 = vld [vmem:[#allocation3 + $0x20] sm:$0xff] }
 0x3b8   : > { %9385 = vst [vmem:[#allocation96_spill] sm:$0xff] %v7835_v8  ;;  %v7849_v27 = vpop.permute.xlu0 %3132 }
 0x3ba   : > { %3310 = vrot.lane.b32.xlu1 %v2894_v29, %s5453_s19  ;;  %v7857_v58 = vpop.permute.xlu1 %3138  ;;  %v7859_v29 = vld [vmem:[#allocation3 + $0x38] sm:$0xff] }
 0x3bb   : > { %3308 = vrot.lane.b32.xlu0 %v2893_v44, %s5453_s19  ;;  %v7863_v44 = vld [vmem:[#allocation3 + $0x30] sm:$0xff] }
 0x3bc   : > { %v7861_v45 = vpop.permute.xlu0 %3136 }
 0x3be   : > { %3378 = vrot.lane.b32.xlu1 %v7847_v11, %s5455_s21  ;;  %v7869_v8 = vpop.permute.xlu1 %3142 }
 0x3bf   : > { %3376 = vrot.lane.b32.xlu0 %v7851_v1, %s5455_s21  ;;  %9386 = vst [vmem:[#allocation75_spill] sm:$0xff] %v7869_v8 }
 0x3c0   : > { %v7873_v51 = vpop.permute.xlu0 %3140 }
 0x3c2   : > { %3382 = vrot.lane.b32.xlu1 %v7859_v29, %s5455_s21  ;;  %v7881_v9 = vpop.permute.xlu1 %3146 }
 0x3c3   : > { %3380 = vrot.lane.b32.xlu0 %v7863_v44, %s5455_s21  ;;  %9387 = vst [vmem:[#allocation13_spill] sm:$0xff] %v7881_v9 }
 0x3c4   : > { %v7885_v33 = vpop.permute.xlu0 %3144 }
 0x3c5   : > { %9388 = vst [vmem:[#allocation95_spill] sm:$0xff] %v7885_v33 }
 0x3c6   : > { %3386 = vrot.lane.b32.xlu1 %v7871_v38, %s5455_s21  ;;  %v7893_v30 = vpop.permute.xlu1 %3150 }
 0x3c7   : > { %3384 = vrot.lane.b32.xlu0 %v7875_v14, %s5455_s21  ;;  %9389 = vst [vmem:[#allocation57_spill] sm:$0xff] %v7893_v30  ;;  %v4377_v30 = vld [vmem:[%s8960_s4 + $0x28] sm:$0xff] }
 0x3c8   : > { %v7897_v52 = vpop.permute.xlu0 %3148 }
 0x3c9   : > { %9391 = vst [vmem:[#allocation129_spill] sm:$0xff] %v7897_v52  ;;  %v3027_v52 = vld [vmem:[#allocation3 + $0x51] sm:$0xff] }
 0x3ca   : > { %3390 = vrot.lane.b32.xlu1 %v7883_v28, %s5455_s21  ;;  %v7905_v17 = vpop.permute.xlu1 %3154 }
 0x3cb   : > { %3388 = vrot.lane.b32.xlu0 %v7887_v21, %s5455_s21  ;;  %9392 = vst [vmem:[#allocation55_spill] sm:$0xff] %v7905_v17  ;;  %v7965_v17 = vld [vmem:[#allocation3 + $0xf0] sm:$0xff] }
 0x3cc   : > { %v7909_v46 = vpop.permute.xlu0 %3152 }
 0x3cd   : > { %9394 = vst [vmem:[#allocation32_spill] sm:$0xff] %v7909_v46  ;;  %v4374_v46 = vld [vmem:[%s8960_s4 + $0x10] sm:$0xff] }
 0x3ce   : > { %3394 = vrot.lane.b32.xlu1 %v7895_v4, %s5455_s21  ;;  %v7917_v59 = vpop.permute.xlu1 %3158 }
 0x3cf   : > { %3392 = vrot.lane.b32.xlu0 %v7899_v13, %s5455_s21  ;;  %9396 = vst [vmem:[#allocation30_spill] sm:$0xff] %v7917_v59 }
 0x3d0   : > { %v7921_v26 = vpop.permute.xlu0 %3156 }
 0x3d1   : > { %9398 = vst [vmem:[#allocation77_spill] sm:$0xff] %v7921_v26 }
 0x3d2   : > { %3398 = vrot.lane.b32.xlu1 %v7907_v0, %s5455_s21  ;;  %v7929_v57 = vpop.permute.xlu1 %3162 }
 0x3d3   : > { %3396 = vrot.lane.b32.xlu0 %v7911_v16, %s5455_s21  ;;  %9400 = vst [vmem:[#allocation97_spill] sm:$0xff] %v7929_v57  ;;  %v4372_v57 = vld [vmem:[%s8960_s4] sm:$0xff] }
 0x3d4   : > { %v7933_v41 = vpop.permute.xlu0 %3160 }
 0x3d5   : > { %9401 = vst [vmem:[#allocation61_spill] sm:$0xff] %v7933_v41 }
 0x3d6   : > { %3402 = vrot.lane.b32.xlu1 %v7919_v35, %s5455_s21  ;;  %v7941_v62 = vpop.permute.xlu1 %3166 }
 0x3d7   : > { %3400 = vrot.lane.b32.xlu0 %v7923_v36, %s5455_s21  ;;  %9402 = vst [vmem:[#allocation16_spill] sm:$0xff] %v7941_v62  ;;  %v4373_v62 = vld [vmem:[%s8960_s4 + $0x8] sm:$0xff] }
 0x3d8   : > { %v7945_v39 = vpop.permute.xlu0 %3164  ;;  %v5361_v59 = vpack.c.bf16 %v4373_v62, %v4372_v57  ;;  %v4375_v62 = vld [vmem:[%s8960_s4 + $0x18] sm:$0xff] }
 0x3d9   : > { %9403 = vst [vmem:[#allocation131_spill] sm:$0xff] %v7945_v39  ;;  %v7961_v39 = vld [vmem:[#allocation3 + $0xf8] sm:$0xff] }
 0x3da   : > { %3406 = vrot.lane.b32.xlu1 %v7931_v3, %s5455_s21  ;;  %v7959_v41 = vpop.permute.xlu1 %3170  ;;  %5362 = vmatprep.subr.bf16.mxu0 %v5361_v59 }
 0x3db   : > { %3404 = vrot.lane.b32.xlu0 %v7935_v61, %s5455_s21  ;;  %9404 = vst [vmem:[#allocation59_spill] sm:$0xff] %v7959_v41  ;;  %5364 = vmatpush3.bf16.msra.mxu0 %v5361_v59  ;;  %v5365_v41 = vpack.c.bf16 %v4375_v62, %v4374_v46  ;;  %v4376_v59 = vld [vmem:[%s8960_s4 + $0x20] sm:$0xff] }
 0x3dc   : > { %v7963_v26 = vpop.permute.xlu0 %3168  ;;  %v5369_v46 = vpack.c.bf16 %v4377_v30, %v4376_v59 }
 0x3dd   : > { %9405 = vst [vmem:[#allocation130_spill] sm:$0xff] %v7963_v26  ;;  %5366 = vmatprep.subr.bf16.mxu0 %v5365_v41 }
 0x3de   : > { %3410 = vrot.lane.b32.xlu1 %v7943_v43, %s5455_s21  ;;  %v7977_v57 = vpop.permute.xlu1 %3174 }
 0x3df   : > { %3408 = vrot.lane.b32.xlu0 %v7947_v32, %s5455_s21  ;;  %9406 = vst [vmem:[#allocation36_spill] sm:$0xff] %v7977_v57  ;;  %5368 = vmatpush3.bf16.msra.mxu0 %v5365_v41 }
 0x3e0   : > { %v7979_v26 = vpop.permute.xlu0 %3172  ;;  %5370 = vmatprep.subr.bf16.mxu0 %v5369_v46 }
 0x3e1   : > { %9407 = vst [vmem:[#allocation80_spill] sm:$0xff] %v7979_v26 }
 0x3e2   : > { %3414 = vrot.lane.b32.xlu1 %v7961_v39, %s5455_s21 }
 0x3e3   : > { %3412 = vrot.lane.b32.xlu0 %v7965_v17, %s5455_s21  ;;  %5372 = vmatpush3.bf16.msra.mxu0 %v5369_v46  ;;  %v4380_v46 = vld [vmem:[%s8960_s4 + $0x40] sm:$0xff] }
 0x3e4   : > { %v7991_v57 = vpop.permute.xlu1 %3178 }
 0x3e5   : > { %9408 = vst [vmem:[#allocation34_spill] sm:$0xff] %v7991_v57  ;;  %v7993_v62 = vpop.permute.xlu0 %3176 }
 0x3e6   : > { %3506 = vrot.lane.b32.xlu1 %v7529_v24, %s5457_s15  ;;  %9409 = vst [vmem:[#allocation100_spill] sm:$0xff] %v7993_v62  ;;  %v4378_v24 = vld [vmem:[%s8960_s4 + $0x30] sm:$0xff]  ;;  %v2931_v62 = vld [vmem:[#allocation3 + $0x49] sm:$0xff] }
 0x3e7   : > { %3504 = vrot.lane.b32.xlu0 %v7534_v20, %s5457_s15  ;;  %v4379_v20 = vld [vmem:[%s8960_s4 + $0x38] sm:$0xff] }
 0x3e8   : > { %v5373_v30 = vpack.c.bf16 %v4379_v20, %v4378_v24 }
 0x3ea   : > { %3634 = vrot.lane.b32.xlu1 %v7668_v7, %s5458_s13  ;;  %5374 = vmatprep.subr.bf16.mxu0 %v5373_v30 }
 0x3eb   : > { %3632 = vrot.lane.b32.xlu0 %v7672_v37, %s5458_s13  ;;  %5376 = vmatpush3.bf16.msra.mxu0 %v5373_v30 }
 0x3ec   : > { %v8005_v41 = vpop.permute.xlu1 %3182  ;;  %5295 = vmatprep.subr.mxu0 %v4380_v46 }
 0x3ed   : > { %9410 = vst [vmem:[#allocation79_spill] sm:$0xff] %v8005_v41  ;;  %v8007_v59 = vpop.permute.xlu0 %3180 }
 0x3ee   : > { %9411 = vst [vmem:[#allocation23_spill] sm:$0xff] %v8007_v59  ;;  %3762 = vrot.lane.b32.xlu1 %v7859_v29, %s5459_s18 }
 0x3ef   : > { %3760 = vrot.lane.b32.xlu0 %v7863_v44, %s5459_s18  ;;  %5296 = vmatpush3.msra.mxu0 %v4380_v46 }
 0x3f0   : > { %v8013_v7 = vpop.permute.xlu1 %3250 }
 0x3f1   : > { %v8015_v37 = vpop.permute.xlu0 %3248 }
 0x3f2   : > { %3508 = vrot.lane.b32.xlu1 %v7545_v60, %s5457_s15 }
 0x3f3   : > { %3888 = vrot.lane.b32.xlu0 %v7545_v60, %s5460_s23  ;;  %v2930_v60 = vld [vmem:[#allocation3 + $0x39] sm:$0xff] }
 0x3f4   : > { %v8024_v24 = vpop.permute.xlu1 %3254 }
 0x3f5   : > { %v8026_v20 = vpop.permute.xlu0 %3252 }
 0x3f6   : > { %4016 = vrot.lane.b32.xlu1 %v7684_v40, %s5461_s24 }
 0x3f7   : > { %3890 = vrot.lane.b32.xlu0 %v7540_v22, %s5460_s23 }
 0x3f8   : > { %v8032_v30 = vpop.permute.xlu1 %3258 }
 0x3f9   : > { %v8034_v41 = vpop.permute.xlu0 %3256 }
 0x3fa   : > { %3636 = vrot.lane.b32.xlu1 %v7684_v40, %s5458_s13 }
 0x3fb   : > { %3510 = vrot.lane.b32.xlu0 %v2930_v60, %s5457_s15 }
 0x3fc   : > { %v8039_v46 = vpop.permute.xlu1 %3262 }
 0x3fd   : > { %v8041_v59 = vpop.permute.xlu0 %3260 }
 0x3fe   : > { %3638 = vrot.lane.b32.xlu1 %v7680_v18, %s5458_s13 }
 0x3ff   : > { %4018 = vrot.lane.b32.xlu0 %v7680_v18, %s5461_s24 }
 0x400   : > { %v8047_v22 = vpop.permute.xlu1 %3266 }
 0x401   : > { %v8049_v57 = vpop.permute.xlu0 %3264 }
 0x402   : > { %3766 = vrot.lane.b32.xlu1 %v7871_v38, %s5459_s18 }
 0x403   : > { %3764 = vrot.lane.b32.xlu0 %v7875_v14, %s5459_s18 }
 0x404   : > { %v8055_v40 = vpop.permute.xlu1 %3270 }
 0x405   : > { %9412 = vst [vmem:[#allocation99_spill] sm:$0xff] %v8055_v40  ;;  %v8057_v60 = vpop.permute.xlu0 %3268 }
 0x406   : > { %9413 = vst [vmem:[#allocation65_spill] sm:$0xff] %v8057_v60  ;;  %3512 = vrot.lane.b32.xlu1 %v2931_v62, %s5457_s15 }
 0x407   : > { %3892 = vrot.lane.b32.xlu0 %v2931_v62, %s5460_s23 }
 0x408   : > { %v8061_v18 = vpop.permute.xlu1 %3274 }
 0x409   : > { %9414 = vst [vmem:[#allocation21_spill] sm:$0xff] %v8061_v18  ;;  %v8063_v26 = vpop.permute.xlu0 %3272 }
 0x40a   : > { %9415 = vst [vmem:[#allocation133_spill] sm:$0xff] %v8063_v26  ;;  %4020 = vrot.lane.b32.xlu1 %v7703_v50, %s5461_s24 }
 0x40b   : > { %3894 = vrot.lane.b32.xlu0 %v3027_v52, %s5460_s23 }
 0x40c   : > { %v8068_v9 = vpop.permute.xlu1 %3278 }
 0x40d   : > { %9416 = vst [vmem:[#allocation63_spill] sm:$0xff] %v8068_v9  ;;  %v8070_v33 = vpop.permute.xlu0 %3276 }
 0x40e   : > { %9417 = vst [vmem:[#allocation132_spill] sm:$0xff] %v8070_v33  ;;  %3640 = vrot.lane.b32.xlu1 %v7703_v50, %s5458_s13  ;;  %v2937_v33 = vld [vmem:[#allocation3 + $0x91] sm:$0xff] }
 0x40f   : > { %3514 = vrot.lane.b32.xlu0 %v3027_v52, %s5457_s15 }
 0x410   : > { %v8075_v62 = vpop.permute.xlu1 %3282 }
 0x411   : > { %9418 = vst [vmem:[#allocation40_spill] sm:$0xff] %v8075_v62  ;;  %v8077_v18 = vpop.permute.xlu0 %3280  ;;  %v2933_v62 = vld [vmem:[#allocation3 + $0x61] sm:$0xff] }
 0x412   : > { %9419 = vst [vmem:[#allocation82_spill] sm:$0xff] %v8077_v18  ;;  %3642 = vrot.lane.b32.xlu1 %v7696_v10, %s5458_s13 }
 0x413   : > { %4022 = vrot.lane.b32.xlu0 %v7696_v10, %s5461_s24 }
 0x414   : > { %v8083_v26 = vpop.permute.xlu1 %3286 }
 0x415   : > { %9420 = vst [vmem:[#allocation145_spill] sm:$0xff] %v8083_v26  ;;  %v8085_v9 = vpop.permute.xlu0 %3284 }
 0x416   : > { %9421 = vst [vmem:[#allocation38_spill] sm:$0xff] %v8085_v9  ;;  %3770 = vrot.lane.b32.xlu1 %v7883_v28, %s5459_s18  ;;  %v3029_v9 = vld [vmem:[#allocation3 + $0x69] sm:$0xff] }
 0x417   : > { %3768 = vrot.lane.b32.xlu0 %v7887_v21, %s5459_s18 }
 0x418   : > { %v8091_v50 = vpop.permute.xlu1 %3290 }
 0x419   : > { %9422 = vst [vmem:[#allocation102_spill] sm:$0xff] %v8091_v50  ;;  %v8093_v52 = vpop.permute.xlu0 %3288 }
 0x41a   : > { %9423 = vst [vmem:[#allocation81_spill] sm:$0xff] %v8093_v52  ;;  %3516 = vrot.lane.b32.xlu1 %v2933_v62, %s5457_s15 }
 0x41b   : > { %3896 = vrot.lane.b32.xlu0 %v2933_v62, %s5460_s23 }
 0x41c   : > { %v8097_v10 = vpop.permute.xlu1 %3294 }
 0x41d   : > { %9424 = vst [vmem:[#allocation27_spill] sm:$0xff] %v8097_v10  ;;  %v8099_v26 = vpop.permute.xlu0 %3292 }
 0x41e   : > { %9425 = vst [vmem:[#allocation101_spill] sm:$0xff] %v8099_v26  ;;  %4024 = vrot.lane.b32.xlu1 %v7717_v31, %s5461_s24 }
 0x41f   : > { %3898 = vrot.lane.b32.xlu0 %v3029_v9, %s5460_s23 }
 0x420   : > { %v8104_v18 = vpop.permute.xlu1 %3298 }
 0x421   : > { %9426 = vst [vmem:[#allocation114_spill] sm:$0xff] %v8104_v18  ;;  %v8106_v50 = vpop.permute.xlu0 %3296 }
 0x422   : > { %9427 = vst [vmem:[#allocation25_spill] sm:$0xff] %v8106_v50  ;;  %3644 = vrot.lane.b32.xlu1 %v7717_v31, %s5458_s13 }
 0x423   : > { %3518 = vrot.lane.b32.xlu0 %v3029_v9, %s5457_s15 }
 0x424   : > { %v8111_v62 = vpop.permute.xlu1 %3302 }
 0x425   : > { %9428 = vst [vmem:[#allocation135_spill] sm:$0xff] %v8111_v62  ;;  %v8113_v10 = vpop.permute.xlu0 %3300  ;;  %v2935_v62 = vld [vmem:[#allocation3 + $0x79] sm:$0xff] }
 0x426   : > { %9429 = vst [vmem:[#allocation68_spill] sm:$0xff] %v8113_v10  ;;  %3646 = vrot.lane.b32.xlu1 %v7710_v54, %s5458_s13 }
 0x427   : > { %4026 = vrot.lane.b32.xlu0 %v7710_v54, %s5461_s24 }
 0x428   : > { %v8119_v26 = vpop.permute.xlu1 %3306 }
 0x429   : > { %9430 = vst [vmem:[#allocation134_spill] sm:$0xff] %v8119_v26  ;;  %v8121_v18 = vpop.permute.xlu0 %3304 }
 0x42a   : > { %9431 = vst [vmem:[#allocation44_spill] sm:$0xff] %v8121_v18  ;;  %3774 = vrot.lane.b32.xlu1 %v7895_v4, %s5459_s18  ;;  %v3031_v18 = vld [vmem:[#allocation3 + $0x81] sm:$0xff] }
 0x42b   : > { %3772 = vrot.lane.b32.xlu0 %v7899_v13, %s5459_s18 }
 0x42c   : > { %v8127_v31 = vpop.permute.xlu1 %3310 }
 0x42d   : > { %9432 = vst [vmem:[#allocation84_spill] sm:$0xff] %v8127_v31  ;;  %v8129_v9 = vpop.permute.xlu0 %3308 }
 0x42e   : > { %9433 = vst [vmem:[#allocation42_spill] sm:$0xff] %v8129_v9  ;;  %3520 = vrot.lane.b32.xlu1 %v2935_v62, %s5457_s15 }
 0x42f   : > { %3900 = vrot.lane.b32.xlu0 %v2935_v62, %s5460_s23 }
 0x430   : > { %v8133_v54 = vpop.permute.xlu1 %3378 }
 0x431   : > { %v3377_v26 = vpop.permute.xlu0 %3376 }
 0x432   : > { %4028 = vrot.lane.b32.xlu1 %v7731_v47, %s5461_s24 }
 0x433   : > { %3902 = vrot.lane.b32.xlu0 %v3031_v18, %s5460_s23 }
 0x434   : > { %v8138_v10 = vpop.permute.xlu1 %3382 }
 0x435   : > { %v8140_v50 = vpop.permute.xlu0 %3380 }
 0x436   : > { %3648 = vrot.lane.b32.xlu1 %v7731_v47, %s5458_s13 }
 0x437   : > { %3522 = vrot.lane.b32.xlu0 %v3031_v18, %s5457_s15 }
 0x438   : > { %v8145_v31 = vpop.permute.xlu1 %3386 }
 0x439   : > { %v8147_v62 = vpop.permute.xlu0 %3384 }
 0x43a   : > { %3650 = vrot.lane.b32.xlu1 %v7724_v42, %s5458_s13 }
 0x43b   : > { %4030 = vrot.lane.b32.xlu0 %v7724_v42, %s5461_s24 }
 0x43c   : > { %v8153_v9 = vpop.permute.xlu1 %3390 }
 0x43d   : > { %v8155_v52 = vpop.permute.xlu0 %3388 }
 0x43e   : > { %3778 = vrot.lane.b32.xlu1 %v7907_v0, %s5459_s18  ;;  %v3033_v0 = vld [vmem:[#allocation3 + $0x99] sm:$0xff] }
 0x43f   : > { %3776 = vrot.lane.b32.xlu0 %v7911_v16, %s5459_s18 }
 0x440   : > { %v8161_v47 = vpop.permute.xlu1 %3394 }
 0x441   : > { %v8163_v18 = vpop.permute.xlu0 %3392 }
 0x442   : > { %3524 = vrot.lane.b32.xlu1 %v2937_v33, %s5457_s15 }
 0x443   : > { %3904 = vrot.lane.b32.xlu0 %v2937_v33, %s5460_s23 }
 0x444   : > { %v8167_v42 = vpop.permute.xlu1 %3398 }
 0x445   : > { %9434 = vst [vmem:[#allocation104_spill] sm:$0xff] %v8167_v42  ;;  %v8169_v40 = vpop.permute.xlu0 %3396 }
 0x446   : > { %9435 = vst [vmem:[#allocation83_spill] sm:$0xff] %v8169_v40  ;;  %4032 = vrot.lane.b32.xlu1 %v7745_v25, %s5461_s24 }
 0x447   : > { %3906 = vrot.lane.b32.xlu0 %v3033_v0, %s5460_s23 }
 0x448   : > { %v8174_v16 = vpop.permute.xlu1 %3402 }
 0x449   : > { %9436 = vst [vmem:[#allocation31_spill] sm:$0xff] %v8174_v16  ;;  %v8176_v4 = vpop.permute.xlu0 %3400 }
 0x44a   : > { %9437 = vst [vmem:[#allocation103_spill] sm:$0xff] %v8176_v4  ;;  %3652 = vrot.lane.b32.xlu1 %v7745_v25, %s5458_s13 }
 0x44b   : > { %3526 = vrot.lane.b32.xlu0 %v3033_v0, %s5457_s15 }
 0x44c   : > { %v8181_v33 = vpop.permute.xlu1 %3406 }
 0x44d   : > { %9438 = vst [vmem:[#allocation116_spill] sm:$0xff] %v8181_v33  ;;  %v8183_v42 = vpop.permute.xlu0 %3404  ;;  %v2939_v33 = vld [vmem:[#allocation3 + $0xa9] sm:$0xff] }
 0x44e   : > { %9439 = vst [vmem:[#allocation29_spill] sm:$0xff] %v8183_v42  ;;  %3654 = vrot.lane.b32.xlu1 %v7738_v49, %s5458_s13 }
 0x44f   : > { %4034 = vrot.lane.b32.xlu0 %v7738_v49, %s5461_s24 }
 0x450   : > { %v8189_v8 = vpop.permute.xlu1 %3410 }
 0x451   : > { %9440 = vst [vmem:[#allocation137_spill] sm:$0xff] %v8189_v8  ;;  %v8191_v16 = vpop.permute.xlu0 %3408  ;;  %v3035_v8 = vld [vmem:[#allocation3 + $0xb1] sm:$0xff] }
 0x452   : > { %9441 = vst [vmem:[#allocation115_spill] sm:$0xff] %v8191_v16  ;;  %3782 = vrot.lane.b32.xlu1 %v7919_v35, %s5459_s18 }
 0x453   : > { %3780 = vrot.lane.b32.xlu0 %v7923_v36, %s5459_s18 }
 0x454   : > { %v8197_v0 = vpop.permute.xlu1 %3414 }
 0x455   : > { %9442 = vst [vmem:[#allocation136_spill] sm:$0xff] %v8197_v0  ;;  %v8199_v25 = vpop.permute.xlu0 %3412  ;;  %v2799_v0 = vld [vmem:[#allocation3] sm:$0xff] }
 0x456   : > { %9443 = vst [vmem:[#allocation48_spill] sm:$0xff] %v8199_v25  ;;  %3528 = vrot.lane.b32.xlu1 %v2939_v33, %s5457_s15 }
 0x457   : > { %3908 = vrot.lane.b32.xlu0 %v2939_v33, %s5460_s23  ;;  %v4112_v33 = vsel %vm1799_vm2, %v2799_v0, %v7809_v15 }
 0x458   : > { %v3507_v49 = vpop.permute.xlu1 %3506  ;;  %v4144_v4 = vsel %vm1865_vm5, %v4112_v33, %v8015_v37  ;;  %v2941_v33 = vld [vmem:[#allocation3 + $0xc1] sm:$0xff] }
 0x459   : > { %v3505_v42 = vpop.permute.xlu0 %3504 }
 0x45a   : > { %4036 = vrot.lane.b32.xlu1 %v7759_v12, %s5461_s24 }
 0x45b   : > { %3910 = vrot.lane.b32.xlu0 %v3035_v8, %s5460_s23 }
 0x45c   : > { %v3635_v16 = vpop.permute.xlu1 %3634 }
 0x45d   : > { %v3633_v35 = vpop.permute.xlu0 %3632 }
 0x45e   : > { %3656 = vrot.lane.b32.xlu1 %v7759_v12, %s5458_s13  ;;  %v4176_v12 = vsel %vm1931_vm7, %v4144_v4, %v3377_v26 }
 0x45f   : > { %3530 = vrot.lane.b32.xlu0 %v3035_v8, %s5457_s15  ;;  %v4208_v8 = vsel %vm1997_vm9, %v4176_v12, %v3505_v42 }
 0x460   : > { %v3763_v25 = vpop.permute.xlu1 %3762  ;;  %v4241_v15 = vsel %vm4240_vm6, %v4208_v8, %v3633_v35  ;;  %v3037_v8 = vld [vmem:[#allocation3 + $0xc9] sm:$0xff] }
 0x461   : > { %v3761_v36 = vpop.permute.xlu0 %3760 }
 0x462   : > { %3658 = vrot.lane.b32.xlu1 %v7752_v56, %s5458_s13  ;;  %v4274_v37 = vsel %vm4273_vm8, %v4241_v15, %v3761_v36 }
 0x463   : > { %4038 = vrot.lane.b32.xlu0 %v7752_v56, %s5461_s24  ;;  %v2800_v56 = vld [vmem:[#allocation3 + $0x8] sm:$0xff] }
 0x464   : > { %v3509_v40 = vpop.permute.xlu1 %3508 }
 0x465   : > { %v3889_v60 = vpop.permute.xlu0 %3888 }
 0x466   : > { %3786 = vrot.lane.b32.xlu1 %v7931_v3, %s5459_s18  ;;  %v4307_v26 = vsel %vm4306_vm10, %v4274_v37, %v3889_v60  ;;  %v4113_v3 = vsel %vm1799_vm2, %v2800_v56, %v7807_v2 }
 0x467   : > { %3784 = vrot.lane.b32.xlu0 %v7935_v61, %s5459_s18  ;;  %v4145_v61 = vsel %vm1865_vm5, %v4113_v3, %v8013_v7  ;;  %v2943_v3 = vld [vmem:[#allocation3 + $0xd9] sm:$0xff] }
 0x468   : > { %v4017_v4 = vpop.permute.xlu1 %4016  ;;  %v4177_v35 = vsel %vm1931_vm7, %v4145_v61, %v8133_v54 }
 0x469   : > { %v4340_v42 = vsel %vm4339_vm11, %v4307_v26, %v4017_v4  ;;  %v3891_v0 = vpop.permute.xlu0 %3890  ;;  %v4209_v12 = vsel %vm1997_vm9, %v4177_v35, %v3507_v49 }
 0x46a   : > { %3532 = vrot.lane.b32.xlu1 %v2941_v33, %s5457_s15  ;;  %5297 = vmatprep.mubr.msk.f32.mxu0 %vm4388_vm12, %v4340_v42  ;;  %v4242_v15 = vsel %vm4240_vm6, %v4209_v12, %v3635_v16  ;;  %v4114_v16 = vsel %vm1799_vm2, %v7851_v1, %v7828_v19  ;;  %v3039_v12 = vld [vmem:[#allocation3 + $0xe1] sm:$0xff] }
 0x46b   : > { %3912 = vrot.lane.b32.xlu0 %v2941_v33, %s5460_s23  ;;  %v4275_v2 = vsel %vm4273_vm8, %v4242_v15, %v3763_v25  ;;  %v4146_v25 = vsel %vm1865_vm5, %v4114_v16, %v8026_v20  ;;  %v2945_v16 = vld [vmem:[#allocation3 + $0xf1] sm:$0xff] }
 0x46c   : > { %v3637_v36 = vpop.permute.xlu1 %3636  ;;  %v4308_v7 = vsel %vm4306_vm10, %v4275_v2, %v3891_v0 }
 0x46d   : > { %v3511_v60 = vpop.permute.xlu0 %3510 }
 0x46e   : > { %4040 = vrot.lane.b32.xlu1 %v7773_v63, %s5461_s24 }
 0x46f   : > { %3914 = vrot.lane.b32.xlu0 %v3037_v8, %s5460_s23 }
 0x470   : > { %v3639_v37 = vpop.permute.xlu1 %3638 }
 0x471   : > { %v4019_v56 = vpop.permute.xlu0 %4018 }
 0x472   : > { %v4341_v26 = vsel %vm4339_vm11, %v4308_v7, %v4019_v56  ;;  %3660 = vrot.lane.b32.xlu1 %v7773_v63, %s5458_s13  ;;  %v4178_v63 = vsel %vm1931_vm7, %v4146_v25, %v8140_v50 }
 0x473   : > { %3534 = vrot.lane.b32.xlu0 %v3037_v8, %s5457_s15  ;;  %5298 = vmatmul.mubr.msk.f32.vlgmr.msra.gmra.mrb[16].mxu0 %vm4388_vm12, %v4341_v26  ;;  %v4210_v42 = vsel %vm1997_vm9, %v4178_v63, %v3509_v40 }
 0x474   : > { %v3767_v54 = vpop.permute.xlu1 %3766  ;;  %v4243_v33 = vsel %vm4240_vm6, %v4210_v42, %v3637_v36  ;;  %v3072_v42 = vld [vmem:[#allocation3 + $0xf2] sm:$0xff] }
 0x475   : > { %v3765_v49 = vpop.permute.xlu0 %3764 }
 0x476   : > { %3662 = vrot.lane.b32.xlu1 %v7766_v23, %s5458_s13  ;;  %v4276_v19 = vsel %vm4273_vm8, %v4243_v33, %v3765_v49  ;;  %v3041_v33 = vld [vmem:[#allocation3 + $0xf9] sm:$0xff] }
 0x477   : > { %4042 = vrot.lane.b32.xlu0 %v7766_v23, %s5461_s24 }
 0x478   : > { %v3513_v4 = vpop.permute.xlu1 %3512 }
 0x479   : > { %v3893_v0 = vpop.permute.xlu0 %3892 }
 0x47a   : > { %3790 = vrot.lane.b32.xlu1 %v7943_v43, %s5459_s18  ;;  %v4309_v1 = vsel %vm4306_vm10, %v4276_v19, %v3893_v0  ;;  %v4115_v43 = vsel %vm1799_vm2, %v7847_v11, %v7822_v55 }
 0x47b   : > { %3788 = vrot.lane.b32.xlu0 %v7947_v32, %s5459_s18  ;;  %v4147_v32 = vsel %vm1865_vm5, %v4115_v43, %v8024_v24 }
 0x47c   : > { %v4021_v23 = vpop.permute.xlu1 %4020  ;;  %v4179_v61 = vsel %vm1931_vm7, %v4147_v32, %v8138_v10 }
 0x47d   : > { %v4342_v20 = vsel %vm4339_vm11, %v4309_v1, %v4021_v23  ;;  %v3895_v50 = vpop.permute.xlu0 %3894  ;;  %v4211_v35 = vsel %vm1997_vm9, %v4179_v61, %v3511_v60  ;;  %v8339_v61 = vld [vmem:[#allocation3 + $0x108] sm:$0xff] }
 0x47e   : > { %3536 = vrot.lane.b32.xlu1 %v2943_v3, %s5457_s15  ;;  %5300 = vmatprep.mubr.msk.f32.mxu0 %vm4388_vm12, %v4342_v20  ;;  %v4244_v8 = vsel %vm4240_vm6, %v4211_v35, %v3639_v37  ;;  %v4116_v37 = vsel %vm1799_vm2, %v7863_v44, %v7841_v53 }
 0x47f   : > { %3916 = vrot.lane.b32.xlu0 %v2943_v3, %s5460_s23  ;;  %v4277_v55 = vsel %vm4273_vm8, %v4244_v8, %v3767_v54  ;;  %v4148_v7 = vsel %vm1865_vm5, %v4116_v37, %v8034_v41  ;;  %v4118_v3 = vsel %vm1799_vm2, %v7875_v14, %v7849_v27 }
 0x480   : > { %v3641_v40 = vpop.permute.xlu1 %3640  ;;  %v4310_v24 = vsel %vm4306_vm10, %v4277_v55, %v3895_v50  ;;  %v2978_v50 = vld [vmem:[#allocation3 + $0xfa] sm:$0xff]  ;;  %v4150_v43 = vsel %vm1865_vm5, %v4118_v3, %v8041_v59  ;;  %v3042_v55 = vld [vmem:[#allocation3 + $0x109] sm:$0xff] }
 0x481   : > { %v3515_v36 = vpop.permute.xlu0 %3514  ;;  %v4182_v32 = vsel %vm1931_vm7, %v4150_v43, %v8155_v52  ;;  %v3076_v3 = vld [vmem:[#allocation3 + $0x122] sm:$0xff]  ;;  %v4122_v43 = vsel %vm1799_vm2, %v7899_v13, %v7873_v51 }
 0x482   : > { %4044 = vrot.lane.b32.xlu1 %v7787_v6, %s5461_s24 }
 0x483   : > { %3918 = vrot.lane.b32.xlu0 %v3039_v12, %s5460_s23 }
 0x484   : > { %v3643_v11 = vpop.permute.xlu1 %3642 }
 0x485   : > { %v4023_v15 = vpop.permute.xlu0 %4022 }
 0x486   : > { %v4343_v2 = vsel %vm4339_vm11, %v4310_v24, %v4023_v15  ;;  %3664 = vrot.lane.b32.xlu1 %v7787_v6, %s5458_s13  ;;  %v4180_v6 = vsel %vm1931_vm7, %v4148_v7, %v8147_v62  ;;  %v4119_v24 = vsel %vm1799_vm2, %v7871_v38, %v7845_v5 }
 0x487   : > { %3538 = vrot.lane.b32.xlu0 %v3039_v12, %s5457_s15  ;;  %5301 = vmatmul.mubr.msk.f32.gmra.mrb[18].mxu0 %vm4388_vm12, %v4343_v2  ;;  %v4212_v26 = vsel %vm1997_vm9, %v4180_v6, %v3513_v4  ;;  %v4151_v15 = vsel %vm1865_vm5, %v4119_v24, %v8039_v46 }
 0x488   : > { %v3771_v10 = vpop.permute.xlu1 %3770  ;;  %v4245_v49 = vsel %vm4240_vm6, %v4212_v26, %v3641_v40 }
 0x489   : > { %v3769_v60 = vpop.permute.xlu0 %3768 }
 0x48a   : > { %3666 = vrot.lane.b32.xlu1 %v7780_v34, %s5458_s13  ;;  %v4278_v53 = vsel %vm4273_vm8, %v4245_v49, %v3769_v60 }
 0x48b   : > { %4046 = vrot.lane.b32.xlu0 %v7780_v34, %s5461_s24 }
 0x48c   : > { %v3517_v56 = vpop.permute.xlu1 %3516 }
 0x48d   : > { %v3897_v54 = vpop.permute.xlu0 %3896 }
 0x48e   : > { %3794 = vrot.lane.b32.xlu1 %v7961_v39, %s5459_s18  ;;  %v4311_v44 = vsel %vm4306_vm10, %v4278_v53, %v3897_v54  ;;  %v4117_v39 = vsel %vm1799_vm2, %v7859_v29, %v7839_v48  ;;  %v4120_v53 = vsel %vm1799_vm2, %v7887_v21, %v7861_v45 }
 0x48f   : > { %3792 = vrot.lane.b32.xlu0 %v7965_v17, %s5459_s18  ;;  %v4149_v17 = vsel %vm1865_vm5, %v4117_v39, %v8032_v30  ;;  %v2980_v39 = vld [vmem:[#allocation3 + $0x112] sm:$0xff] }
 0x490   : > { %v4025_v34 = vpop.permute.xlu1 %4024  ;;  %v4181_v63 = vsel %vm1931_vm7, %v4149_v17, %v8145_v31 }
 0x491   : > { %v4344_v41 = vsel %vm4339_vm11, %v4311_v44, %v4025_v34  ;;  %v3899_v62 = vpop.permute.xlu0 %3898  ;;  %v4213_v0 = vsel %vm1997_vm9, %v4181_v63, %v3515_v36  ;;  %v4214_v36 = vsel %vm1997_vm9, %v4182_v32, %v3517_v56  ;;  %v3074_v56 = vld [vmem:[#allocation3 + $0x10a] sm:$0xff]  ;;  %v4152_v44 = vsel %vm1865_vm5, %v4120_v53, %v8049_v57 }
 0x492   : > { %3540 = vrot.lane.b32.xlu1 %v2945_v16, %s5457_s15  ;;  %5303 = vmatprep.mubr.msk.f32.mxu0 %vm4388_vm12, %v4344_v41  ;;  %v4246_v19 = vsel %vm4240_vm6, %v4213_v0, %v3643_v11  ;;  %v8350_v11 = vld [vmem:[#allocation3 + $0x110] sm:$0xff]  ;;  %v4184_v34 = vsel %vm1931_vm7, %v4152_v44, %v8163_v18 }
 0x493   : > { %3920 = vrot.lane.b32.xlu0 %v2945_v16, %s5460_s23  ;;  %v4279_v48 = vsel %vm4273_vm8, %v4246_v19, %v3771_v10  ;;  %v4183_v10 = vsel %vm1931_vm7, %v4151_v15, %v8153_v9  ;;  %v3043_v9 = vld [vmem:[#allocation3 + $0x111] sm:$0xff]  ;;  %v3045_v32 = vld [vmem:[#allocation3 + $0x129] sm:$0xff] }
 0x494   : > { %v3645_v25 = vpop.permute.xlu1 %3644  ;;  %v4312_v30 = vsel %vm4306_vm10, %v4279_v48, %v3899_v62  ;;  %v3044_v48 = vld [vmem:[#allocation3 + $0x121] sm:$0xff]  ;;  %v2982_v15 = vld [vmem:[#allocation3 + $0x12a] sm:$0xff] }
 0x495   : > { %v3519_v4 = vpop.permute.xlu0 %3518  ;;  %v4247_v12 = vsel %vm4240_vm6, %v4214_v36, %v3645_v25  ;;  %v8389_v25 = vld [vmem:[#allocation3 + $0x120] sm:$0xff] }
 0x496   : > { %4048 = vrot.lane.b32.xlu1 %v3072_v42, %s5461_s24  ;;  %v4215_v37 = vsel %vm1997_vm9, %v4183_v10, %v3519_v4  ;;  %v4121_v4 = vsel %vm1799_vm2, %v7883_v28, %v7857_v58  ;;  %v9447_v10 = vld [vmem:[#allocation10_spill] sm:$0xff] }
 0x497   : > { %3922 = vrot.lane.b32.xlu0 %v3041_v33, %s5460_s23 }
 0x498   : > { %v3647_v29 = vpop.permute.xlu1 %3646 }
 0x499   : > { %v4027_v1 = vpop.permute.xlu0 %4026  ;;  %v4248_v7 = vsel %vm4240_vm6, %v4215_v37, %v3647_v29  ;;  %v8404_v29 = vld [vmem:[#allocation3 + $0x128] sm:$0xff] }
 0x49a   : > { %v4345_v23 = vsel %vm4339_vm11, %v4312_v30, %v4027_v1  ;;  %3668 = vrot.lane.b32.xlu1 %v3072_v42, %s5458_s13  ;;  %v4153_v42 = vsel %vm1865_vm5, %v4121_v4, %v8047_v22  ;;  %v9448_v37 = vld [vmem:[#allocation99_spill] sm:$0xff] }
 0x49b   : > { %3542 = vrot.lane.b32.xlu0 %v3041_v33, %s5457_s15  ;;  %5304 = vmatmul.mubr.msk.f32.gmra.mrb[20].mxu0 %vm4388_vm12, %v4345_v23  ;;  %v4185_v33 = vsel %vm1931_vm7, %v4153_v42, %v8161_v47 }
 0x49c   : > { %v3775_v31 = vpop.permute.xlu1 %3774 }
 0x49d   : > { %v3773_v20 = vpop.permute.xlu0 %3772  ;;  %v4281_v38 = vsel %vm4273_vm8, %v4248_v7, %v3775_v31  ;;  %v2918_v31 = vld [vmem:[#allocation3 + $0x128] sm:$0xff] }
 0x49e   : > { %3670 = vrot.lane.b32.xlu1 %v2978_v50, %s5458_s13  ;;  %v4280_v14 = vsel %vm4273_vm8, %v4247_v12, %v3773_v20 }
 0x49f   : > { %4050 = vrot.lane.b32.xlu0 %v2978_v50, %s5461_s24 }
 0x4a0   : > { %v3521_v40 = vpop.permute.xlu1 %3520 }
 0x4a1   : > { %v3901_v35 = vpop.permute.xlu0 %3900  ;;  %v4216_v62 = vsel %vm1997_vm9, %v4184_v34, %v3521_v40  ;;  %v9444_v40 = vld [vmem:[#allocation65_spill] sm:$0xff] }
 0x4a2   : > { %3416 = vrot.lane.b32.xlu1 %v8339_v61, %s5455_s21  ;;  %v4313_v27 = vsel %vm4306_vm10, %v4280_v14, %v3901_v35  ;;  %v4154_v36 = vsel %vm1865_vm5, %v4122_v43, %v9444_v40  ;;  %v9445_v35 = vld [vmem:[#allocation83_spill] sm:$0xff]  ;;  %v3046_v34 = vld [vmem:[#allocation3 + $0x139] sm:$0xff] }
 0x4a3   : > { %3796 = vrot.lane.b32.xlu0 %v8339_v61, %s5459_s18  ;;  %v4186_v12 = vsel %vm1931_vm7, %v4154_v36, %v9445_v35  ;;  %v2984_v35 = vld [vmem:[#allocation3 + $0x142] sm:$0xff] }
 0x4a4   : > { %v4029_v59 = vpop.permute.xlu1 %4028 }
 0x4a5   : > { %v4346_v52 = vsel %vm4339_vm11, %v4313_v27, %v4029_v59  ;;  %v3903_v8 = vpop.permute.xlu0 %3902 }
 0x4a6   : > { %3924 = vrot.lane.b32.xlu1 %v3042_v55, %s5460_s23  ;;  %5306 = vmatprep.mubr.msk.f32.mxu0 %vm4388_vm12, %v4346_v52  ;;  %v4314_v6 = vsel %vm4306_vm10, %v4281_v38, %v3903_v8 }
 0x4a7   : > { %3798 = vrot.lane.b32.xlu0 %v8350_v11, %s5459_s18 }
 0x4a8   : > { %v3649_v2 = vpop.permute.xlu1 %3648 }
 0x4a9   : > { %v3523_v60 = vpop.permute.xlu0 %3522  ;;  %v4249_v17 = vsel %vm4240_vm6, %v4216_v62, %v3649_v2  ;;  %v9446_v2 = vld [vmem:[#allocation75_spill] sm:$0xff]  ;;  %v3015_v62 = vld [vmem:[#allocation3 + $0x140] sm:$0xff] }
 0x4aa   : > { %3544 = vrot.lane.b32.xlu1 %v3042_v55, %s5457_s15  ;;  %v4217_v30 = vsel %vm1997_vm9, %v4185_v33, %v3523_v60  ;;  %v4123_v60 = vsel %vm1799_vm2, %v9447_v10, %v9446_v2  ;;  %v9458_v2 = vld [vmem:[#allocation129_spill] sm:$0xff]  ;;  %v9459_v10 = vld [vmem:[#allocation19_spill] sm:$0xff] }
 0x4ab   : > { %3418 = vrot.lane.b32.xlu0 %v8350_v11, %s5455_s21  ;;  %v4155_v7 = vsel %vm1865_vm5, %v4123_v60, %v9448_v37  ;;  %v4126_v60 = vsel %vm1799_vm2, %v9459_v10, %v9458_v2  ;;  %v3017_v37 = vld [vmem:[#allocation3 + $0x158] sm:$0xff]  ;;  %v9470_v2 = vld [vmem:[#allocation40_spill] sm:$0xff] }
 0x4ac   : > { %v3651_v5 = vpop.permute.xlu1 %3650 }
 0x4ad   : > { %v4031_v46 = vpop.permute.xlu0 %4030  ;;  %v4250_v28 = vsel %vm4240_vm6, %v4217_v30, %v3651_v5  ;;  %v9449_v5 = vld [vmem:[#allocation104_spill] sm:$0xff]  ;;  %v3047_v30 = vld [vmem:[#allocation3 + $0x141] sm:$0xff] }
 0x4ae   : > { %v4347_v26 = vsel %vm4339_vm11, %v4314_v6, %v4031_v46  ;;  %4052 = vrot.lane.b32.xlu1 %v3074_v56, %s5461_s24  ;;  %v4187_v6 = vsel %vm1931_vm7, %v4155_v7, %v9449_v5  ;;  %v9460_v7 = vld [vmem:[#allocation132_spill] sm:$0xff]  ;;  %v9461_v5 = vld [vmem:[#allocation29_spill] sm:$0xff] }
 0x4af   : > { %3926 = vrot.lane.b32.xlu0 %v3043_v9, %s5460_s23  ;;  %5307 = vmatmul.mubr.msk.f32.gmra.mrb[22].mxu0 %vm4388_vm12, %v4347_v26 }
 0x4b0   : > { %v3779_v54 = vpop.permute.xlu1 %3778 }
 0x4b1   : > { %v3777_v49 = vpop.permute.xlu0 %3776  ;;  %v4283_v58 = vsel %vm4273_vm8, %v4250_v28, %v3779_v54 }
 0x4b2   : > { %3672 = vrot.lane.b32.xlu1 %v3074_v56, %s5458_s13  ;;  %v4282_v21 = vsel %vm4273_vm8, %v4249_v17, %v3777_v49  ;;  %v2919_v56 = vld [vmem:[#allocation3 + $0x138] sm:$0xff]  ;;  %v9450_v17 = vld [vmem:[#allocation95_spill] sm:$0xff] }
 0x4b3   : > { %3546 = vrot.lane.b32.xlu0 %v3043_v9, %s5457_s15 }
 0x4b4   : > { %v3525_v41 = vpop.permute.xlu1 %3524 }
 0x4b5   : > { %v3905_v16 = vpop.permute.xlu0 %3904  ;;  %v4218_v27 = vsel %vm1997_vm9, %v4186_v12, %v3525_v41 }
 0x4b6   : > { %3674 = vrot.lane.b32.xlu1 %v2980_v39, %s5458_s13  ;;  %v4315_v45 = vsel %vm4306_vm10, %v4282_v21, %v3905_v16  ;;  %v9451_v21 = vld [vmem:[#allocation78_spill] sm:$0xff] }
 0x4b7   : > { %4054 = vrot.lane.b32.xlu0 %v2980_v39, %s5461_s24 }
 0x4b8   : > { %v4033_v57 = vpop.permute.xlu1 %4032 }
 0x4b9   : > { %v4348_v18 = vsel %vm4339_vm11, %v4315_v45, %v4033_v57  ;;  %v3907_v63 = vpop.permute.xlu0 %3906  ;;  %v4124_v45 = vsel %vm1799_vm2, %v9451_v21, %v9450_v17  ;;  %v9452_v57 = vld [vmem:[#allocation133_spill] sm:$0xff]  ;;  %v9464_v21 = vld [vmem:[#allocation63_spill] sm:$0xff] }
 0x4ba   : > { %3420 = vrot.lane.b32.xlu1 %v8389_v25, %s5455_s21  ;;  %5309 = vmatprep.mubr.msk.f32.mxu0 %vm4388_vm12, %v4348_v18  ;;  %v4316_v1 = vsel %vm4306_vm10, %v4283_v58, %v3907_v63  ;;  %v4156_v18 = vsel %vm1865_vm5, %v4124_v45, %v9452_v57  ;;  %v9453_v63 = vld [vmem:[#allocation103_spill] sm:$0xff] }
 0x4bb   : > { %3800 = vrot.lane.b32.xlu0 %v8389_v25, %s5459_s18  ;;  %v4188_v4 = vsel %vm1931_vm7, %v4156_v18, %v9453_v63  ;;  %v9465_v18 = vld [vmem:[#allocation116_spill] sm:$0xff] }
 0x4bc   : > { %v3653_v0 = vpop.permute.xlu1 %3652 }
 0x4bd   : > { %v3527_v19 = vpop.permute.xlu0 %3526  ;;  %v4251_v52 = vsel %vm4240_vm6, %v4218_v27, %v3653_v0 }
 0x4be   : > { %3928 = vrot.lane.b32.xlu1 %v3044_v48, %s5460_s23  ;;  %v4219_v26 = vsel %vm1997_vm9, %v4187_v6, %v3527_v19  ;;  %v3078_v19 = vld [vmem:[#allocation3 + $0x13a] sm:$0xff] }
 0x4bf   : > { %3802 = vrot.lane.b32.xlu0 %v8404_v29, %s5459_s18 }
 0x4c0   : > { %v3655_v22 = vpop.permute.xlu1 %3654 }
 0x4c1   : > { %v4035_v23 = vpop.permute.xlu0 %4034  ;;  %v4252_v9 = vsel %vm4240_vm6, %v4219_v26, %v3655_v22 }
 0x4c2   : > { %v4349_v47 = vsel %vm4339_vm11, %v4316_v1, %v4035_v23  ;;  %3548 = vrot.lane.b32.xlu1 %v3044_v48, %s5457_s15 }
 0x4c3   : > { %3422 = vrot.lane.b32.xlu0 %v2918_v31, %s5455_s21  ;;  %5310 = vmatmul.mubr.msk.f32.gmra.mrb[24].mxu0 %vm4388_vm12, %v4349_v47  ;;  %v9454_v47 = vld [vmem:[#allocation13_spill] sm:$0xff]  ;;  %v9455_v31 = vld [vmem:[#allocation128_spill] sm:$0xff] }
 0x4c4   : > { %v3783_v20 = vpop.permute.xlu1 %3782 }
 0x4c5   : > { %v3781_v50 = vpop.permute.xlu0 %3780  ;;  %v4285_v54 = vsel %vm4273_vm8, %v4252_v9, %v3783_v20  ;;  %v4125_v20 = vsel %vm1799_vm2, %v9455_v31, %v9454_v47  ;;  %v5434_v47 = vld [vmem:[#allocation3 + $0xc0] sm:$0xff]  ;;  %v9466_v31 = vld [vmem:[#allocation32_spill] sm:$0xff] }
 0x4c6   : > { %4056 = vrot.lane.b32.xlu1 %v3076_v3, %s5461_s24  ;;  %v4284_v13 = vsel %vm4273_vm8, %v4251_v52, %v3781_v50  ;;  %v9456_v50 = vld [vmem:[#allocation21_spill] sm:$0xff] }
 0x4c7   : > { %3930 = vrot.lane.b32.xlu0 %v3045_v32, %s5460_s23 }
 0x4c8   : > { %v3529_v14 = vpop.permute.xlu1 %3528 }
 0x4c9   : > { %v3909_v59 = vpop.permute.xlu0 %3908  ;;  %v4220_v0 = vsel %vm1997_vm9, %v4188_v4, %v3529_v14 }
 0x4ca   : > { %3676 = vrot.lane.b32.xlu1 %v3076_v3, %s5458_s13  ;;  %v4317_v51 = vsel %vm4306_vm10, %v4284_v13, %v3909_v59  ;;  %v4157_v3 = vsel %vm1865_vm5, %v4125_v20, %v9456_v50  ;;  %v4128_v20 = vsel %vm1799_vm2, %v5434_v47, %v9466_v31  ;;  %v9467_v50 = vld [vmem:[#allocation82_spill] sm:$0xff] }
 0x4cb   : > { %3550 = vrot.lane.b32.xlu0 %v3045_v32, %s5457_s15  ;;  %v9457_v32 = vld [vmem:[#allocation31_spill] sm:$0xff]  ;;  %v5437_v47 = vld [vmem:[#allocation3 + $0xe0] sm:$0xff] }
 0x4cc   : > { %v4037_v8 = vpop.permute.xlu1 %4036  ;;  %v4189_v40 = vsel %vm1931_vm7, %v4157_v3, %v9457_v32  ;;  %v4160_v3 = vsel %vm1865_vm5, %v4128_v20, %v9467_v50  ;;  %v9475_v31 = vld [vmem:[#allocation30_spill] sm:$0xff]  ;;  %v9476_v50 = vld [vmem:[#allocation145_spill] sm:$0xff] }
 0x4cd   : > { %v4350_v55 = vsel %vm4339_vm11, %v4317_v51, %v4037_v8  ;;  %v3911_v24 = vpop.permute.xlu0 %3910  ;;  %v2921_v51 = vld [vmem:[#allocation3 + $0x150] sm:$0xff]  ;;  %v4131_v20 = vsel %vm1799_vm2, %v5437_v47, %v9475_v31 }
 0x4ce   : > { %3678 = vrot.lane.b32.xlu1 %v2982_v15, %s5458_s13  ;;  %5312 = vmatprep.mubr.msk.f32.mxu0 %vm4388_vm12, %v4350_v55  ;;  %v4318_v53 = vsel %vm4306_vm10, %v4285_v54, %v3911_v24 }
 0x4cf   : > { %4058 = vrot.lane.b32.xlu0 %v2982_v15, %s5461_s24  ;;  %v3048_v15 = vld [vmem:[#allocation3 + $0x151] sm:$0xff] }
 0x4d0   : > { %v3657_v38 = vpop.permute.xlu1 %3656 }
 0x4d1   : > { %v3531_v46 = vpop.permute.xlu0 %3530  ;;  %v4253_v48 = vsel %vm4240_vm6, %v4220_v0, %v3657_v38  ;;  %v4158_v38 = vsel %vm1865_vm5, %v4126_v60, %v9460_v7 }
 0x4d2   : > { %3424 = vrot.lane.b32.xlu1 %v2919_v56, %s5455_s21  ;;  %v4221_v12 = vsel %vm1997_vm9, %v4189_v40, %v3531_v46  ;;  %v4190_v6 = vsel %vm1931_vm7, %v4158_v38, %v9461_v5  ;;  %v3082_v5 = vld [vmem:[#allocation3 + $0x16a] sm:$0xff] }
 0x4d3   : > { %3804 = vrot.lane.b32.xlu0 %v2919_v56, %s5459_s18 }
 0x4d4   : > { %v3659_v49 = vpop.permute.xlu1 %3658 }
 0x4d5   : > { %v4039_v44 = vpop.permute.xlu0 %4038  ;;  %v4254_v14 = vsel %vm4240_vm6, %v4221_v12, %v3659_v49  ;;  %v3050_v12 = vld [vmem:[#allocation3 + $0x169] sm:$0xff] }
 0x4d6   : > { %v4351_v41 = vsel %vm4339_vm11, %v4318_v53, %v4039_v44  ;;  %3932 = vrot.lane.b32.xlu1 %v3046_v34, %s5460_s23 }
 0x4d7   : > { %3806 = vrot.lane.b32.xlu0 %v3015_v62, %s5459_s18  ;;  %5313 = vmatmul.mubr.msk.f32.gmra.mrb[26].mxu0 %vm4388_vm12, %v4351_v41  ;;  %v3080_v41 = vld [vmem:[#allocation3 + $0x152] sm:$0xff] }
 0x4d8   : > { %v3787_v16 = vpop.permute.xlu1 %3786 }
 0x4d9   : > { %v3785_v39 = vpop.permute.xlu0 %3784  ;;  %v4287_v27 = vsel %vm4273_vm8, %v4254_v14, %v3787_v16  ;;  %v9462_v16 = vld [vmem:[#allocation57_spill] sm:$0xff] }
 0x4da   : > { %3552 = vrot.lane.b32.xlu1 %v3046_v34, %s5457_s15  ;;  %v4286_v28 = vsel %vm4273_vm8, %v4253_v48, %v3785_v39  ;;  %v9463_v39 = vld [vmem:[#allocation98_spill] sm:$0xff] }
 0x4db   : > { %3426 = vrot.lane.b32.xlu0 %v3015_v62, %s5455_s21  ;;  %v3049_v62 = vld [vmem:[#allocation3 + $0x159] sm:$0xff]  ;;  %v4127_v17 = vsel %vm1799_vm2, %v9463_v39, %v9462_v16 }
 0x4dc   : > { %v3533_v42 = vpop.permute.xlu1 %3532  ;;  %v4159_v45 = vsel %vm1865_vm5, %v4127_v17, %v9464_v21  ;;  %v2925_v39 = vld [vmem:[#allocation3 + $0x180] sm:$0xff]  ;;  %v5436_v17 = vld [vmem:[#allocation3 + $0xd8] sm:$0xff] }
 0x4dd   : > { %v3913_v33 = vpop.permute.xlu0 %3912  ;;  %v4222_v56 = vsel %vm1997_vm9, %v4190_v6, %v3533_v42  ;;  %v4191_v63 = vsel %vm1931_vm7, %v4159_v45, %v9465_v18  ;;  %v9472_v21 = vld [vmem:[#allocation77_spill] sm:$0xff] }
 0x4de   : > { %4060 = vrot.lane.b32.xlu1 %v3078_v19, %s5461_s24  ;;  %v4319_v58 = vsel %vm4306_vm10, %v4286_v28, %v3913_v33  ;;  %v2986_v28 = vld [vmem:[#allocation3 + $0x15a] sm:$0xff]  ;;  %v4130_v45 = vsel %vm1799_vm2, %v5436_v17, %v9472_v21 }
 0x4df   : > { %3934 = vrot.lane.b32.xlu0 %v3047_v30, %s5460_s23  ;;  %v3086_v17 = vld [vmem:[#allocation3 + $0x19a] sm:$0xff] }
 0x4e0   : > { %v4041_v22 = vpop.permute.xlu1 %4040 }
 0x4e1   : > { %v4352_v1 = vsel %vm4339_vm11, %v4319_v58, %v4041_v22  ;;  %v3915_v23 = vpop.permute.xlu0 %3914 }
 0x4e2   : > { %3680 = vrot.lane.b32.xlu1 %v3078_v19, %s5458_s13  ;;  %5315 = vmatprep.mubr.msk.f32.mxu0 %vm4388_vm12, %v4352_v1  ;;  %v4320_v52 = vsel %vm4306_vm10, %v4287_v27, %v3915_v23  ;;  %v2923_v23 = vld [vmem:[#allocation3 + $0x168] sm:$0xff]  ;;  %v3019_v27 = vld [vmem:[#allocation3 + $0x170] sm:$0xff] }
 0x4e3   : > { %3554 = vrot.lane.b32.xlu0 %v3047_v30, %s5457_s15 }
 0x4e4   : > { %v3661_v43 = vpop.permute.xlu1 %3660 }
 0x4e5   : > { %v3535_v36 = vpop.permute.xlu0 %3534  ;;  %v4255_v9 = vsel %vm4240_vm6, %v4222_v56, %v3661_v43  ;;  %v9468_v43 = vld [vmem:[#allocation115_spill] sm:$0xff] }
 0x4e6   : > { %3682 = vrot.lane.b32.xlu1 %v2984_v35, %s5458_s13  ;;  %v4223_v42 = vsel %vm1997_vm9, %v4191_v63, %v3535_v36  ;;  %v4192_v32 = vsel %vm1931_vm7, %v4160_v3, %v9468_v43  ;;  %v9474_v63 = vld [vmem:[#allocation48_spill] sm:$0xff]  ;;  %v4163_v3 = vsel %vm1865_vm5, %v4131_v20, %v9476_v50 }
 0x4e7   : > { %4062 = vrot.lane.b32.xlu0 %v2984_v35, %s5461_s24  ;;  %v8645_v50 = vld [vmem:[%s8962_s6] ss:$0 sm:$0xff] }
 0x4e8   : > { %v3663_v59 = vpop.permute.xlu1 %3662 }
 0x4e9   : > { %v4043_v13 = vpop.permute.xlu0 %4042  ;;  %v4256_v0 = vsel %vm4240_vm6, %v4223_v42, %v3663_v59 }
 0x4ea   : > { %v4353_v8 = vsel %vm4339_vm11, %v4320_v52, %v4043_v13  ;;  %3428 = vrot.lane.b32.xlu1 %v2921_v51, %s5455_s21 }
 0x4eb   : > { %3808 = vrot.lane.b32.xlu0 %v2921_v51, %s5459_s18  ;;  %5316 = vmatmul.mubr.msk.f32.gmra.mrb[28].mxu0 %vm4388_vm12, %v4353_v8 }
 0x4ec   : > { %v3791_v55 = vpop.permute.xlu1 %3790 }
 0x4ed   : > { %v3789_v24 = vpop.permute.xlu0 %3788  ;;  %v4289_v33 = vsel %vm4273_vm8, %v4256_v0, %v3791_v55  ;;  %v5435_v55 = vld [vmem:[#allocation3 + $0xc8] sm:$0xff] }
 0x4ee   : > { %3936 = vrot.lane.b32.xlu1 %v3048_v15, %s5460_s23  ;;  %v4288_v54 = vsel %vm4273_vm8, %v4255_v9, %v3789_v24  ;;  %v9469_v24 = vld [vmem:[#allocation55_spill] sm:$0xff] }
 0x4ef   : > { %3810 = vrot.lane.b32.xlu0 %v3017_v37, %s5459_s18 }
 0x4f0   : > { %v3537_v46 = vpop.permute.xlu1 %3536 }
 0x4f1   : > { %v3917_v26 = vpop.permute.xlu0 %3916  ;;  %v4224_v36 = vsel %vm1997_vm9, %v4192_v32, %v3537_v46  ;;  %v3051_v46 = vld [vmem:[#allocation3 + $0x171] sm:$0xff] }
 0x4f2   : > { %3556 = vrot.lane.b32.xlu1 %v3048_v15, %s5457_s15  ;;  %v4321_v49 = vsel %vm4306_vm10, %v4288_v54, %v3917_v26  ;;  %v4129_v15 = vsel %vm1799_vm2, %v5435_v55, %v9469_v24  ;;  %v9477_v32 = vld [vmem:[#allocation136_spill] sm:$0xff] }
 0x4f3   : > { %3430 = vrot.lane.b32.xlu0 %v3017_v37, %s5455_s21  ;;  %v4161_v10 = vsel %vm1865_vm5, %v4129_v15, %v9470_v2  ;;  %v9471_v37 = vld [vmem:[#allocation137_spill] sm:$0xff]  ;;  %v2990_v15 = vld [vmem:[#allocation3 + $0x18a] sm:$0xff]  ;;  %v3023_v2 = vld [vmem:[#allocation3 + $0x1a0] sm:$0xff] }
 0x4f4   : > { %v4045_v53 = vpop.permute.xlu1 %4044  ;;  %v4193_v7 = vsel %vm1931_vm7, %v4161_v10, %v9471_v37 }
 0x4f5   : > { %v4354_v44 = vsel %vm4339_vm11, %v4321_v49, %v4045_v53  ;;  %v3919_v34 = vpop.permute.xlu0 %3918 }
 0x4f6   : > { %4064 = vrot.lane.b32.xlu1 %v3080_v41, %s5461_s24  ;;  %5318 = vmatprep.mubr.msk.f32.mxu0 %vm4388_vm12, %v4354_v44  ;;  %v4322_v48 = vsel %vm4306_vm10, %v4289_v33, %v3919_v34 }
 0x4f7   : > { %3938 = vrot.lane.b32.xlu0 %v3049_v62, %s5460_s23 }
 0x4f8   : > { %v3665_v57 = vpop.permute.xlu1 %3664 }
 0x4f9   : > { %v3539_v4 = vpop.permute.xlu0 %3538  ;;  %v4257_v14 = vsel %vm4240_vm6, %v4224_v36, %v3665_v57  ;;  %v9473_v57 = vld [vmem:[#allocation38_spill] sm:$0xff] }
 0x4fa   : > { %3684 = vrot.lane.b32.xlu1 %v3080_v41, %s5458_s13  ;;  %v4225_v6 = vsel %vm1997_vm9, %v4193_v7, %v3539_v4  ;;  %v2988_v41 = vld [vmem:[#allocation3 + $0x172] sm:$0xff]  ;;  %v4162_v18 = vsel %vm1865_vm5, %v4130_v45, %v9473_v57 }
 0x4fb   : > { %3558 = vrot.lane.b32.xlu0 %v3049_v62, %s5457_s15  ;;  %v4194_v4 = vsel %vm1931_vm7, %v4162_v18, %v9474_v63  ;;  %v5438_v7 = vld [vmem:[#allocation3 + $0xf0] sm:$0xff]  ;;  %v5439_v45 = vld [vmem:[#allocation3 + $0xf8] sm:$0xff]  ;;  %v9481_v63 = vld [vmem:[#allocation102_spill] sm:$0xff] }
 0x4fc   : > { %v3667_v19 = vpop.permute.xlu1 %3666  ;;  %v9480_v57 = vld [vmem:[#allocation97_spill] sm:$0xff] }
 0x4fd   : > { %v4047_v30 = vpop.permute.xlu0 %4046  ;;  %v4258_v56 = vsel %vm4240_vm6, %v4225_v6, %v3667_v19  ;;  %v3052_v19 = vld [vmem:[#allocation3 + $0x181] sm:$0xff]  ;;  %v9479_v6 = vld [vmem:[#allocation81_spill] sm:$0xff]  ;;  %v4133_v18 = vsel %vm1799_vm2, %v5439_v45, %v9480_v57 }
 0x4fe   : > { %v4355_v58 = vsel %vm4339_vm11, %v4322_v48, %v4047_v30  ;;  %3686 = vrot.lane.b32.xlu1 %v2986_v28, %s5458_s13  ;;  %v3021_v30 = vld [vmem:[#allocation3 + $0x188] sm:$0xff] }
 0x4ff   : > { %4066 = vrot.lane.b32.xlu0 %v2986_v28, %s5461_s24  ;;  %5319 = vmatmul.mubr.msk.f32.gmra.mrb[30].mxu0 %vm4388_vm12, %v4355_v58 }
 0x500   : > { %v3795_v22 = vpop.permute.xlu1 %3794 }
 0x501   : > { %v3793_v1 = vpop.permute.xlu0 %3792  ;;  %v4291_v26 = vsel %vm4273_vm8, %v4258_v56, %v3795_v22  ;;  %v3055_v56 = vld [vmem:[#allocation3 + $0x1a1] sm:$0xff] }
 0x502   : > { %3432 = vrot.lane.b32.xlu1 %v2923_v23, %s5455_s21  ;;  %v4290_v59 = vsel %vm4273_vm8, %v4257_v14, %v3793_v1  ;;  %v3053_v14 = vld [vmem:[#allocation3 + $0x189] sm:$0xff] }
 0x503   : > { %3812 = vrot.lane.b32.xlu0 %v2923_v23, %s5459_s18 }
 0x504   : > { %v3541_v40 = vpop.permute.xlu1 %3540 }
 0x505   : > { %v3921_v35 = vpop.permute.xlu0 %3920  ;;  %v4226_v0 = vsel %vm1997_vm9, %v4194_v4, %v3541_v40  ;;  %v4195_v40 = vsel %vm1931_vm7, %v4163_v3, %v9477_v32  ;;  %v4165_v4 = vsel %vm1865_vm5, %v4133_v18, %v9481_v63 }
 0x506   : > { %3940 = vrot.lane.b32.xlu1 %v3050_v12, %s5460_s23  ;;  %v4323_v52 = vsel %vm4306_vm10, %v4290_v59, %v3921_v35  ;;  %v3084_v35 = vld [vmem:[#allocation3 + $0x182] sm:$0xff] }
 0x507   : > { %3814 = vrot.lane.b32.xlu0 %v3019_v27, %s5459_s18 }
 0x508   : > { %v4049_v13 = vpop.permute.xlu1 %4048 }
 0x509   : > { %v4356_v51 = vsel %vm4339_vm11, %v4323_v52, %v4049_v13  ;;  %v3923_v8 = vpop.permute.xlu0 %3922 }
 0x50a   : > { %3560 = vrot.lane.b32.xlu1 %v3050_v12, %s5457_s15  ;;  %5321 = vmatprep.mubr.msk.f32.mxu0 %vm4388_vm12, %v4356_v51  ;;  %v4324_v54 = vsel %vm4306_vm10, %v4291_v26, %v3923_v8 }
 0x50b   : > { %3434 = vrot.lane.b32.xlu0 %v3019_v27, %s5455_s21 }
 0x50c   : > { %v3669_v60 = vpop.permute.xlu1 %3668 }
 0x50d   : > { %v3543_v38 = vpop.permute.xlu0 %3542  ;;  %v4259_v48 = vsel %vm4240_vm6, %v4226_v0, %v3669_v60  ;;  %v3022_v60 = vld [vmem:[#allocation3 + $0x198] sm:$0xff] }
 0x50e   : > { %4068 = vrot.lane.b32.xlu1 %v3082_v5, %s5461_s24  ;;  %v4227_v12 = vsel %vm1997_vm9, %v4195_v40, %v3543_v38  ;;  %v9478_v38 = vld [vmem:[#allocation61_spill] sm:$0xff] }
 0x50f   : > { %3942 = vrot.lane.b32.xlu0 %v3051_v46, %s5460_s23 }
 0x510   : > { %v3671_v9 = vpop.permute.xlu1 %3670 }
 0x511   : > { %v4051_v49 = vpop.permute.xlu0 %4050  ;;  %v4260_v27 = vsel %vm4240_vm6, %v4227_v12, %v3671_v9  ;;  %v8653_v12 = vld [vmem:[%s8964_s8] ss:$0 sm:$0xff] }
 0x512   : > { %v4357_v53 = vsel %vm4339_vm11, %v4324_v54, %v4051_v49  ;;  %3688 = vrot.lane.b32.xlu1 %v3082_v5, %s5458_s13  ;;  %v4132_v5 = vsel %vm1799_vm2, %v5438_v7, %v9478_v38  ;;  %v3054_v54 = vld [vmem:[#allocation3 + $0x199] sm:$0xff] }
 0x513   : > { %3562 = vrot.lane.b32.xlu0 %v3051_v46, %s5457_s15  ;;  %5322 = vmatmul.mubr.msk.f32.gmra.mrb[32].mxu0 %vm4388_vm12, %v4357_v53  ;;  %v4164_v46 = vsel %vm1865_vm5, %v4132_v5, %v9479_v6 }
 0x514   : > { %v8559_v44 = vpop.permute.xlu1 %3416 }
 0x515   : > { %v3797_v34 = vpop.permute.xlu0 %3796  ;;  %v4196_v26 = vsel %vm1931_vm7, %v4164_v46, %v8559_v44 }
 0x516   : > { %3690 = vrot.lane.b32.xlu1 %v2988_v41, %s5458_s13  ;;  %v4292_v28 = vsel %vm4273_vm8, %v4259_v48, %v3797_v34 }
 0x517   : > { %4070 = vrot.lane.b32.xlu0 %v2988_v41, %s5461_s24 }
 0x518   : > { %v3925_v62 = vpop.permute.xlu1 %3924 }
 0x519   : > { %v3799_v16 = vpop.permute.xlu0 %3798  ;;  %v4325_v58 = vsel %vm4306_vm10, %v4292_v28, %v3925_v62  ;;  %v3087_v62 = vld [vmem:[#allocation3 + $0x1a2] sm:$0xff] }
 0x51a   : > { %3436 = vrot.lane.b32.xlu1 %v2925_v39, %s5455_s21  ;;  %v4293_v59 = vsel %vm4273_vm8, %v4260_v27, %v3799_v16 }
 0x51b   : > { %3816 = vrot.lane.b32.xlu0 %v2925_v39, %s5459_s18 }
 0x51c   : > { %v3545_v42 = vpop.permute.xlu1 %3544 }
 0x51d   : > { %v8572_v33 = vpop.permute.xlu0 %3418  ;;  %v4228_v49 = vsel %vm1997_vm9, %v4196_v26, %v3545_v42 }
 0x51e   : > { %3944 = vrot.lane.b32.xlu1 %v3052_v19, %s5460_s23  ;;  %v4197_v0 = vsel %vm1931_vm7, %v4165_v4, %v8572_v33  ;;  %v8640_v33 = vld [vmem:[%s8961_s5] ss:$0 sm:$0xff] }
 0x51f   : > { %3818 = vrot.lane.b32.xlu0 %v3021_v30, %s5459_s18 }
 0x520   : > { %v4053_v22 = vpop.permute.xlu1 %4052 }
 0x521   : > { %v4358_v1 = vsel %vm4339_vm11, %v4325_v58, %v4053_v22  ;;  %v3927_v23 = vpop.permute.xlu0 %3926 }
 0x522   : > { %3564 = vrot.lane.b32.xlu1 %v3052_v19, %s5457_s15  ;;  %5324 = vmatprep.mubr.msk.f32.mxu0 %vm4388_vm12, %v4358_v1  ;;  %v4326_v13 = vsel %vm4306_vm10, %v4293_v59, %v3927_v23  ;;  %v9483_v59 = vld [vmem:[#allocation131_spill] sm:$0xff] }
 0x523   : > { %3438 = vrot.lane.b32.xlu0 %v3021_v30, %s5455_s21 }
 0x524   : > { %v3673_v43 = vpop.permute.xlu1 %3672 }
 0x525   : > { %v3547_v36 = vpop.permute.xlu0 %3546  ;;  %v4261_v34 = vsel %vm4240_vm6, %v4228_v49, %v3673_v43  ;;  %v9486_v49 = vld [vmem:[#allocation16_spill] sm:$0xff] }
 0x526   : > { %4072 = vrot.lane.b32.xlu1 %v3084_v35, %s5461_s24  ;;  %v4229_v48 = vsel %vm1997_vm9, %v4197_v0, %v3547_v36 }
 0x527   : > { %3946 = vrot.lane.b32.xlu0 %v3053_v14, %s5460_s23 }
 0x528   : > { %v3675_v52 = vpop.permute.xlu1 %3674 }
 0x529   : > { %v4055_v51 = vpop.permute.xlu0 %4054  ;;  %v4262_v30 = vsel %vm4240_vm6, %v4229_v48, %v3675_v52  ;;  %v4134_v52 = vsel %vm1799_vm2, %v8339_v61, %v9483_v59 }
 0x52a   : > { %v4359_v8 = vsel %vm4339_vm11, %v4326_v13, %v4055_v51  ;;  %3692 = vrot.lane.b32.xlu1 %v3084_v35, %s5458_s13  ;;  %v9484_v51 = vld [vmem:[#allocation5_spill] sm:$0xff] }
 0x52b   : > { %3566 = vrot.lane.b32.xlu0 %v3053_v14, %s5457_s15  ;;  %5325 = vmatmul.mubr.msk.f32.gmra.mrb[34].mxu0 %vm4388_vm12, %v4359_v8  ;;  %v9482_v14 = vld [vmem:[#allocation62_spill] sm:$0xff]  ;;  %v2553_v8 = vadd.f32 %v8653_v12, %v9484_v51 }
 0x52c   : > { %v8599_v55 = vpop.permute.xlu1 %3420  ;;  %v2558_v27 = vadd.f32 %v8653_v12, %v9482_v14 }
 0x52d   : > { %v3801_v24 = vpop.permute.xlu0 %3800 }
 0x52e   : > { %3694 = vrot.lane.b32.xlu1 %v2990_v15, %s5458_s13  ;;  %v4294_v41 = vsel %vm4273_vm8, %v4261_v34, %v3801_v24  ;;  %v9485_v24 = vld [vmem:[#allocation101_spill] sm:$0xff]  ;;  %s8670_s13 = scalar_lea.vmem %s8965_s9, %s5046_s12  ;;  %v9487_v34 = vld [vmem:[#allocation27_spill] sm:$0xff] }
 0x52f   : > { %4074 = vrot.lane.b32.xlu0 %v2990_v15, %s5461_s24  ;;  %v4166_v15 = vsel %vm1865_vm5, %v4134_v52, %v9485_v24 }
 0x530   : > { %v3929_v10 = vpop.permute.xlu1 %3928  ;;  %v4198_v61 = vsel %vm1931_vm7, %v4166_v15, %v8599_v55 }
 0x531   : > { %v3803_v37 = vpop.permute.xlu0 %3802  ;;  %v4327_v16 = vsel %vm4306_vm10, %v4294_v41, %v3929_v10 }
 0x532   : > { %3822 = vrot.lane.b32.xlu1 %v3023_v2, %s5459_s18  ;;  %v4295_v28 = vsel %vm4273_vm8, %v4262_v30, %v3803_v37  ;;  %v9488_v30 = vld [vmem:[#allocation7_spill] sm:$0xff] }
 0x533   : > { %3820 = vrot.lane.b32.xlu0 %v3022_v60, %s5459_s18 }
 0x534   : > { %v3549_v9 = vpop.permute.xlu1 %3548 }
 0x535   : > { %v8612_v53 = vpop.permute.xlu0 %3422  ;;  %v4230_v7 = vsel %vm1997_vm9, %v4198_v61, %v3549_v9  ;;  %v4135_v9 = vsel %vm1799_vm2, %v8350_v11, %v9486_v49  ;;  %v9492_v61 = vld [vmem:[#allocation59_spill] sm:$0xff] }
 0x536   : > { %3950 = vrot.lane.b32.xlu1 %v3055_v56, %s5460_s23  ;;  %v4167_v41 = vsel %vm1865_vm5, %v4135_v9, %v9487_v34 }
 0x537   : > { %3948 = vrot.lane.b32.xlu0 %v3054_v54, %s5460_s23 }
 0x538   : > { %v4057_v39 = vpop.permute.xlu1 %4056 }
 0x539   : > { %v4360_v44 = vsel %vm4339_vm11, %v4327_v16, %v4057_v39  ;;  %v3931_v21 = vpop.permute.xlu0 %3930  ;;  %v4199_v16 = vsel %vm1931_vm7, %v4167_v41, %v8612_v53  ;;  %v9494_v41 = vld [vmem:[#allocation66_spill] sm:$0xff] }
 0x53a   : > { %4078 = vrot.lane.b32.xlu1 %v3087_v62, %s5461_s24  ;;  %5327 = vmatprep.mubr.msk.f32.mxu0 %vm4388_vm12, %v4360_v44  ;;  %v4328_v22 = vsel %vm4306_vm10, %v4295_v28, %v3931_v21  ;;  %v2568_v28 = vadd.f32 %v8653_v12, %v9488_v30  ;;  %v9497_v30 = vld [vmem:[#allocation68_spill] sm:$0xff] }
 0x53b   : > { %4076 = vrot.lane.b32.xlu0 %v3086_v17, %s5461_s24 }
 0x53c   : > { %v3677_v42 = vpop.permute.xlu1 %3676 }
 0x53d   : > { %v3551_v19 = vpop.permute.xlu0 %3550  ;;  %v4263_v6 = vsel %vm4240_vm6, %v4230_v7, %v3677_v42 }
 0x53e   : > { %v4231_v17 = vsel %vm1997_vm9, %v4199_v16, %v3551_v19 }
 0x540   : > { %v3679_v58 = vpop.permute.xlu1 %3678 }
 0x541   : > { %v4059_v1 = vpop.permute.xlu0 %4058  ;;  %v4264_v44 = vsel %vm4240_vm6, %v4231_v17, %v3679_v58  ;;  %v9495_v17 = vld [vmem:[#allocation11_spill] sm:$0xff] }
 0x542   : > { %v4361_v23 = vsel %vm4339_vm11, %v4328_v22, %v4059_v1  ;;  %v9489_v22 = vld [vmem:[#allocation67_spill] sm:$0xff] }
 0x543   : > { %5328 = vmatmul.mubr.msk.f32.gmra.mrb[36].mxu0 %vm4388_vm12, %v4361_v23  ;;  %v2563_v1 = vadd.f32 %v8653_v12, %v9489_v22 }
 0x544   : > { %v8635_v47 = vpop.permute.xlu1 %3424 }
 0x545   : > { %v3805_v31 = vpop.permute.xlu0 %3804 }
 0x546   : > { %v5299_v20 = vpop.f32.mrb[16].mxu0  ;;  %v4296_v46 = vsel %vm4273_vm8, %v4263_v6, %v3805_v31 }
 0x547   : > { %v4557_v3 = vadd.f32 %v5299_v20, %v8640_v33  ;;  %v4551_v43 = vpop.f32.mrb[17].mxu0 }
 0x548   : > { %v4552_v32 = vadd.f32 %v8640_v33, %v4551_v43  ;;  %v3933_v40 = vpop.permute.xlu1 %3932 }
 0x549   : > { %vm4711_vm13 = vcmp.gt.f32.partialorder %v4557_v3, 0.0  ;;  %v4750_v36 = vmul.f32 %v8645_v50, %v4557_v3  ;;  %v3807_v35 = vpop.permute.xlu0 %3806  ;;  %v4329_v56 = vsel %vm4306_vm10, %v4296_v46, %v3933_v40  ;;  %v9490_v40 = vld [vmem:[#allocation130_spill] sm:$0xff] }
 0x54a   : > { %vm4710_vm14 = vcmp.gt.f32.partialorder %v4552_v32, 0.0  ;;  %v4749_v13 = vmul.f32 %v8645_v50, %v4552_v32  ;;  %v4297_v21 = vsel %vm4273_vm8, %v4264_v44, %v3807_v35  ;;  %v9491_v35 = vld [vmem:[#allocation25_spill] sm:$0xff]  ;;  %v2573_v44 = vadd.f32 %v8653_v12, %v9495_v17 }
 0x54b   : > { %v4782_v2 = vsel %vm4711_vm13, %v4557_v3, %v4750_v36  ;;  %v4136_v36 = vsel %vm1799_vm2, %v8389_v25, %v9490_v40 }
 0x54c   : > { %v4814_v10 = vadd.f32 %v4782_v2, %v2558_v27  ;;  %v4781_v60 = vsel %vm4710_vm14, %v4552_v32, %v4749_v13  ;;  %v3553_v37 = vpop.permute.xlu1 %3552  ;;  %v4168_v14 = vsel %vm1865_vm5, %v4136_v36, %v9491_v35  ;;  %v2826_v36 = vld [vmem:[#allocation3 + $0x140] sm:$0xff] }
 0x54d   : > { %v4813_v38 = vadd.f32 %v4781_v60, %v2553_v8  ;;  %v3427_v5 = vpop.permute.xlu0 %3426  ;;  %v4200_v27 = vsel %vm1931_vm7, %v4168_v14, %v8635_v47  ;;  %v4137_v47 = vsel %vm1799_vm2, %v8404_v29, %v9492_v61  ;;  %v9500_v61 = vld [vmem:[#allocation70_spill] sm:$0xff] }
 0x54e   : > { %4846 = vst.msk [vmem:[%s8670_s13 + $0x8] sm:$0xff] %vm1799_vm2, %v4814_v10  ;;  %v4232_v52 = vsel %vm1997_vm9, %v4200_v27, %v3553_v37  ;;  %v9493_v10 = vld [vmem:[#allocation114_spill] sm:$0xff] }
 0x54f   : > { %4845 = vst.msk [vmem:[%s8670_s13] sm:$0xff] %vm1799_vm2, %v4813_v38  ;;  %v4169_v60 = vsel %vm1865_vm5, %v4137_v47, %v9493_v10  ;;  %v2588_v47 = vadd.f32 %v8653_v12, %v9500_v61 }
 0x550   : > { %v4061_v26 = vpop.permute.xlu1 %4060  ;;  %v4201_v7 = vsel %vm1931_vm7, %v4169_v60, %v3427_v5 }
 0x551   : > { %v4362_v55 = vsel %vm4339_vm11, %v4329_v56, %v4061_v26  ;;  %v3935_v54 = vpop.permute.xlu0 %3934 }
 0x552   : > { %5330 = vmatprep.mubr.msk.f32.mxu0 %vm4388_vm12, %v4362_v55  ;;  %v4330_v57 = vsel %vm4306_vm10, %v4297_v21, %v3935_v54 }
 0x554   : > { %v3681_v62 = vpop.permute.xlu1 %3680 }
 0x555   : > { %v3555_v39 = vpop.permute.xlu0 %3554  ;;  %v4265_v51 = vsel %vm4240_vm6, %v4232_v52, %v3681_v62  ;;  %v2578_v62 = vadd.f32 %v8653_v12, %v9494_v41  ;;  %v9499_v52 = vld [vmem:[#allocation135_spill] sm:$0xff] }
 0x556   : > { %v4233_v6 = vsel %vm1997_vm9, %v4201_v7, %v3555_v39 }
 0x558   : > { %v3683_v45 = vpop.permute.xlu1 %3682 }
 0x559   : > { %v4063_v18 = vpop.permute.xlu0 %4062  ;;  %v4266_v56 = vsel %vm4240_vm6, %v4233_v6, %v3683_v45 }
 0x55a   : > { %v4363_v11 = vsel %vm4339_vm11, %v4330_v57, %v4063_v18  ;;  %v5302_v63 = vpop.f32.mrb[18].mxu0 }
 0x55b   : > { %v4567_v4 = vadd.f32 %v5302_v63, %v8640_v33  ;;  %v4561_v42 = vpop.f32.mrb[19].mxu0  ;;  %5331 = vmatmul.mubr.msk.f32.gmra.mrb[38].mxu0 %vm4388_vm12, %v4363_v11 }
 0x55c   : > { %v4562_v53 = vadd.f32 %v8640_v33, %v4561_v42  ;;  %v8699_v0 = vpop.permute.xlu1 %3428  ;;  %v2825_v42 = vld [vmem:[#allocation3 + $0x138] sm:$0xff] }
 0x55d   : > { %vm4713_vm15 = vcmp.gt.f32.partialorder %v4567_v4, 0.0  ;;  %v4752_v19 = vmul.f32 %v8645_v50, %v4567_v4  ;;  %v3809_v48 = vpop.permute.xlu0 %3808 }
 0x55e   : > { %vm4712_vm0 = vcmp.gt.f32.partialorder %v4562_v53, 0.0  ;;  %v4751_v58 = vmul.f32 %v8645_v50, %v4562_v53  ;;  %v4298_v8 = vsel %vm4273_vm8, %v4265_v51, %v3809_v48 }
 0x55f   : > { %v4784_v23 = vsel %vm4713_vm15, %v4567_v4, %v4752_v19  ;;  %v9496_v19 = vld [vmem:[#allocation80_spill] sm:$0xff] }
 0x560   : > { %v4816_v31 = vadd.f32 %v4784_v23, %v2568_v28  ;;  %v4783_v20 = vsel %vm4712_vm0, %v4562_v53, %v4751_v58  ;;  %v3937_v3 = vpop.permute.xlu1 %3936  ;;  %v4138_v48 = vsel %vm1799_vm2, %v2825_v42, %v9496_v19 }
 0x561   : > { %v4815_v43 = vadd.f32 %v4783_v20, %v2563_v1  ;;  %v3811_v32 = vpop.permute.xlu0 %3810  ;;  %v4331_v25 = vsel %vm4306_vm10, %v4298_v8, %v3937_v3  ;;  %v4170_v28 = vsel %vm1865_vm5, %v4138_v48, %v9497_v30 }
 0x562   : > { %4848 = vst.msk [vmem:[%s8670_s13 + $0x18] sm:$0xff] %vm1799_vm2, %v4816_v31  ;;  %v4299_v54 = vsel %vm4273_vm8, %v4266_v56, %v3811_v32  ;;  %v4202_v58 = vsel %vm1931_vm7, %v4170_v28, %v8699_v0  ;;  %v9498_v0 = vld [vmem:[#allocation36_spill] sm:$0xff] }
 0x563   : > { %4847 = vst.msk [vmem:[%s8670_s13 + $0x10] sm:$0xff] %vm1799_vm2, %v4815_v43  ;;  %v4139_v14 = vsel %vm1799_vm2, %v2826_v36, %v9498_v0 }
 0x564   : > { %v3557_v59 = vpop.permute.xlu1 %3556  ;;  %v4171_v51 = vsel %vm1865_vm5, %v4139_v14, %v9499_v52 }
 0x565   : > { %v8719_v13 = vpop.permute.xlu0 %3430  ;;  %v4234_v1 = vsel %vm1997_vm9, %v4202_v58, %v3557_v59 }
 0x568   : > { %v4065_v24 = vpop.permute.xlu1 %4064 }
 0x569   : > { %v4364_v15 = vsel %vm4339_vm11, %v4331_v25, %v4065_v24  ;;  %v3939_v2 = vpop.permute.xlu0 %3938  ;;  %v4203_v24 = vsel %vm1931_vm7, %v4171_v51, %v8719_v13 }
 0x56a   : > { %5333 = vmatprep.mubr.msk.f32.mxu0 %vm4388_vm12, %v4364_v15  ;;  %v4332_v9 = vsel %vm4306_vm10, %v4299_v54, %v3939_v2 }
 0x56c   : > { %v3685_v37 = vpop.permute.xlu1 %3684 }
 0x56d   : > { %v3559_v38 = vpop.permute.xlu0 %3558  ;;  %v4267_v31 = vsel %vm4240_vm6, %v4234_v1, %v3685_v37  ;;  %v9501_v37 = vld [vmem:[#allocation9_spill] sm:$0xff] }
 0x56e   : > { %v5305_v46 = vpop.f32.mrb[20].mxu0  ;;  %v4235_v10 = vsel %vm1997_vm9, %v4203_v24, %v3559_v38  ;;  %v2583_v7 = vadd.f32 %v8653_v12, %v9501_v37  ;;  %v9508_v37 = vld [vmem:[#allocation23_spill] sm:$0xff] }
 0x56f   : > { %v4577_v26 = vadd.f32 %v5305_v46, %v8640_v33  ;;  %v4571_v55 = vpop.f32.mrb[21].mxu0 }
 0x570   : > { %v4572_v49 = vadd.f32 %v8640_v33, %v4571_v55  ;;  %v3687_v29 = vpop.permute.xlu1 %3686 }
 0x571   : > { %vm4715_vm1 = vcmp.gt.f32.partialorder %v4577_v26, 0.0  ;;  %v4754_v5 = vmul.f32 %v8645_v50, %v4577_v26  ;;  %v4067_v34 = vpop.permute.xlu0 %4066  ;;  %v4268_v6 = vsel %vm4240_vm6, %v4235_v10, %v3687_v29 }
 0x572   : > { %vm4714_vm3 = vcmp.gt.f32.partialorder %v4572_v49, 0.0  ;;  %v4753_v16 = vmul.f32 %v8645_v50, %v4572_v49  ;;  %v4365_v39 = vsel %vm4339_vm11, %v4332_v9, %v4067_v34  ;;  %v2827_v34 = vld [vmem:[#allocation3 + $0x150] sm:$0xff] }
 0x573   : > { %v4786_v21 = vsel %vm4715_vm1, %v4577_v26, %v4754_v5  ;;  %5334 = vmatmul.mubr.msk.f32.gmra.mrb[40].mxu0 %vm4388_vm12, %v4365_v39  ;;  %v9503_v39 = vld [vmem:[#allocation44_spill] sm:$0xff] }
 0x574   : > { %v4818_v45 = vadd.f32 %v4786_v21, %v2578_v62  ;;  %v4785_v57 = vsel %vm4714_vm3, %v4572_v49, %v4753_v16  ;;  %v3433_v18 = vpop.permute.xlu1 %3432  ;;  %v9502_v62 = vld [vmem:[#allocation100_spill] sm:$0xff] }
 0x575   : > { %v4817_v11 = vadd.f32 %v4785_v57, %v2573_v44  ;;  %v3813_v63 = vpop.permute.xlu0 %3812  ;;  %v4140_v16 = vsel %vm1799_vm2, %v2827_v34, %v9502_v62 }
 0x576   : > { %4850 = vst.msk [vmem:[%s8670_s13 + $0x28] sm:$0xff] %vm1799_vm2, %v4818_v45  ;;  %v4300_v20 = vsel %vm4273_vm8, %v4267_v31, %v3813_v63  ;;  %v4172_v17 = vsel %vm1865_vm5, %v4140_v16, %v9503_v39  ;;  %v9504_v31 = vld [vmem:[#allocation34_spill] sm:$0xff] }
 0x577   : > { %4849 = vst.msk [vmem:[%s8670_s13 + $0x20] sm:$0xff] %vm1799_vm2, %v4817_v11  ;;  %v4204_v44 = vsel %vm1931_vm7, %v4172_v17, %v3433_v18 }
 0x578   : > { %v3941_v4 = vpop.permute.xlu1 %3940 }
 0x579   : > { %v3815_v53 = vpop.permute.xlu0 %3814  ;;  %v4333_v3 = vsel %vm4306_vm10, %v4300_v20, %v3941_v4 }
 0x57a   : > { %v4301_v46 = vsel %vm4273_vm8, %v4268_v6, %v3815_v53  ;;  %v9509_v6 = vld [vmem:[#allocation79_spill] sm:$0xff] }
 0x57c   : > { %v3561_v22 = vpop.permute.xlu1 %3560 }
 0x57d   : > { %v8757_v23 = vpop.permute.xlu0 %3434  ;;  %v4236_v45 = vsel %vm1997_vm9, %v4204_v44, %v3561_v22  ;;  %v2828_v22 = vld [vmem:[#allocation3 + $0x158] sm:$0xff] }
 0x57e   : > { %v4141_v20 = vsel %vm1799_vm2, %v2828_v22, %v9504_v31 }
 0x580   : > { %v4069_v43 = vpop.permute.xlu1 %4068 }
 0x581   : > { %v4366_v32 = vsel %vm4339_vm11, %v4333_v3, %v4069_v43  ;;  %v3943_v40 = vpop.permute.xlu0 %3942  ;;  %v9505_v43 = vld [vmem:[#allocation134_spill] sm:$0xff] }
 0x582   : > { %v5308_v35 = vpop.f32.mrb[22].mxu0  ;;  %5336 = vmatprep.mubr.msk.f32.mxu0 %vm4388_vm12, %v4366_v32  ;;  %v4334_v54 = vsel %vm4306_vm10, %v4301_v46, %v3943_v40  ;;  %v4173_v32 = vsel %vm1865_vm5, %v4141_v20, %v9505_v43  ;;  %v9506_v40 = vld [vmem:[#allocation69_spill] sm:$0xff]  ;;  %v9510_v46 = vld [vmem:[#allocation42_spill] sm:$0xff] }
 0x583   : > { %v4587_v27 = vadd.f32 %v5308_v35, %v8640_v33  ;;  %v4581_v59 = vpop.f32.mrb[23].mxu0  ;;  %v4205_v14 = vsel %vm1931_vm7, %v4173_v32, %v8757_v23 }
 0x584   : > { %v4582_v8 = vadd.f32 %v8640_v33, %v4581_v59  ;;  %v3689_v25 = vpop.permute.xlu1 %3688 }
 0x585   : > { %vm4717_vm4 = vcmp.gt.f32.partialorder %v4587_v27, 0.0  ;;  %v4756_v15 = vmul.f32 %v8645_v50, %v4587_v27  ;;  %v3563_v2 = vpop.permute.xlu0 %3562  ;;  %v4269_v11 = vsel %vm4240_vm6, %v4236_v45, %v3689_v25 }
 0x586   : > { %vm4716_vm13 = vcmp.gt.f32.partialorder %v4582_v8, 0.0  ;;  %v4755_v60 = vmul.f32 %v8645_v50, %v4582_v8  ;;  %v4237_v51 = vsel %vm1997_vm9, %v4205_v14, %v3563_v2  ;;  %v2830_v2 = vld [vmem:[#allocation3 + $0x170] sm:$0xff] }
 0x587   : > { %v4788_v13 = vsel %vm4717_vm4, %v4587_v27, %v4756_v15  ;;  %v9507_v27 = vld [vmem:[#allocation14_spill] sm:$0xff] }
 0x588   : > { %v4820_v56 = vadd.f32 %v4788_v13, %v2588_v47  ;;  %v4787_v26 = vsel %vm4716_vm13, %v4582_v8, %v4755_v60  ;;  %v3691_v55 = vpop.permute.xlu1 %3690  ;;  %v2829_v60 = vld [vmem:[#allocation3 + $0x168] sm:$0xff]  ;;  %v4143_v13 = vsel %vm1799_vm2, %v2830_v2, %v9509_v6 }
 0x589   : > { %v4819_v49 = vadd.f32 %v4787_v26, %v2583_v7  ;;  %v4071_v9 = vpop.permute.xlu0 %4070  ;;  %v4270_v8 = vsel %vm4240_vm6, %v4237_v51, %v3691_v55  ;;  %v4142_v7 = vsel %vm1799_vm2, %v2829_v60, %v9508_v37  ;;  %v9511_v55 = vld [vmem:[#allocation84_spill] sm:$0xff] }
 0x58a   : > { %4852 = vst.msk [vmem:[%s8670_s13 + $0x38] sm:$0xff] %vm1799_vm2, %v4820_v56  ;;  %v4367_v38 = vsel %vm4339_vm11, %v4334_v54, %v4071_v9  ;;  %v4174_v56 = vsel %vm1865_vm5, %v4142_v7, %v9510_v46  ;;  %v4175_v54 = vsel %vm1865_vm5, %v4143_v13, %v9511_v55 }
 0x58b   : > { %4851 = vst.msk [vmem:[%s8670_s13 + $0x30] sm:$0xff] %vm1799_vm2, %v4819_v49  ;;  %5337 = vmatmul.mubr.msk.f32.gmra.mrb[42].mxu0 %vm4388_vm12, %v4367_v38 }
 0x58c   : > { %v3437_v12 = vpop.permute.xlu1 %3436 }
 0x58d   : > { %v3817_v29 = vpop.permute.xlu0 %3816  ;;  %v4206_v49 = vsel %vm1931_vm7, %v4174_v56, %v3437_v12  ;;  %v9518_v56 = vld [vmem:[#allocation20_spill] sm:$0xff] }
 0x58e   : > { %v4302_v4 = vsel %vm4273_vm8, %v4269_v11, %v3817_v29 }
 0x590   : > { %v3945_v5 = vpop.permute.xlu1 %3944 }
 0x591   : > { %v3819_v41 = vpop.permute.xlu0 %3818  ;;  %v4335_v19 = vsel %vm4306_vm10, %v4302_v4, %v3945_v5 }
 0x592   : > { %v4303_v25 = vsel %vm4273_vm8, %v4270_v8, %v3819_v41 }
 0x594   : > { %v3565_v21 = vpop.permute.xlu1 %3564 }
 0x595   : > { %v3439_v57 = vpop.permute.xlu0 %3438  ;;  %v4238_v38 = vsel %vm1997_vm9, %v4206_v49, %v3565_v21 }
 0x596   : > { %v5311_v63 = vpop.f32.mrb[24].mxu0  ;;  %v4207_v29 = vsel %vm1931_vm7, %v4175_v54, %v3439_v57  ;;  %v9519_v54 = vld [vmem:[#allocation18_spill] sm:$0xff] }
 0x597   : > { %v4597_v42 = vadd.f32 %v5311_v63, %v8640_v33  ;;  %v4591_v53 = vpop.f32.mrb[25].mxu0 }
 0x598   : > { %v4592_v48 = vadd.f32 %v8640_v33, %v4591_v53  ;;  %v4073_v30 = vpop.permute.xlu1 %4072 }
 0x599   : > { %vm4719_vm14 = vcmp.gt.f32.partialorder %v4597_v42, 0.0  ;;  %v4758_v18 = vmul.f32 %v8645_v50, %v4597_v42  ;;  %v4368_v28 = vsel %vm4339_vm11, %v4335_v19, %v4073_v30  ;;  %v3947_v58 = vpop.permute.xlu0 %3946 }
 0x59a   : > { %vm4718_vm15 = vcmp.gt.f32.partialorder %v4592_v48, 0.0  ;;  %v4757_v1 = vmul.f32 %v8645_v50, %v4592_v48  ;;  %5339 = vmatprep.mubr.msk.f32.mxu0 %vm4388_vm12, %v4368_v28  ;;  %v4336_v15 = vsel %vm4306_vm10, %v4303_v25, %v3947_v58  ;;  %v9513_v28 = vld [vmem:[#allocation12_spill] sm:$0xff] }
 0x59b   : > { %v4790_v3 = vsel %vm4719_vm14, %v4597_v42, %v4758_v18 }
 0x59c   : > { %v4822_v36 = vadd.f32 %v4790_v3, %v9506_v40  ;;  %v4789_v35 = vsel %vm4718_vm15, %v4592_v48, %v4757_v1  ;;  %v3693_v0 = vpop.permute.xlu1 %3692  ;;  %v9512_v48 = vld [vmem:[#allocation72_spill] sm:$0xff]  ;;  %v9514_v40 = vld [vmem:[#allocation71_spill] sm:$0xff] }
 0x59d   : > { %v4821_v59 = vadd.f32 %v4789_v35, %v9507_v27  ;;  %v3567_v52 = vpop.permute.xlu0 %3566  ;;  %v4271_v34 = vsel %vm4240_vm6, %v4238_v38, %v3693_v0  ;;  %v9515_v0 = vld [vmem:[#allocation17_spill] sm:$0xff] }
 0x59e   : > { %4854 = vst.msk [vmem:[%s8670_s13 + $0x48] sm:$0xff] %vm1799_vm2, %v4822_v36  ;;  %v4239_v41 = vsel %vm1997_vm9, %v4207_v29, %v3567_v52 }
 0x59f   : > { %4853 = vst.msk [vmem:[%s8670_s13 + $0x40] sm:$0xff] %vm1799_vm2, %v4821_v59 }
 0x5a0   : > { %v3695_v24 = vpop.permute.xlu1 %3694 }
 0x5a1   : > { %v4075_v61 = vpop.permute.xlu0 %4074  ;;  %v4272_v39 = vsel %vm4240_vm6, %v4239_v41, %v3695_v24 }
 0x5a2   : > { %v4369_v47 = vsel %vm4339_vm11, %v4336_v15, %v4075_v61  ;;  %v9516_v15 = vld [vmem:[#allocation15_spill] sm:$0xff] }
 0x5a3   : > { %5340 = vmatmul.mubr.msk.f32.gmra.mrb[44].mxu0 %vm4388_vm12, %v4369_v47 }
 0x5a4   : > { %v3823_v23 = vpop.permute.xlu1 %3822 }
 0x5a5   : > { %v3821_v10 = vpop.permute.xlu0 %3820  ;;  %v4305_v45 = vsel %vm4273_vm8, %v4272_v39, %v3823_v23  ;;  %v9517_v23 = vld [vmem:[#allocation73_spill] sm:$0xff] }
 0x5a6   : > { %v4304_v17 = vsel %vm4273_vm8, %v4271_v34, %v3821_v10 }
 0x5a8   : > { %v3951_v26 = vpop.permute.xlu1 %3950 }
 0x5a9   : > { %v3949_v9 = vpop.permute.xlu0 %3948  ;;  %v4338_v63 = vsel %vm4306_vm10, %v4305_v45, %v3951_v26 }
 0x5aa   : > { %v5314_v5 = vpop.f32.mrb[26].mxu0  ;;  %v4337_v21 = vsel %vm4306_vm10, %v4304_v17, %v3949_v9 }
 0x5ab   : > { %v4607_v62 = vadd.f32 %v5314_v5, %v8640_v33  ;;  %v4601_v16 = vpop.f32.mrb[27].mxu0 }
 0x5ac   : > { %v4602_v44 = vadd.f32 %v8640_v33, %v4601_v16  ;;  %v4079_v12 = vpop.permute.xlu1 %4078  ;;  %v9520_v16 = vld [vmem:[#allocation24_spill] sm:$0xff] }
 0x5ad   : > { %vm4721_vm5 = vcmp.gt.f32.partialorder %v4607_v62, 0.0  ;;  %v4760_v57 = vmul.f32 %v8645_v50, %v4607_v62  ;;  %v4077_v11 = vpop.permute.xlu0 %4076  ;;  %v4371_v19 = vsel %vm4339_vm11, %v4338_v63, %v4079_v12 }
 0x5ae   : > { %vm4720_vm7 = vcmp.gt.f32.partialorder %v4602_v44, 0.0  ;;  %v4759_v4 = vmul.f32 %v8645_v50, %v4602_v44  ;;  %v4370_v42 = vsel %vm4339_vm11, %v4337_v21, %v4077_v11 }
 0x5af   : > { %v4792_v53 = vsel %vm4721_vm5, %v4607_v62, %v4760_v57  ;;  %5342 = vmatprep.mubr.msk.f32.mxu0 %vm4388_vm12, %v4370_v42 }
 0x5b0   : > { %v4824_v30 = vadd.f32 %v4792_v53, %v9512_v48  ;;  %v4791_v18 = vsel %vm4720_vm7, %v4602_v44, %v4759_v4  ;;  %5343 = vmatmul.mubr.msk.f32.gmra.mrb[46].mxu0 %vm4388_vm12, %v4371_v19  ;;  %v9521_v44 = vld [vmem:[#allocation22_spill] sm:$0xff] }
 0x5b1   : > { %v4823_v58 = vadd.f32 %v4791_v18, %v9513_v28  ;;  %v9522_v53 = vld [vmem:[#allocation74_spill] sm:$0xff] }
 0x5b2   : > { %4856 = vst.msk [vmem:[%s8670_s13 + $0x58] sm:$0xff] %vm1799_vm2, %v4824_v30  ;;  %v9523_v30 = vld [vmem:[#allocation8_spill] sm:$0xff] }
 0x5b3   : > { %4855 = vst.msk [vmem:[%s8670_s13 + $0x50] sm:$0xff] %vm1799_vm2, %v4823_v58 }
 0x5be   : > { %v5317_v22 = vpop.f32.mrb[28].mxu0 }
 0x5bf   : > { %v4617_v1 = vadd.f32 %v5317_v22, %v8640_v33  ;;  %v4611_v31 = vpop.f32.mrb[29].mxu0 }
 0x5c0   : > { %v4612_v20 = vadd.f32 %v8640_v33, %v4611_v31 }
 0x5c1   : > { %vm4723_vm9 = vcmp.gt.f32.partialorder %v4617_v1, 0.0  ;;  %v4762_v3 = vmul.f32 %v8645_v50, %v4617_v1 }
 0x5c2   : > { %vm4722_vm6 = vcmp.gt.f32.partialorder %v4612_v20, 0.0  ;;  %v4761_v43 = vmul.f32 %v8645_v50, %v4612_v20 }
 0x5c3   : > { %v4794_v32 = vsel %vm4723_vm9, %v4617_v1, %v4762_v3 }
 0x5c4   : > { %v4826_v36 = vadd.f32 %v4794_v32, %v9514_v40  ;;  %v4793_v35 = vsel %vm4722_vm6, %v4612_v20, %v4761_v43  ;;  %v9524_v43 = vld [vmem:[#allocation94_spill] sm:$0xff] }
 0x5c5   : > { %v4825_v14 = vadd.f32 %v4793_v35, %v9515_v0 }
 0x5c6   : > { %4858 = vst.msk [vmem:[%s8670_s13 + $0x68] sm:$0xff] %vm1799_vm2, %v4826_v36  ;;  %v9525_v36 = vld [vmem:[#allocation53_spill] sm:$0xff] }
 0x5c7   : > { %4857 = vst.msk [vmem:[%s8670_s13 + $0x60] sm:$0xff] %vm1799_vm2, %v4825_v14 }
 0x5d2   : > { %v5320_v27 = vpop.f32.mrb[30].mxu0 }
 0x5d3   : > { %v4627_v59 = vadd.f32 %v5320_v27, %v8640_v33  ;;  %v4621_v52 = vpop.f32.mrb[31].mxu0 }
 0x5d4   : > { %v4622_v51 = vadd.f32 %v8640_v33, %v4621_v52 }
 0x5d5   : > { %vm4725_vm8 = vcmp.gt.f32.partialorder %v4627_v59, 0.0  ;;  %v4764_v8 = vmul.f32 %v8645_v50, %v4627_v59 }
 0x5d6   : > { %vm4724_vm10 = vcmp.gt.f32.partialorder %v4622_v51, 0.0  ;;  %v4763_v25 = vmul.f32 %v8645_v50, %v4622_v51 }
 0x5d7   : > { %v4796_v24 = vsel %vm4725_vm8, %v4627_v59, %v4764_v8 }
 0x5d8   : > { %v4828_v61 = vadd.f32 %v4796_v24, %v9516_v15  ;;  %v4795_v47 = vsel %vm4724_vm10, %v4622_v51, %v4763_v25  ;;  %v9526_v25 = vld [vmem:[#allocation6_spill] sm:$0xff] }
 0x5d9   : > { %v4827_v10 = vadd.f32 %v4795_v47, %v9517_v23 }
 0x5da   : > { %4860 = vst.msk [vmem:[%s8670_s13 + $0x78] sm:$0xff] %vm1799_vm2, %v4828_v61  ;;  %v9527_v61 = vld [vmem:[#allocation127_spill] sm:$0xff] }
 0x5db   : > { %4859 = vst.msk [vmem:[%s8670_s13 + $0x70] sm:$0xff] %vm1799_vm2, %v4827_v10 }
 0x5e6   : > { %v5323_v60 = vpop.f32.mrb[32].mxu0 }
 0x5e7   : > { %v4637_v2 = vadd.f32 %v5323_v60, %v8640_v33  ;;  %v4631_v37 = vpop.f32.mrb[33].mxu0 }
 0x5e8   : > { %v4632_v7 = vadd.f32 %v8640_v33, %v4631_v37 }
 0x5e9   : > { %vm4727_vm11 = vcmp.gt.f32.partialorder %v4637_v2, 0.0  ;;  %v4766_v6 = vmul.f32 %v8645_v50, %v4637_v2 }
 0x5ea   : > { %vm4726_vm12 = vcmp.gt.f32.partialorder %v4632_v7, 0.0  ;;  %v4765_v13 = vmul.f32 %v8645_v50, %v4632_v7 }
 0x5eb   : > { %v4798_v46 = vsel %vm4727_vm11, %v4637_v2, %v4766_v6 }
 0x5ec   : > { %v4830_v26 = vadd.f32 %v4798_v46, %v9518_v56  ;;  %v4797_v55 = vsel %vm4726_vm12, %v4632_v7, %v4765_v13  ;;  %v9528_v13 = vld [vmem:[#allocation51_spill] sm:$0xff] }
 0x5ed   : > { %v4829_v49 = vadd.f32 %v4797_v55, %v9519_v54 }
 0x5ee   : > { %4862 = vst.msk [vmem:[%s8670_s13 + $0x88] sm:$0xff] %vm1799_vm2, %v4830_v26  ;;  %v9529_v26 = vld [vmem:[#allocation126_spill] sm:$0xff] }
 0x5ef   : > { %4861 = vst.msk [vmem:[%s8670_s13 + $0x80] sm:$0xff] %vm1799_vm2, %v4829_v49 }
 0x5fe   : > { %v5326_v9 = vpop.f32.mrb[34].mxu0 }
 0x5ff   : > { %v4647_v38 = vadd.f32 %v5326_v9, %v8640_v33  ;;  %v4641_v29 = vpop.f32.mrb[35].mxu0 }
 0x600   : > { %v4642_v5 = vadd.f32 %v8640_v33, %v4641_v29 }
 0x601   : > { %vm4729_vm0 = vcmp.gt.f32.partialorder %v4647_v38, 0.0  ;;  %v4768_v34 = vmul.f32 %v8645_v50, %v4647_v38 }
 0x602   : > { %vm4728_vm1 = vcmp.gt.f32.partialorder %v4642_v5, 0.0  ;;  %v4767_v41 = vmul.f32 %v8645_v50, %v4642_v5 }
 0x603   : > { %v4800_v62 = vsel %vm4729_vm0, %v4647_v38, %v4768_v34 }
 0x604   : > { %v4832_v39 = vadd.f32 %v4800_v62, %v9520_v16  ;;  %v4799_v17 = vsel %vm4728_vm1, %v4642_v5, %v4767_v41  ;;  %v9530_v41 = vld [vmem:[#allocation28_spill] sm:$0xff] }
 0x605   : > { %v4831_v12 = vadd.f32 %v4799_v17, %v9521_v44 }
 0x606   : > { %4864 = vst.msk [vmem:[%s8670_s13 + $0x98] sm:$0xff] %vm1799_vm2, %v4832_v39  ;;  %v9531_v39 = vld [vmem:[#allocation76_spill] sm:$0xff] }
 0x607   : > { %4863 = vst.msk [vmem:[%s8670_s13 + $0x90] sm:$0xff] %vm1799_vm2, %v4831_v12 }
 0x616   : > { %v5329_v45 = vpop.f32.mrb[36].mxu0 }
 0x617   : > { %v4657_v21 = vadd.f32 %v5329_v45, %v8640_v33  ;;  %v4651_v57 = vpop.f32.mrb[37].mxu0 }
 0x618   : > { %v4652_v11 = vadd.f32 %v8640_v33, %v4651_v57 }
 0x619   : > { %vm4731_vm3 = vcmp.gt.f32.partialorder %v4657_v21, 0.0  ;;  %v4770_v63 = vmul.f32 %v8645_v50, %v4657_v21 }
 0x61a   : > { %vm4730_vm4 = vcmp.gt.f32.partialorder %v4652_v11, 0.0  ;;  %v4769_v4 = vmul.f32 %v8645_v50, %v4652_v11 }
 0x61b   : > { %v4802_v42 = vsel %vm4731_vm3, %v4657_v21, %v4770_v63 }
 0x61c   : > { %v4834_v19 = vadd.f32 %v4802_v42, %v9522_v53  ;;  %v4801_v48 = vsel %vm4730_vm4, %v4652_v11, %v4769_v4  ;;  %v9532_v4 = vld [vmem:[#allocation26_spill] sm:$0xff] }
 0x61d   : > { %v4833_v18 = vadd.f32 %v4801_v48, %v9523_v30 }
 0x61e   : > { %4866 = vst.msk [vmem:[%s8670_s13 + $0xa8] sm:$0xff] %vm1799_vm2, %v4834_v19  ;;  %v9533_v19 = vld [vmem:[#allocation96_spill] sm:$0xff] }
 0x61f   : > { %4865 = vst.msk [vmem:[%s8670_s13 + $0xa0] sm:$0xff] %vm1799_vm2, %v4833_v18 }
 0x62e   : > { %v5332_v28 = vpop.f32.mrb[38].mxu0 }
 0x62f   : > { %v4667_v58 = vadd.f32 %v5332_v28, %v8640_v33  ;;  %v4661_v22 = vpop.f32.mrb[39].mxu0 }
 0x630   : > { %v4662_v1 = vadd.f32 %v8640_v33, %v4661_v22 }
 0x631   : > { %vm4733_vm13 = vcmp.gt.f32.partialorder %v4667_v58, 0.0  ;;  %v4772_v31 = vmul.f32 %v8645_v50, %v4667_v58 }
 0x632   : > { %vm4732_vm14 = vcmp.gt.f32.partialorder %v4662_v1, 0.0  ;;  %v4771_v20 = vmul.f32 %v8645_v50, %v4662_v1 }
 0x633   : > { %v4804_v3 = vsel %vm4733_vm13, %v4667_v58, %v4772_v31 }
 0x634   : > { %v4836_v32 = vadd.f32 %v4804_v3, %v9524_v43  ;;  %v4803_v40 = vsel %vm4732_vm14, %v4662_v1, %v4771_v20 }
 0x635   : > { %v4835_v35 = vadd.f32 %v4803_v40, %v9525_v36 }
 0x636   : > { %4868 = vst.msk [vmem:[%s8670_s13 + $0xb8] sm:$0xff] %vm1799_vm2, %v4836_v32 }
 0x637   : > { %4867 = vst.msk [vmem:[%s8670_s13 + $0xb0] sm:$0xff] %vm1799_vm2, %v4835_v35 }
 0x646   : > { %v5335_v0 = vpop.f32.mrb[40].mxu0 }
 0x647   : > { %v4677_v14 = vadd.f32 %v5335_v0, %v8640_v33  ;;  %v4671_v27 = vpop.f32.mrb[41].mxu0 }
 0x648   : > { %v4672_v59 = vadd.f32 %v8640_v33, %v4671_v27 }
 0x649   : > { %vm4735_vm15 = vcmp.gt.f32.partialorder %v4677_v14, 0.0  ;;  %v4774_v52 = vmul.f32 %v8645_v50, %v4677_v14 }
 0x64a   : > { %vm4734_vm5 = vcmp.gt.f32.partialorder %v4672_v59, 0.0  ;;  %v4773_v51 = vmul.f32 %v8645_v50, %v4672_v59 }
 0x64b   : > { %v4806_v8 = vsel %vm4735_vm15, %v4677_v14, %v4774_v52 }
 0x64c   : > { %v4838_v24 = vadd.f32 %v4806_v8, %v9526_v25  ;;  %v4805_v15 = vsel %vm4734_vm5, %v4672_v59, %v4773_v51 }
 0x64d   : > { %v4837_v47 = vadd.f32 %v4805_v15, %v9527_v61 }
 0x64e   : > { %4870 = vst.msk [vmem:[%s8670_s13 + $0xc8] sm:$0xff] %vm1799_vm2, %v4838_v24 }
 0x64f   : > { %4869 = vst.msk [vmem:[%s8670_s13 + $0xc0] sm:$0xff] %vm1799_vm2, %v4837_v47 }
 0x65e   : > { %v5338_v23 = vpop.f32.mrb[42].mxu0 }
 0x65f   : > { %v4687_v10 = vadd.f32 %v5338_v23, %v8640_v33  ;;  %v4681_v60 = vpop.f32.mrb[43].mxu0 }
 0x660   : > { %v4682_v2 = vadd.f32 %v8640_v33, %v4681_v60 }
 0x661   : > { %vm4737_vm7 = vcmp.gt.f32.partialorder %v4687_v10, 0.0  ;;  %v4776_v37 = vmul.f32 %v8645_v50, %v4687_v10 }
 0x662   : > { %vm4736_vm9 = vcmp.gt.f32.partialorder %v4682_v2, 0.0  ;;  %v4775_v7 = vmul.f32 %v8645_v50, %v4682_v2 }
 0x663   : > { %v4808_v6 = vsel %vm4737_vm7, %v4687_v10, %v4776_v37 }
 0x664   : > { %v4840_v46 = vadd.f32 %v4808_v6, %v9528_v13  ;;  %v4807_v56 = vsel %vm4736_vm9, %v4682_v2, %v4775_v7 }
 0x665   : > { %v4839_v55 = vadd.f32 %v4807_v56, %v9529_v26 }
 0x666   : > { %4872 = vst.msk [vmem:[%s8670_s13 + $0xd8] sm:$0xff] %vm1799_vm2, %v4840_v46 }
 0x667   : > { %4871 = vst.msk [vmem:[%s8670_s13 + $0xd0] sm:$0xff] %vm1799_vm2, %v4839_v55 }
 0x676   : > { %v5341_v54 = vpop.f32.mrb[44].mxu0 }
 0x677   : > { %v4697_v49 = vadd.f32 %v5341_v54, %v8640_v33  ;;  %v4691_v9 = vpop.f32.mrb[45].mxu0 }
 0x678   : > { %v4692_v38 = vadd.f32 %v8640_v33, %v4691_v9 }
 0x679   : > { %vm4739_vm6 = vcmp.gt.f32.partialorder %v4697_v49, 0.0  ;;  %v4778_v29 = vmul.f32 %v8645_v50, %v4697_v49 }
 0x67a   : > { %vm4738_vm8 = vcmp.gt.f32.partialorder %v4692_v38, 0.0  ;;  %v4777_v5 = vmul.f32 %v8645_v50, %v4692_v38 }
 0x67b   : > { %v4810_v34 = vsel %vm4739_vm6, %v4697_v49, %v4778_v29 }
 0x67c   : > { %v4842_v62 = vadd.f32 %v4810_v34, %v9530_v41  ;;  %v4809_v16 = vsel %vm4738_vm8, %v4692_v38, %v4777_v5 }
 0x67d   : > { %v4841_v17 = vadd.f32 %v4809_v16, %v9531_v39 }
 0x67e   : > { %4874 = vst.msk [vmem:[%s8670_s13 + $0xe8] sm:$0xff] %vm1799_vm2, %v4842_v62 }
 0x67f   : > { %4873 = vst.msk [vmem:[%s8670_s13 + $0xe0] sm:$0xff] %vm1799_vm2, %v4841_v17 }
 0x683   : > { %v5344_v44 = vpop.f32.mrb[46].mxu0 }
 0x684   : > { %v4707_v12 = vadd.f32 %v5344_v44, %v8640_v33  ;;  %v4701_v45 = vpop.f32.mrb[47].mxu0 }
 0x685   : > { %v4702_v21 = vadd.f32 %v8640_v33, %v4701_v45 }
 0x686   : > { %vm4741_vm10 = vcmp.gt.f32.partialorder %v4707_v12, 0.0  ;;  %v4780_v57 = vmul.f32 %v8645_v50, %v4707_v12 }
 0x687   : > { %vm4740_vm11 = vcmp.gt.f32.partialorder %v4702_v21, 0.0  ;;  %v4779_v11 = vmul.f32 %v8645_v50, %v4702_v21 }
 0x688   : > { %v4812_v63 = vsel %vm4741_vm10, %v4707_v12, %v4780_v57 }
 0x689   : > { %v4844_v42 = vadd.f32 %v4812_v63, %v9532_v4  ;;  %v4811_v53 = vsel %vm4740_vm11, %v4702_v21, %v4779_v11 }
 0x68a   : > { %v4843_v48 = vadd.f32 %v4811_v53, %v9533_v19 }
 0x68b   : > { %4876 = vst.msk [vmem:[%s8670_s13 + $0xf8] sm:$0xff] %vm1799_vm2, %v4844_v42 }
 0x68c   : > { %4875 = vst.msk [vmem:[%s8670_s13 + $0xf0] sm:$0xff] %vm1799_vm2, %v4843_v48 }
 0x68d PF: > { %s19_s30 = sadd.s32 1, %s5447_s30  }
 0x68e   : > { %p16_p4 = scmp.ge.s32.totalorder %s19_s30, 4  }
 0x690   :  { %18 = sbr.rel (!%p16_p4) target bundleno = 1 (0x1), region = 90 }

</bundles_post_ra>
